<compile_context>
chip_gen: v6e
topology: v6e:2x2x1
jax: 0.10.0
libtpu: 0.0.40
codegen_flags: <defaults>
</compile_context>

<pallas_src>
import jax
import jax.numpy as jnp
import numpy as np
from jax.experimental import pallas as pl
from jax.experimental.pallas import tpu as pltpu


# ----------------------------------------------------------------------------
# Structure-matrix construction (host-side numpy, built once in the wrapper)
# ----------------------------------------------------------------------------
def _structure_part(w_np, P, W, OWC_pad, d, K=4):
    """Structure matrix of one row-shifted operand of a ConvTranspose2d(4,2,1).

    w_np : (Cin, Cout, K, K) slice of the PyTorch weight for these in-channels.
    P    : logical image rows packed per stored row of the input slab.
    W    : logical input spatial width.
    d    : stored-row offset of the operand (0: A[j], -1: A[j-1], +1: A[j+1]).

    Input lane layout : t*(W*Cin) + iw*Cin + ci      (t in [0,P))
    Output lane layout: u*OWC_pad + ow*Cout + co     (u in [0,2P), ow in [0,2W))
    Entry = w[ci, co, kh, kw] with kh = u - 2*t + 1 - 2*P*d, kw = ow - 2*iw + 1
    when both taps are in [0, K), else 0.
    """
    Cin, Cout = int(w_np.shape[0]), int(w_np.shape[1])
    Q, OW = 2 * P, 2 * W
    t = np.arange(P)
    u = np.arange(Q)
    kh = u[None, :] - 2 * t[:, None] + 1 - 2 * P * d            # (P, Q)
    okh = (kh >= 0) & (kh < K)
    iw = np.arange(W)
    ow = np.arange(OW)
    kw = ow[None, :] - 2 * iw[:, None] + 1                      # (W, OW)
    okw = (kw >= 0) & (kw < K)

    wk = w_np[:, :, np.clip(kh, 0, K - 1)]                      # (Cin,Cout,P,Q,K)
    wk = wk[..., np.clip(kw, 0, K - 1)]                         # (Cin,Cout,P,Q,W,OW)
    wk = wk * (okh[None, None, :, :, None, None] &
               okw[None, None, None, None, :, :])
    m = np.transpose(wk, (2, 4, 0, 3, 5, 1))                    # (P,W,Cin,Q,OW,Cout)

    full = np.zeros((P, W, Cin, Q, OWC_pad), np.float32)
    full[..., : OW * Cout] = m.reshape(P, W, Cin, Q, OW * Cout)
    return full.reshape(P * W * Cin, Q * OWC_pad)


def _build_block_matrix(w_np, P, W, Cy, Cs, OWC_pad):
    """Full per-block matrix matching a_aug = [ [y|skip], [y|skip]_dn, [y|skip]_up ]."""
    parts = []
    for d in (0, -1, 1):                      # A[j], A[j-1], A[j+1]
        sub = [_structure_part(w_np[:Cy], P, W, OWC_pad, d)]
        if Cs:
            sub.append(_structure_part(w_np[Cy:Cy + Cs], P, W, OWC_pad, d))
        parts.append(np.concatenate(sub, axis=0))
    return np.concatenate(parts, axis=0)      # (3 * P*W*(Cy+Cs), 2P*OWC_pad)


def _affine_row(vec, OW, Q, OWC_pad, pad_value):
    """Per-lane folded-BN scale/shift row for the packed output layout."""
    v = np.asarray(vec, np.float32)
    seg = np.full((OWC_pad,), pad_value, np.float32)
    seg[: OW * v.shape[0]] = np.tile(v, OW)
    return np.tile(seg, Q)[None, :]           # (1, Q*OWC_pad)


def _const_spec(arr):
    nd = arr.ndim
    return pl.BlockSpec(tuple(arr.shape), lambda n, _nd=nd: (0,) * _nd)


# ----------------------------------------------------------------------------
# Fused decoder kernel: Bt images per grid step, one wide matmul per block
# ----------------------------------------------------------------------------
def _make_decoder_kernel(block_meta, nskips):
    def kernel(*refs):
        out_ref = refs[-1]
        x_ref = refs[0]
        skip_refs = refs[1:1 + nskips]
        sdn_ref = refs[1 + nskips]
        sup_ref = refs[2 + nskips]
        widx = 3 + nskips

        sdn = sdn_ref[...]                       # (R, R) bf16, 0/1, image-aware
        sup = sup_ref[...]
        a = x_ref[0]                             # (R, W0*C0) bf16, row-packed
        y = None
        for b, (has_skip, act) in enumerate(block_meta):
            m_ref = refs[widx]
            sc_ref = refs[widx + 1]
            sh_ref = refs[widx + 2]
            widx += 3

            if has_skip:
                # torch.cat([x, skip], dim=1): single lane concat of two
                # lane-dense bf16 slabs (one matmul, full contraction depth).
                a = jnp.concatenate([a, skip_refs[b - 1][0]], axis=-1)

            # +/-1 stored-row shifted copies.  Exact 0/1 bf16 matmuls with the
            # image-boundary zeros baked into sdn/sup (no cross-image leakage).
            a_dn = jnp.dot(sdn, a, preferred_element_type=jnp.float32).astype(a.dtype)
            a_up = jnp.dot(sup, a, preferred_element_type=jnp.float32).astype(a.dtype)
            a_aug = jnp.concatenate([a, a_dn, a_up], axis=-1)

            # Whole transposed conv (all 4 kernel rows + row scatter) as ONE
            # wide matmul onto the row-packed output slab.
            y = jnp.dot(a_aug, m_ref[...], preferred_element_type=jnp.float32)

            # Folded BN + bias, applied once per block.
            y = y * sc_ref[...] + sh_ref[...]
            if act == "relu":
                y = jnp.maximum(y, 0.0)
                # TODO(synk): Dropout(p=0.6) identity (eval mode only).
            else:
                y = jax.nn.sigmoid(y)
            a = y.astype(jnp.bfloat16)           # feeds the next block

        out_ref[...] = y.reshape(out_ref.shape)
    return kernel


# ----------------------------------------------------------------------------
# Decoder forward (single fused Pallas call)
# ----------------------------------------------------------------------------
def decoder_forward(params, x_nchw, skips_nchw, *, K, stride, pad, batch_tile=None):
    assert K == 4 and stride == 2 and pad == 1, "structure matrices assume K=4,s=2,p=1"
    N, C0, H0, W0 = x_nchw.shape
    skips_rev = skips_nchw[::-1]

    if batch_tile is None:
        # Pack several images per grid step (fills the matmul M-dim) while
        # keeping the parallel grid >= 2 so both v7x TensorCores stay busy.
        batch_tile = max(1, min(8, N // 2))
        while N % batch_tile:
            batch_tile -= 1
    Bt = batch_tile
    G = N // Bt
    rows_per_img = H0                        # stored rows per image, all blocks
    R = Bt * rows_per_img

    def pack(t_nchw, p):
        # NCHW -> row-packed bf16 slab (G, Bt*H/p, p*W*C); stored row j holds
        # logical rows p*j .. p*j+p-1 back-to-back along lanes.
        n, c, h, w = t_nchw.shape
        t = jnp.transpose(t_nchw, (0, 2, 3, 1)).reshape(n, h // p, p * w * c)
        return t.reshape(G, Bt * (h // p), p * w * c).astype(jnp.bfloat16)

    x_packed = pack(x_nchw, 1)
    skip_packed = [pack(skips_rev[i], 2 ** i) for i in range(1, len(params))]

    # Shared 0/1 stored-row shift matrices with image-boundary zeros.
    sdn = np.zeros((R, R), np.float32)
    sup = np.zeros((R, R), np.float32)
    for j in range(R):
        if j % rows_per_img != 0:
            sdn[j, j - 1] = 1.0               # a_dn[j] = a[j-1]
        if j % rows_per_img != rows_per_img - 1:
            sup[j, j + 1] = 1.0               # a_up[j] = a[j+1]

    const_ops = [jnp.asarray(sdn, jnp.bfloat16), jnp.asarray(sup, jnp.bfloat16)]
    block_meta = []
    P, W, Cy = 1, W0, C0
    Q = 2 * P
    owc_pad = 0
    for i, prm in enumerate(params):
        w_np = np.asarray(prm["w"], np.float32)       # (Cin, Cout, K, K) PyTorch layout
        cin_total, cout = int(w_np.shape[0]), int(w_np.shape[1])
        has_skip = i > 0
        cs = cin_total - Cy if has_skip else 0
        OW = 2 * W
        owc = OW * cout
        is_last = i == len(params) - 1
        # Lane-dense final store: pad the last block's row width up to 128.
        owc_pad = ((owc + 127) // 128) * 128 if is_last else owc
        Q = 2 * P

        m = _build_block_matrix(w_np, P, W, Cy, cs, owc_pad)
        sc = _affine_row(prm["scale"], OW, Q, owc_pad, 1.0)
        sh = _affine_row(prm["shift"], OW, Q, owc_pad, 0.0)
        const_ops += [jnp.asarray(m, jnp.bfloat16),
                      jnp.asarray(sc, jnp.float32),
                      jnp.asarray(sh, jnp.float32)]
        block_meta.append((has_skip, prm["act"]))
        P, W, Cy = Q, OW, cout                         # next block's input geometry

    out_w = Q * owc_pad
    OH_f, OW_f, C_f = rows_per_img * P, W, Cy

    operands = [x_packed] + skip_packed + const_ops
    in_specs = ([pl.BlockSpec((1, R, int(t.shape[-1])), lambda n: (n, 0, 0))
                 for t in [x_packed] + skip_packed]
                + [_const_spec(t) for t in const_ops])

    kernel = _make_decoder_kernel(block_meta, nskips=len(skip_packed))
    out = pl.pallas_call(
        kernel,
        out_shape=jax.ShapeDtypeStruct((G, R, out_w), jnp.float32),
        grid=(G,),
        in_specs=in_specs,
        out_specs=pl.BlockSpec((1, R, out_w), lambda n: (n, 0, 0)),
        compiler_params=pltpu.CompilerParams(
            dimension_semantics=("parallel",)),        # v7x: images split across TCs
    )(*operands)

    # Unpack: (G, Bt*4, 8*128) -> (N, OH, OW, C) -> NCHW (kept in the wrapper
    # only because the test compares against an NCHW reference).
    out = out.reshape(G, Bt, rows_per_img, P, owc_pad)
    out = out.reshape(N, OH_f, owc_pad)[:, :, : OW_f * C_f]
    out = out.reshape(N, OH_f, OW_f, C_f)
    return jnp.transpose(out, (0, 3, 1, 2))


# ----------------------------------------------------------------------------
# Parameter construction (deterministic, synthetic) — PyTorch weight layout
# ----------------------------------------------------------------------------
def init_decoder_params(key, input_features, features, kernel_size, noise_dim):
    specs = []
    for i in range(len(features) - 1, 0, -1):
        cin = features[i] + noise_dim if i == len(features) - 1 else features[i] * 2
        specs.append((cin, features[i - 1], True))           # ConvT+BN+ReLU(+Dropout)
    specs.append((features[0] * 2, input_features, False))   # ConvT+Sigmoid

    params = []
    eps = 1e-5
    for cin, cout, has_bn in specs:
        key, k1, k2, k3, k4, k5, k6 = jax.random.split(key, 7)
        bound = 1.0 / np.sqrt(cin * kernel_size * kernel_size)
        w_pt = jax.random.uniform(k1, (cin, cout, kernel_size, kernel_size),
                                  jnp.float32, -bound, bound)
        b = jax.random.uniform(k2, (cout,), jnp.float32, -bound, bound)
        if has_bn:
            gamma = jax.random.uniform(k3, (cout,), jnp.float32, 0.5, 1.5)
            beta = jax.random.uniform(k4, (cout,), jnp.float32, -0.5, 0.5)
            rmean = jax.random.uniform(k5, (cout,), jnp.float32, -0.5, 0.5)
            rvar = jax.random.uniform(k6, (cout,), jnp.float32, 0.5, 1.5)
            scale = gamma / jnp.sqrt(rvar + eps)
            shift = scale * (b - rmean) + beta                # BN folded with bias
            act = "relu"
        else:
            scale = jnp.ones((cout,), jnp.float32)
            shift = b
            act = "sigmoid"
        params.append(dict(w=w_pt, scale=scale, shift=shift, act=act))
    return params


# ----------------------------------------------------------------------------
# Pure-JAX reference (bf16 operands / f32 accumulation, matching the kernel)
# ----------------------------------------------------------------------------
def _convt_block_ref(x_nhwc, w_pt, scale, shift, *, K, stride, pad, act):
    # ConvTranspose2d == stride-1 conv on the zero-dilated input with the
    # spatially flipped kernel (HWIO).
    w_flip = jnp.transpose(w_pt[:, :, ::-1, ::-1], (2, 3, 0, 1))
    y = jax.lax.conv_general_dilated(
        x_nhwc.astype(jnp.bfloat16), w_flip.astype(jnp.bfloat16),
        window_strides=(1, 1),
        padding=[(K - 1 - pad, K - 1 - pad)] * 2,
        lhs_dilation=(stride, stride),
        dimension_numbers=("NHWC", "HWIO", "NHWC"),
        preferred_element_type=jnp.float32)
    y = y * scale + shift
    return jnp.maximum(y, 0.0) if act == "relu" else jax.nn.sigmoid(y)


def decoder_forward_ref(params, x_nchw, skips_nchw, *, K, stride, pad):
    skips = skips_nchw[::-1]
    x = jnp.transpose(x_nchw, (0, 2, 3, 1))
    p0 = params[0]
    x = _convt_block_ref(x, p0["w"], p0["scale"], p0["shift"],
                         K=K, stride=stride, pad=pad, act=p0["act"])
    for i in range(1, len(params)):
        s = jnp.transpose(skips[i], (0, 2, 3, 1))
        x = jnp.concatenate([x, s], axis=-1)
        p = params[i]
        x = _convt_block_ref(x, p["w"], p["scale"], p["shift"],
                             K=K, stride=stride, pad=pad, act=p["act"])
    return jnp.transpose(x, (0, 3, 1, 2))


# ----------------------------------------------------------------------------
if __name__ == "__main__":
    input_features = 3
    features = [4, 8, 16]        # encoder channel ladder
    kernel_size = 4
    stride = 2
    padding = 1
    noise_dim = 2
    B = 8                        # packed 4 images/grid-step -> grid=(2,)

    key = jax.random.PRNGKey(0)
    kp, kx, ks0, ks1, ks2 = jax.random.split(key, 5)

    params = init_decoder_params(kp, input_features, features,
                                 kernel_size, noise_dim)

    # Decoder input: deepest encoder feature + noise channels (NCHW).
    x = jax.random.normal(kx, (B, features[-1] + noise_dim, 4, 4), jnp.float32)
    # Encoder skip connections, shallow -> deep (NCHW); the deepest one is
    # never consumed by the decoder forward.
    skips = [
        jax.random.normal(ks0, (B, features[0], 16, 16), jnp.float32),
        jax.random.normal(ks1, (B, features[1], 8, 8), jnp.float32),
        jax.random.normal(ks2, (B, features[2], 4, 4), jnp.float32),
    ]

    out = decoder_forward(params, x, skips, K=kernel_size,
                          stride=stride, pad=padding)
    out = jax.block_until_ready(out)
    assert out.shape == (B, input_features, 32, 32), out.shape

    ref = decoder_forward_ref(params, x, skips, K=kernel_size,
                              stride=stride, pad=padding)
    ref = jax.block_until_ready(ref)
    # bf16 matmul/conv operands in both paths; f32 accumulation -> tight agreement.
    np.testing.assert_allclose(np.asarray(out), np.asarray(ref),
                               rtol=5e-3, atol=5e-3)

    print("KERNEL_OK")
</pallas_src>

<mosaic_0001>
module attributes {stable_mosaic.version = 11 : i64} {
  func.func @kernel(%arg0: i32, %arg1: memref<1x16x72xbf16, #tpu.memory_space<vmem>>, %arg2: memref<1x16x128xbf16, #tpu.memory_space<vmem>>, %arg3: memref<1x16x256xbf16, #tpu.memory_space<vmem>>, %arg4: memref<16x16xbf16, #tpu.memory_space<vmem>>, %arg5: memref<16x16xbf16, #tpu.memory_space<vmem>>, %arg6: memref<216x128xbf16, #tpu.memory_space<vmem>>, %arg7: memref<1x128xf32, #tpu.memory_space<vmem>>, %arg8: memref<1x128xf32, #tpu.memory_space<vmem>>, %arg9: memref<768x256xbf16, #tpu.memory_space<vmem>>, %arg10: memref<1x256xf32, #tpu.memory_space<vmem>>, %arg11: memref<1x256xf32, #tpu.memory_space<vmem>>, %arg12: memref<1536x1024xbf16, #tpu.memory_space<vmem>>, %arg13: memref<1x1024xf32, #tpu.memory_space<vmem>>, %arg14: memref<1x1024xf32, #tpu.memory_space<vmem>>, %arg15: memref<1x16x1024xf32, #tpu.memory_space<vmem>>) attributes {dimension_semantics = [#tpu.dimension_semantics<parallel>], iteration_bounds = array<i64: 2>, scalar_prefetch = 0 : i64, scratch_operands = 0 : i64, tpu.core_type = #tpu.core_type<tc>, window_params = [{transform_indices = @transform_0, window_bounds = array<i64: 1, 16, 72>}, {transform_indices = @transform_1, window_bounds = array<i64: 1, 16, 128>}, {transform_indices = @transform_2, window_bounds = array<i64: 1, 16, 256>}, {pipeline_mode = #tpu.pipeline_mode<synchronous>, transform_indices = @transform_3, window_bounds = array<i64: 16, 16>}, {pipeline_mode = #tpu.pipeline_mode<synchronous>, transform_indices = @transform_4, window_bounds = array<i64: 16, 16>}, {pipeline_mode = #tpu.pipeline_mode<synchronous>, transform_indices = @transform_5, window_bounds = array<i64: 216, 128>}, {pipeline_mode = #tpu.pipeline_mode<synchronous>, transform_indices = @transform_6, window_bounds = array<i64: 1, 128>}, {pipeline_mode = #tpu.pipeline_mode<synchronous>, transform_indices = @transform_7, window_bounds = array<i64: 1, 128>}, {pipeline_mode = #tpu.pipeline_mode<synchronous>, transform_indices = @transform_8, window_bounds = array<i64: 768, 256>}, {pipeline_mode = #tpu.pipeline_mode<synchronous>, transform_indices = @transform_9, window_bounds = array<i64: 1, 256>}, {pipeline_mode = #tpu.pipeline_mode<synchronous>, transform_indices = @transform_10, window_bounds = array<i64: 1, 256>}, {pipeline_mode = #tpu.pipeline_mode<synchronous>, transform_indices = @transform_11, window_bounds = array<i64: 1536, 1024>}, {pipeline_mode = #tpu.pipeline_mode<synchronous>, transform_indices = @transform_12, window_bounds = array<i64: 1, 1024>}, {pipeline_mode = #tpu.pipeline_mode<synchronous>, transform_indices = @transform_13, window_bounds = array<i64: 1, 1024>}, {transform_indices = @transform_14, window_bounds = array<i64: 1, 16, 1024>}]} {
    %c0 = arith.constant 0 : index
    %c0_0 = arith.constant 0 : index
    %0 = vector.load %arg4[%c0, %c0_0] : memref<16x16xbf16, #tpu.memory_space<vmem>>, vector<16x16xbf16>
    %c0_1 = arith.constant 0 : index
    %c0_2 = arith.constant 0 : index
    %1 = vector.load %arg5[%c0_1, %c0_2] : memref<16x16xbf16, #tpu.memory_space<vmem>>, vector<16x16xbf16>
    %c0_3 = arith.constant 0 : index
    %c0_4 = arith.constant 0 : index
    %c0_5 = arith.constant 0 : index
    %2 = vector.load %arg1[%c0_3, %c0_4, %c0_5] : memref<1x16x72xbf16, #tpu.memory_space<vmem>>, vector<1x16x72xbf16>
    %3 = vector.shape_cast %2 : vector<1x16x72xbf16> to vector<16x72xbf16>
    %cst = arith.constant dense<0.000000e+00> : vector<16x72xf32>
    %4 = tpu.matmul %0, %3, %cst {dimension_numbers = #tpu.dot_dimension_numbers<[1], [0], [0], [1], [0, 0, 1, 1], [], []>} : vector<16x16xbf16>, vector<16x72xbf16>, vector<16x72xf32> -> vector<16x72xf32>
    %5 = arith.truncf %4 : vector<16x72xf32> to vector<16x72xbf16>
    %cst_6 = arith.constant dense<0.000000e+00> : vector<16x72xf32>
    %6 = tpu.matmul %1, %3, %cst_6 {dimension_numbers = #tpu.dot_dimension_numbers<[1], [0], [0], [1], [0, 0, 1, 1], [], []>} : vector<16x16xbf16>, vector<16x72xbf16>, vector<16x72xf32> -> vector<16x72xf32>
    %7 = arith.truncf %6 : vector<16x72xf32> to vector<16x72xbf16>
    %8 = tpu.concatenate %3, %5, %7 in 1 : vector<16x72xbf16>, vector<16x72xbf16>, vector<16x72xbf16> -> vector<16x216xbf16>
    %c0_7 = arith.constant 0 : index
    %c0_8 = arith.constant 0 : index
    %9 = vector.load %arg6[%c0_7, %c0_8] : memref<216x128xbf16, #tpu.memory_space<vmem>>, vector<216x128xbf16>
    %cst_9 = arith.constant dense<0.000000e+00> : vector<16x128xf32>
    %10 = tpu.matmul %8, %9, %cst_9 {dimension_numbers = #tpu.dot_dimension_numbers<[1], [0], [0], [1], [0, 0, 1, 1], [], []>} : vector<16x216xbf16>, vector<216x128xbf16>, vector<16x128xf32> -> vector<16x128xf32>
    %c0_10 = arith.constant 0 : index
    %c0_11 = arith.constant 0 : index
    %11 = vector.load %arg7[%c0_10, %c0_11] : memref<1x128xf32, #tpu.memory_space<vmem>>, vector<1x128xf32>
    %12 = vector.broadcast %11 : vector<1x128xf32> to vector<16x128xf32>
    %13 = arith.mulf %10, %12 : vector<16x128xf32>
    %c0_12 = arith.constant 0 : index
    %c0_13 = arith.constant 0 : index
    %14 = vector.load %arg8[%c0_12, %c0_13] : memref<1x128xf32, #tpu.memory_space<vmem>>, vector<1x128xf32>
    %15 = vector.broadcast %14 : vector<1x128xf32> to vector<16x128xf32>
    %16 = arith.addf %13, %15 : vector<16x128xf32>
    %cst_14 = arith.constant 0.000000e+00 : f32
    %17 = vector.broadcast %cst_14 : f32 to vector<16x128xf32>
    %18 = arith.maximumf %16, %17 : vector<16x128xf32>
    %19 = arith.truncf %18 : vector<16x128xf32> to vector<16x128xbf16>
    %c0_15 = arith.constant 0 : index
    %c0_16 = arith.constant 0 : index
    %c0_17 = arith.constant 0 : index
    %20 = vector.load %arg2[%c0_15, %c0_16, %c0_17] : memref<1x16x128xbf16, #tpu.memory_space<vmem>>, vector<1x16x128xbf16>
    %21 = vector.shape_cast %20 : vector<1x16x128xbf16> to vector<16x128xbf16>
    %22 = tpu.concatenate %19, %21 in 1 : vector<16x128xbf16>, vector<16x128xbf16> -> vector<16x256xbf16>
    %cst_18 = arith.constant dense<0.000000e+00> : vector<16x256xf32>
    %23 = tpu.matmul %0, %22, %cst_18 {dimension_numbers = #tpu.dot_dimension_numbers<[1], [0], [0], [1], [0, 0, 1, 1], [], []>} : vector<16x16xbf16>, vector<16x256xbf16>, vector<16x256xf32> -> vector<16x256xf32>
    %24 = arith.truncf %23 : vector<16x256xf32> to vector<16x256xbf16>
    %cst_19 = arith.constant dense<0.000000e+00> : vector<16x256xf32>
    %25 = tpu.matmul %1, %22, %cst_19 {dimension_numbers = #tpu.dot_dimension_numbers<[1], [0], [0], [1], [0, 0, 1, 1], [], []>} : vector<16x16xbf16>, vector<16x256xbf16>, vector<16x256xf32> -> vector<16x256xf32>
    %26 = arith.truncf %25 : vector<16x256xf32> to vector<16x256xbf16>
    %27 = tpu.concatenate %22, %24, %26 in 1 : vector<16x256xbf16>, vector<16x256xbf16>, vector<16x256xbf16> -> vector<16x768xbf16>
    %c0_20 = arith.constant 0 : index
    %c0_21 = arith.constant 0 : index
    %28 = vector.load %arg9[%c0_20, %c0_21] : memref<768x256xbf16, #tpu.memory_space<vmem>>, vector<768x256xbf16>
    %cst_22 = arith.constant dense<0.000000e+00> : vector<16x256xf32>
    %29 = tpu.matmul %27, %28, %cst_22 {dimension_numbers = #tpu.dot_dimension_numbers<[1], [0], [0], [1], [0, 0, 1, 1], [], []>} : vector<16x768xbf16>, vector<768x256xbf16>, vector<16x256xf32> -> vector<16x256xf32>
    %c0_23 = arith.constant 0 : index
    %c0_24 = arith.constant 0 : index
    %30 = vector.load %arg10[%c0_23, %c0_24] : memref<1x256xf32, #tpu.memory_space<vmem>>, vector<1x256xf32>
    %31 = vector.broadcast %30 : vector<1x256xf32> to vector<16x256xf32>
    %32 = arith.mulf %29, %31 : vector<16x256xf32>
    %c0_25 = arith.constant 0 : index
    %c0_26 = arith.constant 0 : index
    %33 = vector.load %arg11[%c0_25, %c0_26] : memref<1x256xf32, #tpu.memory_space<vmem>>, vector<1x256xf32>
    %34 = vector.broadcast %33 : vector<1x256xf32> to vector<16x256xf32>
    %35 = arith.addf %32, %34 : vector<16x256xf32>
    %cst_27 = arith.constant 0.000000e+00 : f32
    %36 = vector.broadcast %cst_27 : f32 to vector<16x256xf32>
    %37 = arith.maximumf %35, %36 : vector<16x256xf32>
    %38 = arith.truncf %37 : vector<16x256xf32> to vector<16x256xbf16>
    %c0_28 = arith.constant 0 : index
    %c0_29 = arith.constant 0 : index
    %c0_30 = arith.constant 0 : index
    %39 = vector.load %arg3[%c0_28, %c0_29, %c0_30] : memref<1x16x256xbf16, #tpu.memory_space<vmem>>, vector<1x16x256xbf16>
    %40 = vector.shape_cast %39 : vector<1x16x256xbf16> to vector<16x256xbf16>
    %41 = tpu.concatenate %38, %40 in 1 : vector<16x256xbf16>, vector<16x256xbf16> -> vector<16x512xbf16>
    %cst_31 = arith.constant dense<0.000000e+00> : vector<16x512xf32>
    %42 = tpu.matmul %0, %41, %cst_31 {dimension_numbers = #tpu.dot_dimension_numbers<[1], [0], [0], [1], [0, 0, 1, 1], [], []>} : vector<16x16xbf16>, vector<16x512xbf16>, vector<16x512xf32> -> vector<16x512xf32>
    %43 = arith.truncf %42 : vector<16x512xf32> to vector<16x512xbf16>
    %cst_32 = arith.constant dense<0.000000e+00> : vector<16x512xf32>
    %44 = tpu.matmul %1, %41, %cst_32 {dimension_numbers = #tpu.dot_dimension_numbers<[1], [0], [0], [1], [0, 0, 1, 1], [], []>} : vector<16x16xbf16>, vector<16x512xbf16>, vector<16x512xf32> -> vector<16x512xf32>
    %45 = arith.truncf %44 : vector<16x512xf32> to vector<16x512xbf16>
    %46 = tpu.concatenate %41, %43, %45 in 1 : vector<16x512xbf16>, vector<16x512xbf16>, vector<16x512xbf16> -> vector<16x1536xbf16>
    %c0_33 = arith.constant 0 : index
    %c0_34 = arith.constant 0 : index
    %47 = vector.load %arg12[%c0_33, %c0_34] : memref<1536x1024xbf16, #tpu.memory_space<vmem>>, vector<1536x1024xbf16>
    %cst_35 = arith.constant dense<0.000000e+00> : vector<16x1024xf32>
    %48 = tpu.matmul %46, %47, %cst_35 {dimension_numbers = #tpu.dot_dimension_numbers<[1], [0], [0], [1], [0, 0, 1, 1], [], []>} : vector<16x1536xbf16>, vector<1536x1024xbf16>, vector<16x1024xf32> -> vector<16x1024xf32>
    %c0_36 = arith.constant 0 : index
    %c0_37 = arith.constant 0 : index
    %49 = vector.load %arg13[%c0_36, %c0_37] : memref<1x1024xf32, #tpu.memory_space<vmem>>, vector<1x1024xf32>
    %50 = vector.broadcast %49 : vector<1x1024xf32> to vector<16x1024xf32>
    %51 = arith.mulf %48, %50 : vector<16x1024xf32>
    %c0_38 = arith.constant 0 : index
    %c0_39 = arith.constant 0 : index
    %52 = vector.load %arg14[%c0_38, %c0_39] : memref<1x1024xf32, #tpu.memory_space<vmem>>, vector<1x1024xf32>
    %53 = vector.broadcast %52 : vector<1x1024xf32> to vector<16x1024xf32>
    %54 = arith.addf %51, %53 : vector<16x1024xf32>
    %55 = arith.negf %54 : vector<16x1024xf32>
    %56 = math.exp %55 : vector<16x1024xf32>
    %cst_40 = arith.constant 1.000000e+00 : f32
    %57 = vector.broadcast %cst_40 : f32 to vector<16x1024xf32>
    %58 = arith.addf %57, %56 : vector<16x1024xf32>
    %59 = arith.divf %57, %58 : vector<16x1024xf32>
    %60 = vector.shape_cast %59 : vector<16x1024xf32> to vector<1x16x1024xf32>
    %c0_41 = arith.constant 0 : index
    %c0_42 = arith.constant 0 : index
    %c0_43 = arith.constant 0 : index
    %61 = vector.load %arg15[%c0_41, %c0_42, %c0_43] : memref<1x16x1024xf32, #tpu.memory_space<vmem>>, vector<1x16x1024xf32>
    tpu.vector_store %arg15[%c0_41, %c0_42, %c0_43], %60 {strides = array<i32>} : memref<1x16x1024xf32, #tpu.memory_space<vmem>>, vector<1x16x1024xf32>,
    return
  }
  func.func @transform_0(%arg0: i32) -> (i32, i32, i32) {
    %c0_i32 = arith.constant 0 : i32
    %c0_i32_0 = arith.constant 0 : i32
    %c0_i32_1 = arith.constant 0 : i32
    return %arg0, %c0_i32, %c0_i32_0 : i32, i32, i32
  }
  func.func @transform_1(%arg0: i32) -> (i32, i32, i32) {
    %c0_i32 = arith.constant 0 : i32
    %c0_i32_0 = arith.constant 0 : i32
    %c0_i32_1 = arith.constant 0 : i32
    return %arg0, %c0_i32, %c0_i32_0 : i32, i32, i32
  }
  func.func @transform_2(%arg0: i32) -> (i32, i32, i32) {
    %c0_i32 = arith.constant 0 : i32
    %c0_i32_0 = arith.constant 0 : i32
    %c0_i32_1 = arith.constant 0 : i32
    return %arg0, %c0_i32, %c0_i32_0 : i32, i32, i32
  }
  func.func @transform_3(%arg0: i32) -> (i32, i32) {
    %c0_i32 = arith.constant 0 : i32
    %c0_i32_0 = arith.constant 0 : i32
    %c0_i32_1 = arith.constant 0 : i32
    return %c0_i32, %c0_i32_0 : i32, i32
  }
  func.func @transform_4(%arg0: i32) -> (i32, i32) {
    %c0_i32 = arith.constant 0 : i32
    %c0_i32_0 = arith.constant 0 : i32
    %c0_i32_1 = arith.constant 0 : i32
    return %c0_i32, %c0_i32_0 : i32, i32
  }
  func.func @transform_5(%arg0: i32) -> (i32, i32) {
    %c0_i32 = arith.constant 0 : i32
    %c0_i32_0 = arith.constant 0 : i32
    %c0_i32_1 = arith.constant 0 : i32
    return %c0_i32, %c0_i32_0 : i32, i32
  }
  func.func @transform_6(%arg0: i32) -> (i32, i32) {
    %c0_i32 = arith.constant 0 : i32
    %c0_i32_0 = arith.constant 0 : i32
    %c0_i32_1 = arith.constant 0 : i32
    return %c0_i32, %c0_i32_0 : i32, i32
  }
  func.func @transform_7(%arg0: i32) -> (i32, i32) {
    %c0_i32 = arith.constant 0 : i32
    %c0_i32_0 = arith.constant 0 : i32
    %c0_i32_1 = arith.constant 0 : i32
    return %c0_i32, %c0_i32_0 : i32, i32
  }
  func.func @transform_8(%arg0: i32) -> (i32, i32) {
    %c0_i32 = arith.constant 0 : i32
    %c0_i32_0 = arith.constant 0 : i32
    %c0_i32_1 = arith.constant 0 : i32
    return %c0_i32, %c0_i32_0 : i32, i32
  }
  func.func @transform_9(%arg0: i32) -> (i32, i32) {
    %c0_i32 = arith.constant 0 : i32
    %c0_i32_0 = arith.constant 0 : i32
    %c0_i32_1 = arith.constant 0 : i32
    return %c0_i32, %c0_i32_0 : i32, i32
  }
  func.func @transform_10(%arg0: i32) -> (i32, i32) {
    %c0_i32 = arith.constant 0 : i32
    %c0_i32_0 = arith.constant 0 : i32
    %c0_i32_1 = arith.constant 0 : i32
    return %c0_i32, %c0_i32_0 : i32, i32
  }
  func.func @transform_11(%arg0: i32) -> (i32, i32) {
    %c0_i32 = arith.constant 0 : i32
    %c0_i32_0 = arith.constant 0 : i32
    %c0_i32_1 = arith.constant 0 : i32
    return %c0_i32, %c0_i32_0 : i32, i32
  }
  func.func @transform_12(%arg0: i32) -> (i32, i32) {
    %c0_i32 = arith.constant 0 : i32
    %c0_i32_0 = arith.constant 0 : i32
    %c0_i32_1 = arith.constant 0 : i32
    return %c0_i32, %c0_i32_0 : i32, i32
  }
  func.func @transform_13(%arg0: i32) -> (i32, i32) {
    %c0_i32 = arith.constant 0 : i32
    %c0_i32_0 = arith.constant 0 : i32
    %c0_i32_1 = arith.constant 0 : i32
    return %c0_i32, %c0_i32_0 : i32, i32
  }
  func.func @transform_14(%arg0: i32) -> (i32, i32, i32) {
    %c0_i32 = arith.constant 0 : i32
    %c0_i32_0 = arith.constant 0 : i32
    %c0_i32_1 = arith.constant 0 : i32
    return %arg0, %c0_i32, %c0_i32_0 : i32, i32, i32
  }
}

</mosaic_0001>

<bundles_post_ra>
// kernel: tpu_custom_call.1
= control target key start
LH: loop header
LB: loop body
LE: loop exit
PB: predicated region body
PF: predicated region fallthrough
CT: control target
= control target key end

     0   :  { %s10818_s0 = inlined_call_operand.hbm [shape: bf16[2,16,72], index: 0, kind: input, shape index: {}]   ;;  %s10819_s1 = inlined_call_operand.hbm [shape: bf16[2,16,128], index: 1, kind: input, shape index: {}]   ;;  %s10820_s2 = inlined_call_operand.hbm [shape: bf16[2,16,256], index: 2, kind: input, shape index: {}]   ;;  %s10821_s3 = inlined_call_operand.hbm [shape: bf16[16,16], index: 3, kind: input, shape index: {}]   ;;  %s10822_s4 = inlined_call_operand.hbm [shape: bf16[16,16], index: 4, kind: input, shape index: {}]   ;;  %s10823_s5 = inlined_call_operand.hbm [shape: bf16[216,128], index: 5, kind: input, shape index: {}]   ;;  %s10824_s6 = inlined_call_operand.hbm [shape: f32[1,128], index: 6, kind: input, shape index: {}]   ;;  %s10825_s7 = inlined_call_operand.hbm [shape: f32[1,128], index: 7, kind: input, shape index: {}]   ;;  %s10826_s8 = inlined_call_operand.hbm [shape: bf16[768,256], index: 8, kind: input, shape index: {}]   ;;  %s10827_s9 = inlined_call_operand.hbm [shape: f32[1,256], index: 9, kind: input, shape index: {}]   ;;  %s10828_s10 = inlined_call_operand.hbm [shape: f32[1,256], index: 10, kind: input, shape index: {}]   ;;  %s10829_s11 = inlined_call_operand.hbm [shape: bf16[1536,1024], index: 11, kind: input, shape index: {}]   ;;  %s10830_s12 = inlined_call_operand.hbm [shape: f32[1,1024], index: 12, kind: input, shape index: {}]   ;;  %s10831_s13 = inlined_call_operand.hbm [shape: f32[1,1024], index: 13, kind: input, shape index: {}]   ;;  %s10832_s14 = inlined_call_operand.hbm [shape: f32[2,16,1024], index: 14, kind: output, shape index: {}]  }
   0x1   :  { %10859 = sst [smem:[#allocation40_spill]] %s10819_s1 }
   0x2   :  { %10860 = sst [smem:[#allocation41_spill]] %s10821_s3 }
   0x3   :  { %10861 = sst [smem:[#allocation42_spill]] %s10822_s4 }
   0x4   :  { %10862 = sst [smem:[#allocation43_spill]] %s10823_s5 }
   0x5   :  { %10863 = sst [smem:[#allocation44_spill]] %s10824_s6 }
   0x6   :  { %10864 = sst [smem:[#allocation45_spill]] %s10825_s7 }
   0x7   :  { %10865 = sst [smem:[#allocation46_spill]] %s10827_s9 }
   0x8   :  { %10866 = sst [smem:[#allocation47_spill]] %s10829_s11 }
   0x9   :  { %10867 = sst [smem:[#allocation48_spill]] %s10832_s14 }
   0xa   :  { %19 = vsyncpa [#allocation3], 0 }
   0xb   :  { %21 = vsyncpa [#allocation3 + $0x1], 0 }
   0xc   :  { %22 = vsyncpa [#allocation6], 0 }
   0xd   :  { %24 = vsyncpa [#allocation6 + $0x1], 0 }
   0xe   :  { %25 = vsyncpa [#allocation9], 0 }
   0xf   :  { %26 = vsyncpa [#allocation12], 0 }
  0x10   :  { %27 = vsyncpa [#allocation15], 0 }
  0x11   :  { %28 = vsyncpa [#allocation18], 0 }
  0x12   :  { %29 = vsyncpa [#allocation21], 0 }
  0x13   :  { %30 = vsyncpa [#allocation24], 0 }
  0x14   :  { %31 = vsyncpa [#allocation4], 0 }
  0x15   :  { %33 = vsyncpa [#allocation4 + $0x1], 0  ;;  %s10114_s29 = smov 0   ;;  %s10116_s30 = smov 0  }
  0x16   :  { %s10118_s15 = smov 0   ;;  %s10120_s16 = smov 0  }
  0x17 LB: > { %10868 = sst [smem:[#allocation35_spill]] %s9997_s29  ;;  %s10011_s17 = smov [#allocation8]   ;;  %s10009_s16 = sphi %s10120_s16, %s10920_s16   ;;  %s10005_s15 = sphi %s10118_s15, %s10922_s15   ;;  %s10001_s30 = sphi %s10116_s30, %s10924_s30   ;;  %s9997_s29 = sphi %s10114_s29, %s10923_s29  }
  0x18   : > { %10869 = sst [smem:[#allocation36_spill]] %s10005_s15  ;;  %s391_s18 = sshll.u32 %s10011_s17, 4  ;;  %s392_s18 = int_to_ptr.vmem [resolvable:$true] %s391_s18 }
  0x19   : > { %s10135_s19 = sadd.s32 4294967295, %s10009_s16   ;;  %p8152_p0 = scmp.ge.s32.totalorder %s10009_s16, 1 }
  0x1a   : > { %p10838_p1 = scmp.eq.s32.totalorder %s10135_s19, 0  ;;  %p379_p2 = scmp.lt.s32.totalorder %s10009_s16, 3 }
  0x1b   : > { %s10012_s21 = smov [#allocation11]   ;;  %s10013_s24 = smov [#allocation14]  }
  0x1c   : > { %p10140_p3 = pnand %p8152_p0, %p379_p2  ;;  %s417_s22 = sshll.u32 %s10012_s21, 4  ;;  %s10153_s22 = int_to_ptr.vmem [resolvable:$true] %s417_s22 }
  0x1d   : > { %s442_s25 = sshll.u32 %s10013_s24, 4  ;;  %s9558_s27 = scalar_lea.vmem %s392_s18, 128  ;;  %s10155_s25 = int_to_ptr.vmem [resolvable:$true] %s442_s25 }
  0x1e   : > { %s10870_s20 = scalar_select %p10140_p3, 1, 0 }
  0x1f   : > { %p9178_p5 = pneg %p10140_p3  ;;  %p9559_p8 = scmp.ne.s32.totalorder %s392_s18, %s9558_s27 }
  0x20   : > { %p9566_p11 = scmp.lt.s32.totalorder %s392_s18, %s392_s18  ;;  %p9567_p12 = scmp.lt.s32.totalorder %s9558_s27, %s9558_s27 }
  0x21   : > { %p10149_p6 = pnand %p9178_p5, %p10838_p1 }
  0x22   : > { %p9568_p13 = por %p9567_p12, %p9566_p11 }
  0x23   : > { %s10871_s23 = scalar_select %p10149_p6, 1, 0 }
  0x24   : > { %p10159_p7 = pneg %p10149_p6 }
  0x26   : > { %s10872_s26 = scalar_select %p10159_p7, 1, 0 }
  0x27   : > { %p9561_p9 = pnand %p9559_p8, %p10159_p7 }
  0x29   : > { %p9562_p10 = pneg %p9561_p9 }
  0x2b   : > { %p9569_p0 = pnand %p9568_p13, %p9562_p10 }
  0x2d   : > { %9572 = shalt.err (!%p9569_p0)
}
  0x2e   : > { %s10834_s28 = smov 64   ;;  %s10836_s17 = smov 4  }
  0x2f   : > { %s10873_s3 = sld [smem:[#allocation41_spill]]  ;;  %s9584_s14 = scalar_lea.vmem %s10153_s22, 1728 }
  0x30   : > { %p9585_p2 = scmp.ne.s32.totalorder %s10153_s22, %s9584_s14  ;;  %p9592_p9 = scmp.lt.s32.totalorder %s10153_s22, %s10153_s22 }
  0x31   : > { %p9593_p10 = scmp.lt.s32.totalorder %s9584_s14, %s9584_s14 }
  0x32   : > { %p9587_p5 = pnand %p9585_p2, %p10159_p7 }
  0x33   : > { %p9594_p11 = por %p9593_p10, %p9592_p9 }
  0x34   : > { %p9588_p8 = pneg %p9587_p5 }
  0x35   : > { %9181 = dma.hbm_to_vmem [thread:$0]  (!%p10149_p6), %s10873_s3, 128, %s392_s18, [#allocation9], %s10834_s28, %s10834_s28, %s10836_s17  }
  0x36   : > { %p9595_p12 = pnand %p9594_p11, %p9588_p8 }
  0x38   : > { %9598 = shalt.err (!%p9595_p12)
}
  0x39   : > { %s10874_s5 = sld [smem:[#allocation43_spill]]  ;;  %s9610_s18 = scalar_lea.vmem %s10155_s25, 16 }
  0x3a   : > { %p9611_p13 = scmp.ne.s32.totalorder %s10155_s25, %s9610_s18  ;;  %s9617_s14 = scalar_lea.vmem %s10155_s25, 32 }
  0x3b   : > { %p9618_p5 = scmp.lt.s32.totalorder %s10155_s25, %s10155_s25  ;;  %p9619_p8 = scmp.lt.s32.totalorder %s9617_s14, %s9610_s18 }
  0x3c   : > { %p9613_p0 = pnand %p9611_p13, %p10159_p7 }
  0x3d   : > { %p9620_p9 = por %p9619_p8, %p9618_p5 }
  0x3e   : > { %p9614_p2 = pneg %p9613_p0 }
  0x3f   : > { %9187 = dma.hbm_to_vmem [thread:$0]  (!%p10149_p6), %s10874_s5, 1728, %s10153_s22, [#allocation12], %s10834_s28, %s10834_s28, %s10836_s17  }
  0x40   : > { %p9621_p10 = pnand %p9620_p9, %p9614_p2 }
  0x42   : > { %9624 = shalt.err (!%p9621_p10)
}
  0x43   : > { %s10875_s7 = sld [smem:[#allocation45_spill]]  ;;  %s10016_s22 = smov [#allocation17]  }
  0x44   : > { %s466_s21 = sshll.u32 %s10016_s22, 4  ;;  %s10017_s28 = smov [#allocation20]   ;;  %s467_s21 = int_to_ptr.vmem [resolvable:$true] %s466_s21 }
  0x45   : > { %s487_s17 = sshll.u32 %s10017_s28, 4  ;;  %s9636_s3 = scalar_lea.vmem %s467_s21, 32  ;;  %s488_s17 = int_to_ptr.vmem [resolvable:$true] %s487_s17 }
  0x46   : > { %p9637_p11 = scmp.ne.s32.totalorder %s467_s21, %s9636_s3  ;;  %p9644_p0 = scmp.lt.s32.totalorder %s467_s21, %s467_s21 }
  0x47   : > { %p9645_p2 = scmp.lt.s32.totalorder %s9636_s3, %s9636_s3 }
  0x48   : > { %p9639_p12 = pnand %p9637_p11, %p10159_p7 }
  0x49   : > { %9193 = dma.hbm_to_vmem [thread:$0]  (!%p10149_p6), %s10875_s7, 16, %s10155_s25, [#allocation15]  }
  0x4a   : > { %p9640_p13 = pneg %p9639_p12  ;;  %p9646_p5 = por %p9645_p2, %p9644_p0 }
  0x4c   : > { %p9647_p8 = pnand %p9646_p5, %p9640_p13 }
  0x4e   : > { %9650 = shalt.err (!%p9647_p8)
}
  0x4f   : > { %s10876_s9 = sld [smem:[#allocation46_spill]]  ;;  %s9662_s25 = scalar_lea.vmem %s488_s17, 98304 }
  0x50   : > { %p9663_p9 = scmp.ne.s32.totalorder %s488_s17, %s9662_s25  ;;  %p9670_p11 = scmp.lt.s32.totalorder %s488_s17, %s488_s17 }
  0x51   : > { %p9671_p12 = scmp.lt.s32.totalorder %s9662_s25, %s9662_s25 }
  0x52   : > { %p9665_p10 = pnand %p9663_p9, %p10159_p7 }
  0x53   : > { %p9672_p1 = por %p9671_p12, %p9670_p11 }
  0x54   : > { %p9666_p4 = pneg %p9665_p10 }
  0x55   : > { %9199 = dma.hbm_to_vmem [thread:$0]  (!%p10149_p6), %s10876_s9, 32, %s467_s21, [#allocation18]  }
  0x56   : > { %p9673_p3 = pnand %p9672_p1, %p9666_p4 }
  0x58   : > { %9676 = shalt.err (!%p9673_p3)
}
  0x59   : > { %s10018_s3 = smov 512   ;;  %s10019_s28 = smov 32  }
  0x5a   : > { %s10877_s11 = sld [smem:[#allocation47_spill]]  ;;  %s8151_s22 = sadd.s32 4294967294, %s10009_s16  }
  0x5b   : > { %s10217_s21 = sadd.s32 1, %s10009_s16   ;;  %s46_s18 = sadd.s32 1, %s10005_s15 }
  0x5c   : > { %10878 = sst [smem:[#allocation37_spill]] %s10217_s21  ;;  %s43_s14 = ssub.s32 %s10009_s16, %s10217_s21 }
  0x5d   : > { %p53_p1 = scmp.ne.s32.totalorder %s10005_s15, %s10001_s30  ;;  %p44_p3 = scmp.eq.s32.totalorder %s43_s14, 0 }
  0x5e   : > { %p54_p4 = scmp.eq.s32.totalorder %s10009_s16, 0  ;;  %p59_p13 = scmp.ne.s32.totalorder %s10001_s30, %s9997_s29 }
  0x5f   : > { %p366_p0 = scmp.eq.s32.totalorder %s10135_s19, 1  ;;  %p10880_p5 = scmp.eq.s32.totalorder %s10135_s19, 0 }
  0x60   : > { %9205 = dma.hbm_to_vmem [thread:$0]  (!%p10149_p6), %s10877_s11, 98304, %s488_s17, [#allocation21], %s10018_s3, %s10018_s3, %s10019_s28  }
  0x61   : > { %s10229_s25 = scalar_select %p44_p3, %s10005_s15, %s46_s18  }
  0x62   : > { %p55_p2 = por %p54_p4, %p53_p1  ;;  %p10233_p8 = por %p10880_p5, %p59_p13 }
  0x63   : > { %10879 = sst [smem:[#allocation38_spill]] %s10229_s25  ;;  %p10237_p9 = por %p366_p0, %p53_p1 }
  0x64   : > { %s10881_s17 = scalar_select %p10233_p8, 1, 0 }
  0x65   : > { %s10882_s3 = scalar_select %p10237_p9, 1, 0 }
  0x66   : > { %p372_p10 = scmp.eq.s32.totalorder %s8151_s22, 1  ;;  %p9237_p11 = scmp.lt.s32.totalorder %s10009_s16, 2 }
  0x67   : > { %s10243_s28 = sand.u32 1, %s10005_s15   ;;  %s10845_s18 = sshll.u32 %s10009_s16, 7 }
  0x68   : > { %p10245_p12 = por %p372_p10, %p59_p13  ;;  %s10844_s27 = sshll.u32 %s10243_s28, 3 }
  0x69   : > { %p10251_p3 = pnand %p9237_p11, %p55_p2  ;;  %s544_s5 = sand.u32 1, %s10009_s16  }
  0x6a   : > { %s10883_s24 = scalar_select %p10245_p12, 1, 0 }
  0x6b   : > { %s10885_s14 = scalar_select %p10251_p3, 1, 0 }
  0x6c   : > { %10884 = sst [smem:[#allocation39_spill]] %s10883_s24  ;;  %s548_s11 = scalar_lea.vmem [#allocation5], %s10844_s27 }
  0x6d   : > { %s10886_s1 = sld [smem:[#allocation40_spill]]  ;;  %s555_s25 = sshll.u32 %s548_s11, 4  ;;  %s10265_s25 = int_to_ptr.vmem [resolvable:$true] %s555_s25 }
  0x6e   : > { %s10267_s15 = scalar_lea.sflag [#allocation6], %s544_s5  ;;  %p10273_p4 = pneg %p10251_p3 }
  0x70   : > { %s10887_s24 = scalar_select %p10273_p4, 1, 0 }
  0x73   : > { %s10261_s9 = scalar_lea.hbm %s10886_s1, %s10845_s18  ;;  %s9682_s27 = scalar_lea.hbm %s10886_s1, 256 }
  0x74   : > { %s9677_s21 = scalar_lea.hbm %s10261_s9, 128  ;;  %p9683_p2 = scmp.lt.s32.totalorder %s10261_s9, %s10886_s1 }
  0x75   : > { %p9678_p1 = scmp.ne.s32.totalorder %s10261_s9, %s9677_s21  ;;  %p9684_p5 = scmp.lt.s32.totalorder %s9682_s27, %s9677_s21 }
  0x77   : > { %p9680_p13 = pnand %p10273_p4, %p9678_p1  ;;  %p9685_p10 = por %p9684_p5, %p9683_p2 }
  0x79   : > { %p9681_p0 = pneg %p9680_p13 }
  0x7b   : > { %p9686_p11 = pnand %p9685_p10, %p9681_p0 }
  0x7d   : > { %9689 = shalt.err (!%p9686_p11)
}
  0x7e   : > { %s9690_s5 = scalar_lea.vmem %s10265_s25, 128  ;;  %s10020_s29 = smov [#allocation5]  }
  0x7f   : > { %p9691_p12 = scmp.ne.s32.totalorder %s10265_s25, %s9690_s5  ;;  %s9695_s7 = sshll.u32 %s10020_s29, 4  ;;  %s9696_s7 = int_to_ptr.vmem [resolvable:$false] %s9695_s7 }
  0x80   : > { %s9697_s22 = scalar_lea.vmem %s9696_s7, 256  ;;  %p9698_p9 = scmp.lt.s32.totalorder %s10265_s25, %s9696_s7 }
  0x81   : > { %p9693_p1 = pnand %p9691_p12, %p10273_p4  ;;  %p9699_p8 = scmp.lt.s32.totalorder %s9697_s22, %s9690_s5 }
  0x83   : > { %p9694_p13 = pneg %p9693_p1  ;;  %p9700_p6 = por %p9699_p8, %p9698_p9 }
  0x85   : > { %p9701_p7 = pnand %p9700_p6, %p9694_p13 }
  0x87   : > { %9704 = shalt.err (!%p9701_p7)
}
  0x88   : > { %s10888_s21 = smov 4   ;;  %s10889_s27 = smov 64  }
  0x89   : > { %9218 = dma.hbm_to_vmem [thread:$0]  (!%p10251_p3), %s10261_s9, 128, %s10265_s25, %s10267_s15, %s10889_s27, %s10889_s27, %s10888_s21  }
  0x8a   : > { %s10021_s18 = smov [#allocation10]   ;;  %s10022_s29 = smov [#allocation13]  }
  0x8b   : > { %s404_s11 = sshll.u32 %s10021_s18, 4  ;;  %s431_s1 = sshll.u32 %s10022_s29, 4  ;;  %s405_s11 = int_to_ptr.vmem [resolvable:$true] %s404_s11  ;;  %s432_s1 = int_to_ptr.vmem [resolvable:$true] %s431_s1 }
  0x8c   : > { %s9716_s7 = scalar_lea.vmem %s405_s11, 128  ;;  %p10890_p8 = scmp.ne.s32.totalorder %s10872_s26, 0 }
  0x8d   : > { %p9717_p12 = scmp.ne.s32.totalorder %s405_s11, %s9716_s7  ;;  %p9724_p9 = scmp.lt.s32.totalorder %s405_s11, %s405_s11 }
  0x8e   : > { %p9725_p0 = scmp.lt.s32.totalorder %s9716_s7, %s9716_s7 }
  0x8f   : > { %p9719_p6 = pnand %p9717_p12, %p10890_p8 }
  0x90   : > { %p9726_p2 = por %p9725_p0, %p9724_p9 }
  0x91   : > { %p9720_p7 = pneg %p9719_p6 }
  0x93   : > { %p9727_p5 = pnand %p9726_p2, %p9720_p7 }
  0x95   : > { %9730 = shalt.err (!%p9727_p5)
}
  0x96   : > { %p10891_p10 = scmp.ne.s32.totalorder %s10871_s23, 0  ;;  %s10892_s4 = sld [smem:[#allocation42_spill]] }
  0x97   : > { %s9742_s5 = scalar_lea.vmem %s432_s1, 16  ;;  %s9749_s22 = scalar_lea.vmem %s432_s1, 32 }
  0x98   : > { %p9743_p11 = scmp.ne.s32.totalorder %s432_s1, %s9742_s5  ;;  %p9750_p12 = scmp.lt.s32.totalorder %s432_s1, %s432_s1 }
  0x99   : > { %p9751_p6 = scmp.lt.s32.totalorder %s9749_s22, %s9742_s5 }
  0x9a   : > { %p9745_p1 = pnand %p9743_p11, %p10890_p8 }
  0x9b   : > { %p9752_p7 = por %p9751_p6, %p9750_p12 }
  0x9c   : > { %9184 = dma.hbm_to_vmem [thread:$0]  (!%p10891_p10), %s10892_s4, 128, %s405_s11, [#allocation9], %s10889_s27, %s10889_s27, %s10888_s21  }
  0x9d   : > { %p9746_p13 = pneg %p9745_p1 }
  0x9f   : > { %p9753_p9 = pnand %p9752_p7, %p9746_p13 }
  0xa1   : > { %9756 = shalt.err (!%p9753_p9)
}
  0xa2   : > { %s10893_s6 = sld [smem:[#allocation44_spill]]  ;;  %s10023_s11 = smov [#allocation16]  }
  0xa3   : > { %s452_s7 = sshll.u32 %s10023_s11, 4  ;;  %s453_s7 = int_to_ptr.vmem [resolvable:$true] %s452_s7 }
  0xa4   : > { %s9768_s9 = scalar_lea.vmem %s453_s7, 12288  ;;  %p9776_p11 = scmp.lt.s32.totalorder %s453_s7, %s453_s7 }
  0xa5   : > { %p9769_p0 = scmp.ne.s32.totalorder %s453_s7, %s9768_s9  ;;  %p9777_p1 = scmp.lt.s32.totalorder %s9768_s9, %s9768_s9 }
  0xa7   : > { %p9771_p2 = pnand %p9769_p0, %p10890_p8  ;;  %p9778_p12 = por %p9777_p1, %p9776_p11 }
  0xa8   : > { %9190 = dma.hbm_to_vmem [thread:$0]  (!%p10891_p10), %s10893_s6, 16, %s432_s1, [#allocation12]  }
  0xa9   : > { %p9772_p5 = pneg %p9771_p2 }
  0xab   : > { %p9779_p13 = pnand %p9778_p12, %p9772_p5 }
  0xad   : > { %9782 = shalt.err (!%p9779_p13)
}
  0xae   : > { %s10857_s25 = smov 128   ;;  %s10858_s5 = smov 8  }
  0xaf   : > { %9196 = dma.hbm_to_vmem [thread:$0]  (!%p10891_p10), %s10826_s8, 12288, %s453_s7, [#allocation15], %s10857_s25, %s10857_s25, %s10858_s5  }
  0xb0   : > { %s10026_s18 = smov [#allocation19]   ;;  %s10027_s11 = smov [#allocation22]  }
  0xb1   : > { %s477_s29 = sshll.u32 %s10026_s18, 4  ;;  %s501_s4 = sshll.u32 %s10027_s11, 4  ;;  %s478_s29 = int_to_ptr.vmem [resolvable:$true] %s477_s29  ;;  %s502_s4 = int_to_ptr.vmem [resolvable:$true] %s501_s4 }
  0xb2   : > { %s9794_s9 = scalar_lea.vmem %s478_s29, 32  ;;  %p9802_p0 = scmp.lt.s32.totalorder %s478_s29, %s478_s29 }
  0xb3   : > { %p9795_p6 = scmp.ne.s32.totalorder %s478_s29, %s9794_s9  ;;  %p9803_p2 = scmp.lt.s32.totalorder %s9794_s9, %s9794_s9 }
  0xb5   : > { %p9797_p7 = pnand %p9795_p6, %p10890_p8  ;;  %p9804_p5 = por %p9803_p2, %p9802_p0 }
  0xb7   : > { %p9798_p9 = pneg %p9797_p7 }
  0xb9   : > { %p9805_p11 = pnand %p9804_p5, %p9798_p9 }
  0xbb   : > { %9808 = shalt.err (!%p9805_p11)
}
  0xbc   : > { %9202 = dma.hbm_to_vmem [thread:$0]  (!%p10891_p10), %s10828_s10, 32, %s478_s29, [#allocation18]  }
  0xbd   : > { %s9820_s22 = scalar_lea.vmem %s502_s4, 128  ;;  %p9828_p3 = scmp.lt.s32.totalorder %s502_s4, %s502_s4 }
  0xbe   : > { %p9821_p1 = scmp.ne.s32.totalorder %s502_s4, %s9820_s22  ;;  %p9829_p6 = scmp.lt.s32.totalorder %s9820_s22, %s9820_s22 }
  0xc0   : > { %p9823_p12 = pnand %p9821_p1, %p10890_p8  ;;  %p9830_p7 = por %p9829_p6, %p9828_p3 }
  0xc2   : > { %p9824_p13 = pneg %p9823_p12 }
  0xc4   : > { %p9831_p4 = pnand %p9830_p7, %p9824_p13 }
  0xc6   : > { %9834 = shalt.err (!%p9831_p4)
}
  0xc7   : > { %9208 = dma.hbm_to_vmem [thread:$0]  (!%p10891_p10), %s10830_s12, 128, %s502_s4, [#allocation21]  }
  0xc8   : > { %s10028_s9 = smov [#allocation23]   ;;  %s10894_s1 = sshll.u32 %s10009_s16, 7 }
  0xc9   : > { %s512_s29 = sshll.u32 %s10028_s9, 4  ;;  %s10345_s5 = scalar_lea.hbm %s10818_s0, %s10894_s1  ;;  %s513_s29 = int_to_ptr.vmem [resolvable:$true] %s512_s29 }
  0xca   : > { %s9846_s22 = scalar_lea.vmem %s513_s29, 128  ;;  %p9854_p0 = scmp.lt.s32.totalorder %s513_s29, %s513_s29 }
  0xcb   : > { %p9847_p3 = scmp.ne.s32.totalorder %s513_s29, %s9846_s22  ;;  %p9855_p2 = scmp.lt.s32.totalorder %s9846_s22, %s9846_s22 }
  0xcd   : > { %p9849_p4 = pnand %p9847_p3, %p10890_p8  ;;  %p9856_p5 = por %p9855_p2, %p9854_p0 }
  0xcf   : > { %p9850_p9 = pneg %p9849_p4 }
  0xd1   : > { %p9857_p11 = pnand %p9856_p5, %p9850_p9 }
  0xd3   : > { %9860 = shalt.err (!%p9857_p11)
}
  0xd4   : > { %9211 = dma.hbm_to_vmem [thread:$0]  (!%p10891_p10), %s10831_s13, 128, %s513_s29, [#allocation24]  }
  0xd5   : > { %s10895_s26 = sshll.u32 %s10243_s28, 3  ;;  %s8171_s9 = sshll.u32 %s10243_s28, 4 }
  0xd6   : > { %s527_s25 = scalar_lea.vmem [#allocation2], %s10895_s26  ;;  %s524_s1 = scalar_lea.sflag [#allocation3], %s10243_s28 }
  0xd7   : > { %s534_s11 = sshll.u32 %s527_s25, 4  ;;  %s9861_s7 = scalar_lea.hbm %s10345_s5, 128  ;;  %s10357_s11 = int_to_ptr.vmem [resolvable:$true] %s534_s11 }
  0xd8   : > { %p9862_p8 = scmp.ne.s32.totalorder %s10345_s5, %s9861_s7  ;;  %p10896_p1 = scmp.ne.s32.totalorder %s10887_s24, 0 }
  0xd9   : > { %s9866_s4 = scalar_lea.hbm %s10818_s0, 256  ;;  %p9867_p10 = scmp.lt.s32.totalorder %s10345_s5, %s10818_s0 }
  0xda   : > { %p9864_p12 = pnand %p9862_p8, %p10896_p1  ;;  %p9868_p6 = scmp.lt.s32.totalorder %s9866_s4, %s9861_s7 }
  0xdc   : > { %p9865_p13 = pneg %p9864_p12  ;;  %p9869_p7 = por %p9868_p6, %p9867_p10 }
  0xde   : > { %p9870_p3 = pnand %p9869_p7, %p9865_p13 }
  0xe0   : > { %9873 = shalt.err (!%p9870_p3)
}
  0xe1   : > { %s9874_s29 = scalar_lea.vmem %s10357_s11, 128  ;;  %s10029_s26 = smov [#allocation2]  }
  0xe2   : > { %p9875_p4 = scmp.ne.s32.totalorder %s10357_s11, %s9874_s29  ;;  %s9879_s25 = sshll.u32 %s10029_s26, 4  ;;  %s9880_s25 = int_to_ptr.vmem [resolvable:$false] %s9879_s25 }
  0xe3   : > { %s9881_s23 = scalar_lea.vmem %s9880_s25, 256  ;;  %p9882_p2 = scmp.lt.s32.totalorder %s10357_s11, %s9880_s25 }
  0xe4   : > { %p9877_p9 = pnand %p9875_p4, %p10896_p1  ;;  %p9883_p5 = scmp.lt.s32.totalorder %s9881_s23, %s9874_s29 }
  0xe6   : > { %p9878_p0 = pneg %p9877_p9  ;;  %p9884_p11 = por %p9883_p5, %p9882_p2 }
  0xe8   : > { %p9885_p8 = pnand %p9884_p11, %p9878_p0 }
  0xea   : > { %9888 = shalt.err (!%p9885_p8)
}
  0xeb   : > { %p10897_p12 = scmp.ne.s32.totalorder %s10885_s14, 0  ;;  %s9108_s6 = sshll.u32 %s10009_s16, 8 }
  0xec   : > { %s569_s7 = scalar_lea.vmem [#allocation7], %s8171_s9  ;;  %s10389_s29 = scalar_lea.hbm %s10820_s2, %s9108_s6 }
  0xed   : > { %9215 = dma.hbm_to_vmem [thread:$0]  (!%p10897_p12), %s10345_s5, 128, %s10357_s11, %s524_s1, %s10889_s27, %s10889_s27, %s10888_s21  }
  0xee   : > { %s576_s22 = sshll.u32 %s569_s7, 4  ;;  %s9889_s26 = scalar_lea.hbm %s10389_s29, 256  ;;  %s577_s22 = int_to_ptr.vmem [resolvable:$true] %s576_s22 }
  0xef   : > { %p9890_p13 = scmp.ne.s32.totalorder %s10389_s29, %s9889_s26  ;;  %s9894_s28 = scalar_lea.hbm %s10820_s2, 512 }
  0xf0   : > { %p9895_p7 = scmp.lt.s32.totalorder %s10389_s29, %s10820_s2  ;;  %p9896_p3 = scmp.lt.s32.totalorder %s9894_s28, %s9889_s26 }
  0xf1   : > { %p9892_p10 = pnand %p9890_p13, %p10896_p1 }
  0xf2   : > { %p9897_p4 = por %p9896_p3, %p9895_p7 }
  0xf3   : > { %p9893_p6 = pneg %p9892_p10 }
  0xf5   : > { %p9898_p9 = pnand %p9897_p4, %p9893_p6 }
  0xf7   : > { %9901 = shalt.err (!%p9898_p9)
}
  0xf8   : > { %s9902_s11 = scalar_lea.vmem %s577_s22, 256  ;;  %s10030_s9 = smov [#allocation7]  }
  0xf9   : > { %p9903_p0 = scmp.ne.s32.totalorder %s577_s22, %s9902_s11  ;;  %s9907_s1 = sshll.u32 %s10030_s9, 4  ;;  %s9908_s1 = int_to_ptr.vmem [resolvable:$false] %s9907_s1 }
  0xfa   : > { %s9909_s23 = scalar_lea.vmem %s9908_s1, 512  ;;  %p9910_p11 = scmp.lt.s32.totalorder %s577_s22, %s9908_s1 }
  0xfb   : > { %p9905_p2 = pnand %p9903_p0, %p10896_p1  ;;  %p9911_p8 = scmp.lt.s32.totalorder %s9909_s23, %s9902_s11 }
  0xfd   : > { %p9906_p5 = pneg %p9905_p2  ;;  %p9912_p13 = por %p9911_p8, %p9910_p11 }
  0xff   : > { %p9913_p10 = pnand %p9912_p13, %p9906_p5 }
 0x101   : > { %9916 = shalt.err (!%p9913_p10)
}
 0x102   : > { %s10898_s6 = smov 8   ;;  %s10899_s7 = smov 128  }
 0x103   : > { %9221 = dma.hbm_to_vmem [thread:$0]  (!%p10897_p12), %s10389_s29, 256, %s577_s22, %s10267_s15, %s10899_s7, %s10899_s7, %s10898_s6  }
 0x104   : > { %p10900_p1 = scmp.ne.s32.totalorder %s10870_s20, 0 }
 0x105   : > { %s10414_s24 = sand.u32 (!%p10900_p1), 1, %s10001_s30   ;;  %p10901_p6 = scmp.ne.s32.totalorder (!%p10900_p1), %s10881_s17, 0 }
 0x106   : > { %588 = sbr.rel (%p10900_p1) target bundleno = 2349 (0x92d), region = 76  ;;  %s8175_s4 = sshll.u32 (!%p10900_p1), %s10414_s24, 3 }
 0x107   : > { %s591_s18 = scalar_lea.sflag (!%p10900_p1), [#allocation3], %s10414_s24  ;;  %s594_s26 = scalar_lea.vmem (!%p10900_p1), [#allocation2], %s8175_s4 }
 0x10b   : > { %9960 = dma.done.wait (%p10901_p6), %s591_s18, 128  }
 0x10c   : > { %9962 = vsyncadd (%p10901_p6), %s591_s18, 4294967168  ;;  %s599_s15 = sand.u32 1, %s10135_s19   ;;  %s10423_s20 = scalar_lea.vmem [#allocation5], %s8175_s4 }
 0x10d   : > { %s600_s14 = scalar_lea.sflag [#allocation6], %s599_s15 }
 0x10e   : > { %9964 = dma.done.wait (%p10901_p6), %s600_s14, 384  }
 0x10f   : > { %9966 = vsyncadd (%p10901_p6), %s600_s14, 4294966912  ;;  %s8177_s22 = sshll.u32 %s10414_s24, 4  ;;  %p10902_p12 = scmp.eq.s32.totalorder %s10135_s19, 0 }
 0x110   : > { %s10430_s29 = scalar_lea.vmem [#allocation7], %s8177_s22 }
 0x111   : > { %9968 = dma.done.wait (%p10902_p12), [#allocation9], 256   ;;  %p10903_p7 = pmov %p10902_p12 }
 0x113   : > { %9970 = vsyncadd (%p10903_p7), [#allocation9], 4294967040  ;;  %p10904_p3 = pmov %p10903_p7 }
 0x115   : > { %9972 = dma.done.wait (%p10904_p3), [#allocation12], 1744   ;;  %p10905_p4 = pmov %p10904_p3 }
 0x116   : > { %p10906_p9 = pmov %p10904_p3 }
 0x117   : > { %9974 = vsyncadd (%p10905_p4), [#allocation12], 4294965552 }
 0x118   : > { %9976 = dma.done.wait (%p10906_p9), [#allocation15], 12304   ;;  %p10907_p0 = pmov %p10904_p3 }
 0x11a   : > { %9978 = vsyncadd (%p10907_p0), [#allocation15], 4294954992  ;;  %p10908_p2 = pmov %p10907_p0 }
 0x11b   : > { %p10909_p5 = pmov %p10907_p0 }
 0x11c   : > { %9980 = dma.done.wait (%p10908_p2), [#allocation18], 64  }
 0x11d   : > { %9982 = vsyncadd (%p10909_p5), [#allocation18], 4294967232  ;;  %p10910_p11 = pmov %p10907_p0 }
 0x11e   : > { %p10911_p8 = pmov %p10907_p0 }
 0x11f   : > { %9984 = dma.done.wait (%p10910_p11), [#allocation21], 98432  }
 0x120   : > { %9986 = vsyncadd (%p10911_p8), [#allocation21], 4294868864  ;;  %p10912_p13 = pmov %p10907_p0 }
 0x121   : > { %p10913_p10 = pmov %p10907_p0 }
 0x122   : > { %9988 = dma.done.wait (%p10912_p13), [#allocation24], 128  }
 0x123   : > { %9990 = vsyncadd (%p10913_p10), [#allocation24], 4294967168  ;;  %v10031_v0 = vmov 0.0   ;;  %vm10032_vm0 = vmmov 0   ;;  %v10456_v1 = vld [vmem:[%s594_s26] sm:$0xff]   ;;  %vm729_vm1 = vcmask 130048  }
 0x124   : > { %9114 = vmatprep.subr.bf16.mxu0 %v10031_v0  ;;  %9120 = vmatprep.subr.bf16.mxu1 %v10031_v0  ;;  %v10458_v2 = vld [vmem:[#allocation8] sm:$0xff]   ;;  %v10462_v3 = vld [vmem:[#allocation10] sm:$0xff]   ;;  %v10033_v5 = vmov 0   ;;  %v9311_v7 = vld [vmem:[#allocation11 + $0x28] sm:$0xff]   ;;  %vm949_vm2 = vcmask 1043456   ;;  %s10034_s17 = smov 72  }
 0x125   : > { %9116 = vmatprep.mubr.msk.bf16.mxu0 %vm10032_vm0, %v10031_v0  ;;  %9122 = vmatprep.mubr.msk.bf16.mxu1 %vm10032_vm0, %v10031_v0  ;;  %v9309_v4 = vld [vmem:[#allocation11 + $0x38] sm:$0xff]   ;;  %v9310_v6 = vld [vmem:[#allocation11 + $0x30] sm:$0xff]   ;;  %v9312_v8 = vld [vmem:[#allocation11 + $0x20] sm:$0xff]   ;;  %s10035_s25 = smov 16   ;;  %vm831_vm3 = vcmask 588800   ;;  %vm946_vm4 = vcmask 719872  }
 0x126   : > { %9115 = vmatpush3.bf16.msra.mxu0 %v10456_v1  ;;  %9121 = vmatpush3.bf16.msra.mxu1 %v10456_v1  ;;  %v9313_v9 = vld [vmem:[#allocation11 + $0x18] sm:$0xff]   ;;  %v9314_v10 = vld [vmem:[#allocation11 + $0x10] sm:$0xff]   ;;  %v9315_v11 = vld [vmem:[#allocation11 + $0x8] sm:$0xff]   ;;  %s8189_s21 = sshll.u32 %s10414_s24, 7  ;;  %s9109_s27 = sshll.u32 %s10135_s19, 11 }
 0x127   : > { %953 = vmatprep.subr.bf16.mxu0 %v10033_v5  ;;  %v9316_v12 = vld [vmem:[#allocation11] sm:$0xff]   ;;  %v9317_v13 = vld [vmem:[#allocation11 + $0x68] ss:$0 sps:$4 sm:$0xff]   ;;  %v9319_v16 = vld [vmem:[#allocation11 + $0x58] sm:$0xff]   ;;  %s10644_s28 = scalar_lea.vmem [#allocation25], %s8189_s21  ;;  %s10914_s1 = sld [smem:[#allocation48_spill]] }
 0x128   : > { %v951_v14 = vsel %vm949_vm2, %v9317_v13, 0  ;;  %v9318_v15 = vld [vmem:[#allocation11 + $0x60] sm:$0xff]   ;;  %v9320_v17 = vld [vmem:[#allocation11 + $0x50] sm:$0xff]   ;;  %v9321_v18 = vld [vmem:[#allocation11 + $0x48] sm:$0xff]   ;;  %s7930_s5 = sshll.u32 %s10644_s28, 4  ;;  %s7917_s6 = scalar_lea.sflag [#allocation4], %s10414_s24  ;;  %s10773_s5 = int_to_ptr.vmem [resolvable:$true] %s7930_s5 }
 0x129   : > { %9117 = vmatmul.mubr.msk.bf16.vlgmr.msra.gmra.mxu0 %vm729_vm1, %v10458_v2  ;;  %9123 = vmatmul.mubr.msk.bf16.vlgmr.msra.gmra.mxu1 %vm729_vm1, %v10462_v3  ;;  %v9322_v19 = vld [vmem:[#allocation11 + $0x40] sm:$0xff]   ;;  %v9377_v37 = vld [vmem:[#allocation16 + $0x164] ss:$8 sps:$4 sm:$0xff]   ;;  %v9375_v38 = vld [vmem:[#allocation16 + $0x160] ss:$8 sps:$4 sm:$0xff]   ;;  %s9917_s7 = scalar_lea.vmem %s10773_s5, 2048 }
 0x12a   : > { %1055 = vmatprep.mubr.bf16.mxu1 %v10033_v5  ;;  %954 = vmatpush1.bf16.msra.mxu0 %v9309_v4  ;;  %v10486_v34 = vld [vmem:[%s10423_s20] sm:$0xff]   ;;  %v9386_v41 = vld [vmem:[#allocation16 + $0x144] ss:$8 sps:$4 sm:$0xff]   ;;  %v9384_v42 = vld [vmem:[#allocation16 + $0x140] ss:$8 sps:$4 sm:$0xff]   ;;  %p9918_p1 = scmp.ne.s32.totalorder %s10773_s5, %s9917_s7  ;;  %p10915_p6 = scmp.ne.s32.totalorder %s10882_s3, 0 }
 0x12b   : > { %955 = vmatprep.subr.bf16.mxu0 %v10033_v5  ;;  %1037 = vmatprep.subr.bf16.mxu1 %v10486_v34  ;;  %v9372_v35 = vld [vmem:[#allocation16 + $0x170] ss:$8 sps:$4 sm:$0xff]   ;;  %v9374_v36 = vld [vmem:[#allocation16 + $0x174] ss:$8 sps:$4 sm:$0xff]   ;;  %v9398_v45 = vld [vmem:[#allocation16 + $0x124] ss:$8 sps:$4 sm:$0xff]  }
 0x12c   : > { %v9380_v39 = vld [vmem:[#allocation16 + $0x154] ss:$8 sps:$4 sm:$0xff]   ;;  %v9378_v40 = vld [vmem:[#allocation16 + $0x150] ss:$8 sps:$4 sm:$0xff]   ;;  %v9396_v46 = vld [vmem:[#allocation16 + $0x120] ss:$8 sps:$4 sm:$0xff]   ;;  %p9919_p12 = pnand %p9918_p1, %p10915_p6 }
 0x12d   : > { %v9392_v43 = vld [vmem:[#allocation16 + $0x134] ss:$8 sps:$4 sm:$0xff]   ;;  %v9390_v44 = vld [vmem:[#allocation16 + $0x130] ss:$8 sps:$4 sm:$0xff]   ;;  %v9410_v49 = vld [vmem:[#allocation16 + $0x104] ss:$8 sps:$4 sm:$0xff]   ;;  %s10771_s23 = scalar_lea.hbm %s10914_s1, %s9109_s27 }
 0x12e   : > { %956 = vmatpush1.bf16.msra.mxu0 %v9310_v6  ;;  %v9404_v47 = vld [vmem:[#allocation16 + $0x114] ss:$8 sps:$4 sm:$0xff]   ;;  %v9402_v48 = vld [vmem:[#allocation16 + $0x110] ss:$8 sps:$4 sm:$0xff]   ;;  %v9408_v50 = vld [vmem:[#allocation16 + $0x100] ss:$8 sps:$4 sm:$0xff]   ;;  %p9920_p7 = pneg %p9919_p12 }
 0x12f   : > { %957 = vmatprep.subr.bf16.mxu0 %v10033_v5  ;;  %v9416_v51 = vld [vmem:[#allocation16 + $0x1f4] ss:$8 sps:$4 sm:$0xff]   ;;  %v9414_v52 = vld [vmem:[#allocation16 + $0x1f0] ss:$8 sps:$4 sm:$0xff]   ;;  %v9422_v53 = vld [vmem:[#allocation16 + $0x1e4] ss:$8 sps:$4 sm:$0xff]  }
 0x130   : > { %v9420_v54 = vld [vmem:[#allocation16 + $0x1e0] ss:$8 sps:$4 sm:$0xff]   ;;  %v9428_v55 = vld [vmem:[#allocation16 + $0x1d4] ss:$8 sps:$4 sm:$0xff]   ;;  %v9426_v57 = vld [vmem:[#allocation16 + $0x1d0] ss:$8 sps:$4 sm:$0xff]  }
 0x131   : > { %v8210_v56 = vld [vmem:[#allocation13] ss:$0 sm:$0xff]  ;;  %v9434_v59 = vld [vmem:[#allocation16 + $0x1c4] ss:$8 sps:$4 sm:$0xff]   ;;  %v8211_v61 = vld [vmem:[#allocation14] ss:$0 sm:$0xff] }
 0x132   : > { %958 = vmatpush1.bf16.msra.mxu0 %v9311_v7  ;;  %v9432_v63 = vld [vmem:[#allocation16 + $0x1c0] ss:$8 sps:$4 sm:$0xff]   ;;  %s10036_s19 = smov [#allocation25]  }
 0x133   : > { %959 = vmatprep.subr.bf16.mxu0 %v10033_v5  ;;  %s9921_s4 = sshll.u32 %s10036_s19, 4  ;;  %s9922_s4 = int_to_ptr.vmem [resolvable:$false] %s9921_s4 }
 0x134   : > { %s9923_s18 = scalar_lea.vmem %s9922_s4, 4096  ;;  %p9924_p3 = scmp.lt.s32.totalorder %s10773_s5, %s9922_s4 }
 0x135   : > { %p9925_p4 = scmp.lt.s32.totalorder %s9923_s18, %s9917_s7 }
 0x136   : > { %960 = vmatpush1.bf16.msra.mxu0 %v9312_v8 }
 0x137   : > { %961 = vmatprep.subr.bf16.mxu0 %v10033_v5  ;;  %p9926_p9 = por %p9925_p4, %p9924_p3 }
 0x139   : > { %p9927_p0 = pnand %p9926_p9, %p9920_p7 }
 0x13a   : > { %962 = vmatpush1.bf16.msra.mxu0 %v9313_v9  ;;  %v9438_v9 = vld [vmem:[#allocation16 + $0x1b0] ss:$8 sps:$4 sm:$0xff]  }
 0x13b   : > { %963 = vmatprep.subr.bf16.mxu0 %v10033_v5 }
 0x13e   : > { %964 = vmatpush1.bf16.msra.mxu0 %v9314_v10  ;;  %v9446_v10 = vld [vmem:[#allocation16 + $0x1a4] ss:$8 sps:$4 sm:$0xff]  }
 0x13f   : > { %965 = vmatprep.subr.bf16.mxu0 %v10033_v5 }
 0x142   : > { %966 = vmatpush1.bf16.msra.mxu0 %v9315_v11 }
 0x143   : > { %967 = vmatprep.subr.bf16.mxu0 %v10033_v5 }
 0x146   : > { %968 = vmatpush1.bf16.msra.mxu0 %v9316_v12 }
 0x147   : > { %973 = vmatprep.subr.bf16.mxu0 %v10033_v5 }
 0x14a   : > { %974 = vmatpush2.bf16.msra.mxu0 %v951_v14  ;;  %v9444_v14 = vld [vmem:[#allocation16 + $0x1a0] ss:$8 sps:$4 sm:$0xff]  }
 0x14b   : > { %975 = vmatprep.subr.bf16.mxu0 %v10033_v5 }
 0x14e   : > { %976 = vmatpush2.bf16.msra.mxu0 %v9318_v15  ;;  %v9326_v15 = vld [vmem:[#allocation16 + $0x74] ss:$8 sps:$4 sm:$0xff]  }
 0x14f   : > { %977 = vmatprep.subr.bf16.mxu0 %v10033_v5 }
 0x152   : > { %978 = vmatpush2.bf16.msra.mxu0 %v9319_v16  ;;  %v9324_v16 = vld [vmem:[#allocation16 + $0x70] ss:$8 sps:$4 sm:$0xff]  }
 0x153   : > { %979 = vmatprep.subr.bf16.mxu0 %v10033_v5 }
 0x156   : > { %980 = vmatpush2.bf16.msra.mxu0 %v9320_v17  ;;  %v9329_v17 = vld [vmem:[#allocation16 + $0x64] ss:$8 sps:$4 sm:$0xff]  }
 0x157   : > { %981 = vmatprep.subr.bf16.mxu0 %v10033_v5 }
 0x15a   : > { %982 = vmatpush2.bf16.msra.mxu0 %v9321_v18  ;;  %v9327_v18 = vld [vmem:[#allocation16 + $0x60] ss:$8 sps:$4 sm:$0xff]  }
 0x15b   : > { %983 = vmatprep.subr.bf16.mxu0 %v10033_v5 }
 0x15e   : > { %984 = vmatpush2.bf16.msra.mxu0 %v9322_v19  ;;  %v9332_v19 = vld [vmem:[#allocation16 + $0x54] ss:$8 sps:$4 sm:$0xff]  }
 0x15f   : > { %1732 = vmatprep.subr.bf16.mxu0 %v9374_v36  ;;  %v9357_v36 = vld [vmem:[#allocation16 + $0xc0] ss:$8 sps:$4 sm:$0xff]  }
 0x1e9   : > { %v767_v20 = vpop.f32.mrf.mxu0  ;;  %v817_v21 = vpop.f32.mrf.mxu1 }
 0x1eb   : > { %v9118_v22 = vpop.f32.mrf.mxu0  ;;  %v9124_v23 = vpop.f32.mrf.mxu1 }
 0x1ec   : > { %v9338_v22 = vld [vmem:[#allocation16 + $0x34] ss:$8 sps:$4 sm:$0xff]   ;;  %v9336_v23 = vld [vmem:[#allocation16 + $0x30] ss:$8 sps:$4 sm:$0xff]  }
 0x1ed   : > { %v770_v24 = vpop.f32.mrf.mxu0  ;;  %v820_v25 = vpop.f32.mrf.mxu1 }
 0x1ee   : > { %v774_v26 = vpack.c.bf16 %v770_v24, %v767_v20  ;;  %v824_v29 = vpack.c.bf16 %v820_v25, %v817_v21  ;;  %v9330_v20 = vld [vmem:[#allocation16 + $0x50] ss:$8 sps:$4 sm:$0xff]   ;;  %v9333_v21 = vld [vmem:[#allocation16 + $0x40] ss:$8 sps:$4 sm:$0xff]   ;;  %v9341_v24 = vld [vmem:[#allocation16 + $0x24] ss:$8 sps:$4 sm:$0xff]  }
 0x1ef   : > { %v9119_v27 = vpop.f32.mrf.mxu0  ;;  %v9125_v28 = vpop.f32.mrf.mxu1  ;;  %v9344_v25 = vld [vmem:[#allocation16 + $0x14] ss:$8 sps:$4 sm:$0xff]  }
 0x1f0   : > { %826 = vrot.lane.b32.xlu0 %v774_v26, %s10034_s17  ;;  %v9342_v26 = vld [vmem:[#allocation16 + $0x10] ss:$8 sps:$4 sm:$0xff]   ;;  %v9347_v27 = vld [vmem:[#allocation16 + $0x4] ss:$8 sps:$4 sm:$0xff]   ;;  %v9345_v28 = vld [vmem:[#allocation16] ss:$8 sps:$4 sm:$0xff]  }
 0x1f4   : > { %829 = vrot.lane.b32.xlu0 %v824_v29, %s10035_s25  ;;  %v9350_v29 = vld [vmem:[#allocation16 + $0xf4] ss:$8 sps:$4 sm:$0xff]  }
 0x262   : > { %v827_v30 = vpop.permute.xlu0 %826 }
 0x263   : > { %v834_v33 = vsel %vm831_vm3, %v10456_v1, %v827_v30  ;;  %v9440_v1 = vld [vmem:[#allocation16 + $0x1b4] ss:$8 sps:$4 sm:$0xff]  }
 0x266   : > { %v830_v31 = vpop.permute.xlu0 %829 }
 0x267   : > { %v837_v32 = vsel %vm729_vm1, %v827_v30, %v830_v31  ;;  %v9348_v30 = vld [vmem:[#allocation16 + $0xf0] ss:$8 sps:$4 sm:$0xff]   ;;  %v9353_v31 = vld [vmem:[#allocation16 + $0xe4] ss:$8 sps:$4 sm:$0xff]  }
 0x268   : > { %8209 = vmatprep.mubr.msk.bf16.mxu0 %vm946_vm4, %v837_v32  ;;  %v9351_v32 = vld [vmem:[#allocation16 + $0xe0] ss:$8 sps:$4 sm:$0xff]  }
 0x269   : > { %986 = vmatmul.mubr.bf16.vlgmr.msra.gmra.mxu0 %v834_v33  ;;  %v9356_v33 = vld [vmem:[#allocation16 + $0xd4] ss:$8 sps:$4 sm:$0xff]  }
 0x26a   : > { %1733 = vmatpush1.bf16.msra.mxu0 %v9372_v35  ;;  %v9359_v35 = vld [vmem:[#allocation16 + $0xc4] ss:$8 sps:$4 sm:$0xff]  }
 0x26b   : > { %1734 = vmatprep.subr.bf16.mxu0 %v9377_v37  ;;  %v9362_v37 = vld [vmem:[#allocation16 + $0xb4] ss:$8 sps:$4 sm:$0xff]  }
 0x26e   : > { %1735 = vmatpush1.bf16.msra.mxu0 %v9375_v38  ;;  %v9360_v38 = vld [vmem:[#allocation16 + $0xb0] ss:$8 sps:$4 sm:$0xff]  }
 0x26f   : > { %1736 = vmatprep.subr.bf16.mxu0 %v9380_v39  ;;  %v9365_v39 = vld [vmem:[#allocation16 + $0xa4] ss:$8 sps:$4 sm:$0xff]  }
 0x272   : > { %1737 = vmatpush1.bf16.msra.mxu0 %v9378_v40  ;;  %v9363_v40 = vld [vmem:[#allocation16 + $0xa0] ss:$8 sps:$4 sm:$0xff]  }
 0x273   : > { %1738 = vmatprep.subr.bf16.mxu0 %v9386_v41  ;;  %v9368_v41 = vld [vmem:[#allocation16 + $0x94] ss:$8 sps:$4 sm:$0xff]  }
 0x276   : > { %1739 = vmatpush1.bf16.msra.mxu0 %v9384_v42  ;;  %v9366_v42 = vld [vmem:[#allocation16 + $0x90] ss:$8 sps:$4 sm:$0xff]  }
 0x277   : > { %1740 = vmatprep.subr.bf16.mxu0 %v9392_v43  ;;  %v9371_v43 = vld [vmem:[#allocation16 + $0x84] ss:$8 sps:$4 sm:$0xff]  }
 0x27a   : > { %1741 = vmatpush1.bf16.msra.mxu0 %v9390_v44  ;;  %v9369_v44 = vld [vmem:[#allocation16 + $0x80] ss:$8 sps:$4 sm:$0xff]  }
 0x27b   : > { %1742 = vmatprep.subr.bf16.mxu0 %v9398_v45  ;;  %v9452_v45 = vld [vmem:[#allocation16 + $0x194] ss:$8 sps:$4 sm:$0xff]  }
 0x27e   : > { %1743 = vmatpush1.bf16.msra.mxu0 %v9396_v46  ;;  %v9383_v46 = vld [vmem:[#allocation16 + $0x274] ss:$8 sps:$4 sm:$0xff]  }
 0x27f   : > { %1744 = vmatprep.subr.bf16.mxu0 %v9404_v47  ;;  %v9450_v47 = vld [vmem:[#allocation16 + $0x190] ss:$8 sps:$4 sm:$0xff]  }
 0x282   : > { %1745 = vmatpush1.bf16.msra.mxu0 %v9402_v48  ;;  %v9381_v48 = vld [vmem:[#allocation16 + $0x270] ss:$8 sps:$4 sm:$0xff]  }
 0x283   : > { %1746 = vmatprep.subr.bf16.mxu0 %v9410_v49  ;;  %v9458_v49 = vld [vmem:[#allocation16 + $0x184] ss:$8 sps:$4 sm:$0xff]  }
 0x286   : > { %1747 = vmatpush1.bf16.msra.mxu0 %v9408_v50  ;;  %v9389_v50 = vld [vmem:[#allocation16 + $0x264] ss:$8 sps:$4 sm:$0xff]  }
 0x287   : > { %1748 = vmatprep.subr.bf16.mxu0 %v9416_v51  ;;  %v9456_v51 = vld [vmem:[#allocation16 + $0x180] ss:$8 sps:$4 sm:$0xff]  }
 0x28a   : > { %1749 = vmatpush2.bf16.msra.mxu0 %v9414_v52  ;;  %v9387_v52 = vld [vmem:[#allocation16 + $0x260] ss:$8 sps:$4 sm:$0xff]  }
 0x28b   : > { %1750 = vmatprep.subr.bf16.mxu0 %v9422_v53  ;;  %v9395_v53 = vld [vmem:[#allocation16 + $0x254] ss:$8 sps:$4 sm:$0xff]  }
 0x28e   : > { %1751 = vmatpush2.bf16.msra.mxu0 %v9420_v54  ;;  %v9393_v54 = vld [vmem:[#allocation16 + $0x250] ss:$8 sps:$4 sm:$0xff]  }
 0x28f   : > { %1752 = vmatprep.subr.bf16.mxu0 %v9428_v55  ;;  %v9401_v55 = vld [vmem:[#allocation16 + $0x244] ss:$8 sps:$4 sm:$0xff]  }
 0x292   : > { %1753 = vmatpush2.bf16.msra.mxu0 %v9426_v57  ;;  %v9407_v57 = vld [vmem:[#allocation16 + $0x234] ss:$8 sps:$4 sm:$0xff]  }
 0x293   : > { %1754 = vmatprep.subr.bf16.mxu0 %v9434_v59  ;;  %v9413_v59 = vld [vmem:[#allocation16 + $0x224] ss:$8 sps:$4 sm:$0xff]  }
 0x296   : > { %1755 = vmatpush2.bf16.msra.mxu0 %v9432_v63  ;;  %v9425_v63 = vld [vmem:[#allocation16 + $0x204] ss:$8 sps:$4 sm:$0xff]  }
 0x297   : > { %1756 = vmatprep.subr.bf16.mxu0 %v9440_v1  ;;  %v9431_v1 = vld [vmem:[#allocation16 + $0x2f4] ss:$8 sps:$4 sm:$0xff]  }
 0x29a   : > { %1757 = vmatpush2.bf16.msra.mxu0 %v9438_v9  ;;  %v9441_v9 = vld [vmem:[#allocation16 + $0x2d0] ss:$8 sps:$4 sm:$0xff]  }
 0x29b   : > { %1758 = vmatprep.subr.bf16.mxu0 %v9446_v10  ;;  %v9449_v10 = vld [vmem:[#allocation16 + $0x2c4] ss:$8 sps:$4 sm:$0xff]  }
 0x29e   : > { %1759 = vmatpush2.bf16.msra.mxu0 %v9444_v14  ;;  %v9461_v14 = vld [vmem:[#allocation16 + $0x2a4] ss:$8 sps:$4 sm:$0xff]  }
 0x29f   : > { %1760 = vmatprep.subr.bf16.mxu0 %v9452_v45  ;;  %v2072_v45 = vld [vmem:[#allocation20 + $0xc0] sm:$0xff] }
 0x2a2   : > { %1761 = vmatpush2.bf16.msra.mxu0 %v9450_v47 }
 0x2a3   : > { %1762 = vmatprep.subr.bf16.mxu0 %v9458_v49  ;;  %v2064_v49 = vld [vmem:[#allocation20 + $0x80] sm:$0xff] }
 0x2a6   : > { %1763 = vmatpush2.bf16.msra.mxu0 %v9456_v51 }
 0x329   : > { %v987_v58 = vpop.f32.mrf.mxu0 }
 0x32a   : > { %v1001_v60 = vmul.f32 %v8210_v56, %v987_v58  ;;  %v9405_v58 = vld [vmem:[#allocation16 + $0x230] ss:$8 sps:$4 sm:$0xff]  }
 0x32b   : > { %v989_v62 = vpop.f32.mrf.mxu0 }
 0x32c   : > { %v1010_v4 = vadd.f32 %v8211_v61, %v1001_v60  ;;  %v9411_v60 = vld [vmem:[#allocation16 + $0x220] ss:$8 sps:$4 sm:$0xff]   ;;  %v9417_v62 = vld [vmem:[#allocation16 + $0x210] ss:$8 sps:$4 sm:$0xff]  }
 0x32d   : > { %v990_v0 = vpop.f32.mrf.mxu0 }
 0x32e   : > { %v1002_v6 = vmul.f32 %v8210_v56, %v990_v0  ;;  %v1012_v11 = vmax.f32 %v1010_v4, 0.0  ;;  %v9399_v56 = vld [vmem:[#allocation16 + $0x240] ss:$8 sps:$4 sm:$0xff]   ;;  %v9429_v4 = vld [vmem:[#allocation16 + $0x2f0] ss:$8 sps:$4 sm:$0xff]  }
 0x32f   : > { %v992_v7 = vpop.f32.mrf.mxu0  ;;  %v9423_v0 = vld [vmem:[#allocation16 + $0x200] ss:$8 sps:$4 sm:$0xff]  }
 0x330   : > { %v1011_v8 = vadd.f32 %v8211_v61, %v1002_v6  ;;  %v9419_v61 = vld [vmem:[#allocation16 + $0x214] ss:$8 sps:$4 sm:$0xff]   ;;  %v9437_v6 = vld [vmem:[#allocation16 + $0x2e4] ss:$8 sps:$4 sm:$0xff]   ;;  %v9435_v7 = vld [vmem:[#allocation16 + $0x2e0] ss:$8 sps:$4 sm:$0xff]  }
 0x332   : > { %v1013_v12 = vmax.f32 %v1011_v8, 0.0  ;;  %v9443_v8 = vld [vmem:[#allocation16 + $0x2d4] ss:$8 sps:$4 sm:$0xff]  }
 0x334   : > { %v10489_v13 = vpack.c.bf16 %v1013_v12, %v1012_v11  ;;  %v9447_v11 = vld [vmem:[#allocation16 + $0x2c0] ss:$8 sps:$4 sm:$0xff]   ;;  %v9455_v12 = vld [vmem:[#allocation16 + $0x2b4] ss:$8 sps:$4 sm:$0xff]  }
 0x336   : > { %1038 = vmatpush1.bf16.msra.mxu1 %v10489_v13 }
 0x337   : > { %1082 = vmatprep.subr.bf16.mxu1 %v10486_v34 }
 0x339   : > { %8213 = vmatmul.mubr.msk.bf16.vlgmr.msra.gmra.mxu1 %vm729_vm1, %v10458_v2  ;;  %v9335_v2 = vld [vmem:[#allocation16 + $0x44] ss:$8 sps:$4 sm:$0xff]  }
 0x33a   : > { %1083 = vmatpush1.bf16.msra.mxu1 %v10489_v13  ;;  %1100 = vmatprep.mubr.bf16.mxu1 %v10033_v5 }
 0x33b   : > { %1689 = vmatprep.subr.bf16.mxu1 %v9326_v15  ;;  %v9459_v15 = vld [vmem:[#allocation16 + $0x2a0] ss:$8 sps:$4 sm:$0xff]  }
 0x341   : > { %8214 = vmatmul.mubr.msk.bf16.vlgmr.msra.gmra.mxu1 %vm729_vm1, %v10462_v3  ;;  %v9339_v3 = vld [vmem:[#allocation16 + $0x20] ss:$8 sps:$4 sm:$0xff]  }
 0x342   : > { %1690 = vmatpush1.bf16.msra.mxu1 %v9324_v16  ;;  %1721 = vmatprep.mubr.bf16.mxu1 %v10486_v34  ;;  %v9354_v34 = vld [vmem:[#allocation16 + $0xd0] ss:$8 sps:$4 sm:$0xff]   ;;  %v9464_v16 = vld [vmem:[#allocation16 + $0x294] ss:$8 sps:$4 sm:$0xff]  }
 0x343   : > { %1691 = vmatprep.subr.bf16.mxu1 %v9329_v17  ;;  %v9462_v17 = vld [vmem:[#allocation16 + $0x290] ss:$8 sps:$4 sm:$0xff]  }
 0x346   : > { %1692 = vmatpush1.bf16.msra.mxu1 %v9327_v18  ;;  %v9467_v18 = vld [vmem:[#allocation16 + $0x284] ss:$8 sps:$4 sm:$0xff]  }
 0x347   : > { %1693 = vmatprep.subr.bf16.mxu1 %v9332_v19  ;;  %v9465_v19 = vld [vmem:[#allocation16 + $0x280] ss:$8 sps:$4 sm:$0xff]  }
 0x34a   : > { %1694 = vmatpush1.bf16.msra.mxu1 %v9330_v20  ;;  %v2104_v20 = vld [vmem:[#allocation20 + $0x1c0] sm:$0xff] }
 0x34b   : > { %1695 = vmatprep.subr.bf16.mxu1 %v9335_v2  ;;  %v2108_v2 = vld [vmem:[#allocation20 + $0x1e0] sm:$0xff] }
 0x34e   : > { %1696 = vmatpush1.bf16.msra.mxu1 %v9333_v21  ;;  %v8373_v21 = vcombine.low %v2104_v20, %v2108_v2 }
 0x34f   : > { %1697 = vmatprep.subr.bf16.mxu1 %v9338_v22  ;;  %v8374_v22 = vcombine.high %v2104_v20, %v2108_v2  ;;  %v2128_v2 = vld [vmem:[#allocation20 + $0x280] sm:$0xff] }
 0x352   : > { %1698 = vmatpush1.bf16.msra.mxu1 %v9336_v23 }
 0x353   : > { %1699 = vmatprep.subr.bf16.mxu1 %v9341_v24 }
 0x356   : > { %1700 = vmatpush1.bf16.msra.mxu1 %v9339_v3 }
 0x357   : > { %1701 = vmatprep.subr.bf16.mxu1 %v9344_v25 }
 0x35a   : > { %1702 = vmatpush1.bf16.msra.mxu1 %v9342_v26 }
 0x35b   : > { %1703 = vmatprep.subr.bf16.mxu1 %v9347_v27 }
 0x35e   : > { %1704 = vmatpush1.bf16.msra.mxu1 %v9345_v28 }
 0x35f   : > { %1705 = vmatprep.subr.bf16.mxu1 %v9350_v29 }
 0x362   : > { %1706 = vmatpush2.bf16.msra.mxu1 %v9348_v30 }
 0x363   : > { %1707 = vmatprep.subr.bf16.mxu1 %v9353_v31  ;;  %v2096_v31 = vld [vmem:[#allocation20 + $0x180] sm:$0xff] }
 0x366   : > { %1708 = vmatpush2.bf16.msra.mxu1 %v9351_v32  ;;  %v2100_v32 = vld [vmem:[#allocation20 + $0x1a0] sm:$0xff] }
 0x367   : > { %1709 = vmatprep.subr.bf16.mxu1 %v9356_v33 }
 0x36a   : > { %1710 = vmatpush2.bf16.msra.mxu1 %v9354_v34 }
 0x36b   : > { %1711 = vmatprep.subr.bf16.mxu1 %v9359_v35 }
 0x36e   : > { %1712 = vmatpush2.bf16.msra.mxu1 %v9357_v36  ;;  %v8366_v36 = vcombine.high %v2096_v31, %v2100_v32 }
 0x36f   : > { %1713 = vmatprep.subr.bf16.mxu1 %v9362_v37  ;;  %v2088_v37 = vld [vmem:[#allocation20 + $0x140] sm:$0xff] }
 0x372   : > { %1714 = vmatpush2.bf16.msra.mxu1 %v9360_v38  ;;  %v2092_v38 = vld [vmem:[#allocation20 + $0x160] sm:$0xff] }
 0x373   : > { %1715 = vmatprep.subr.bf16.mxu1 %v9365_v39  ;;  %v8365_v39 = vcombine.low %v2096_v31, %v2100_v32  ;;  %v2360_v31 = vld [vmem:[#allocation20 + $0x9c0] sm:$0xff] }
 0x374   : > { %v2364_v32 = vld [vmem:[#allocation20 + $0x9e0] sm:$0xff] }
 0x376   : > { %1716 = vmatpush2.bf16.msra.mxu1 %v9363_v40  ;;  %v8358_v40 = vcombine.high %v2088_v37, %v2092_v38 }
 0x377   : > { %1717 = vmatprep.subr.bf16.mxu1 %v9368_v41  ;;  %v2080_v41 = vld [vmem:[#allocation20 + $0x100] sm:$0xff] }
 0x37a   : > { %1718 = vmatpush2.bf16.msra.mxu1 %v9366_v42  ;;  %v2084_v42 = vld [vmem:[#allocation20 + $0x120] sm:$0xff] }
 0x37b   : > { %1719 = vmatprep.subr.bf16.mxu1 %v9371_v43  ;;  %v8357_v43 = vcombine.low %v2088_v37, %v2092_v38  ;;  %v8349_v47 = vcombine.low %v2080_v41, %v2084_v42 }
 0x37e   : > { %1720 = vmatpush2.bf16.msra.mxu1 %v9369_v44  ;;  %v8350_v44 = vcombine.high %v2080_v41, %v2084_v42 }
 0x37f   : > { %1775 = vmatprep.subr.bf16.mxu1 %v9383_v46  ;;  %v2076_v46 = vld [vmem:[#allocation20 + $0xe0] sm:$0xff] }
 0x380   : > { %v8341_v51 = vcombine.low %v2072_v45, %v2076_v46 }
 0x381   : > { %1722 = vmatmul.mubr.bf16.vlgmr.msra.gmra.mxu1 %v10489_v13  ;;  %v9453_v13 = vld [vmem:[#allocation16 + $0x2b0] ss:$8 sps:$4 sm:$0xff]  }
 0x382   : > { %1776 = vmatpush1.bf16.msra.mxu1 %v9381_v48  ;;  %v8342_v48 = vcombine.high %v2072_v45, %v2076_v46  ;;  %v1818_v45 = vld [vmem:[#allocation17] sm:$0x3] }
 0x383   : > { %1777 = vmatprep.subr.bf16.mxu1 %v9389_v50  ;;  %v2068_v50 = vld [vmem:[#allocation20 + $0xa0] sm:$0xff] }
 0x386   : > { %1778 = vmatpush1.bf16.msra.mxu1 %v9387_v52  ;;  %v8334_v52 = vcombine.high %v2064_v49, %v2068_v50 }
 0x387   : > { %1779 = vmatprep.subr.bf16.mxu1 %v9395_v53  ;;  %v2056_v53 = vld [vmem:[#allocation20 + $0x40] sm:$0xff] }
 0x38a   : > { %1780 = vmatpush1.bf16.msra.mxu1 %v9393_v54  ;;  %v2060_v54 = vld [vmem:[#allocation20 + $0x60] sm:$0xff] }
 0x38b   : > { %1781 = vmatprep.subr.bf16.mxu1 %v9401_v55  ;;  %v8333_v55 = vcombine.low %v2064_v49, %v2068_v50 }
 0x38e   : > { %1782 = vmatpush1.bf16.msra.mxu1 %v9399_v56  ;;  %v8326_v56 = vcombine.high %v2056_v53, %v2060_v54 }
 0x38f   : > { %1783 = vmatprep.subr.bf16.mxu1 %v9407_v57  ;;  %v2048_v57 = vld [vmem:[#allocation20] sm:$0xff] }
 0x392   : > { %1784 = vmatpush1.bf16.msra.mxu1 %v9405_v58  ;;  %v2052_v58 = vld [vmem:[#allocation20 + $0x20] sm:$0xff] }
 0x393   : > { %1785 = vmatprep.subr.bf16.mxu1 %v9413_v59  ;;  %v8325_v59 = vcombine.low %v2056_v53, %v2060_v54 }
 0x396   : > { %1786 = vmatpush1.bf16.msra.mxu1 %v9411_v60  ;;  %v8318_v60 = vcombine.high %v2048_v57, %v2052_v58 }
 0x397   : > { %1787 = vmatprep.subr.bf16.mxu1 %v9419_v61  ;;  %v2168_v61 = vld [vmem:[#allocation20 + $0x3c0] sm:$0xff] }
 0x39a   : > { %1788 = vmatpush1.bf16.msra.mxu1 %v9417_v62  ;;  %v2172_v62 = vld [vmem:[#allocation20 + $0x3e0] sm:$0xff] }
 0x39b   : > { %1789 = vmatprep.subr.bf16.mxu1 %v9425_v63  ;;  %v8317_v63 = vcombine.low %v2048_v57, %v2052_v58 }
 0x39e   : > { %1790 = vmatpush1.bf16.msra.mxu1 %v9423_v0  ;;  %v8438_v0 = vcombine.high %v2168_v61, %v2172_v62 }
 0x39f   : > { %1791 = vmatprep.subr.bf16.mxu1 %v9431_v1  ;;  %v2160_v1 = vld [vmem:[#allocation20 + $0x380] sm:$0xff] }
 0x3a2   : > { %1792 = vmatpush2.bf16.msra.mxu1 %v9429_v4  ;;  %v2164_v4 = vld [vmem:[#allocation20 + $0x3a0] sm:$0xff] }
 0x3a3   : > { %1793 = vmatprep.subr.bf16.mxu1 %v9437_v6  ;;  %v8437_v6 = vcombine.low %v2168_v61, %v2172_v62 }
 0x3a6   : > { %1794 = vmatpush2.bf16.msra.mxu1 %v9435_v7  ;;  %v8430_v7 = vcombine.high %v2160_v1, %v2164_v4 }
 0x3a7   : > { %1795 = vmatprep.subr.bf16.mxu1 %v9443_v8  ;;  %v8429_v8 = vcombine.low %v2160_v1, %v2164_v4 }
 0x3aa   : > { %1796 = vmatpush2.bf16.msra.mxu1 %v9441_v9  ;;  %v2152_v9 = vld [vmem:[#allocation20 + $0x340] sm:$0xff] }
 0x3ab   : > { %1797 = vmatprep.subr.bf16.mxu1 %v9449_v10  ;;  %v2156_v10 = vld [vmem:[#allocation20 + $0x360] sm:$0xff] }
 0x3ae   : > { %1798 = vmatpush2.bf16.msra.mxu1 %v9447_v11  ;;  %v8422_v11 = vcombine.high %v2152_v9, %v2156_v10 }
 0x3af   : > { %1799 = vmatprep.subr.bf16.mxu1 %v9455_v12  ;;  %v8421_v12 = vcombine.low %v2152_v9, %v2156_v10 }
 0x3b2   : > { %1800 = vmatpush2.bf16.msra.mxu1 %v9453_v13  ;;  %v2144_v13 = vld [vmem:[#allocation20 + $0x300] sm:$0xff] }
 0x3b3   : > { %1801 = vmatprep.subr.bf16.mxu1 %v9461_v14  ;;  %v2148_v14 = vld [vmem:[#allocation20 + $0x320] sm:$0xff] }
 0x3b6   : > { %1802 = vmatpush2.bf16.msra.mxu1 %v9459_v15  ;;  %v8414_v15 = vcombine.high %v2144_v13, %v2148_v14 }
 0x3b7   : > { %1803 = vmatprep.subr.bf16.mxu1 %v9464_v16  ;;  %v8413_v16 = vcombine.low %v2144_v13, %v2148_v14  ;;  %v2352_v14 = vld [vmem:[#allocation20 + $0x980] sm:$0xff] }
 0x3ba   : > { %1804 = vmatpush2.bf16.msra.mxu1 %v9462_v17  ;;  %v2136_v17 = vld [vmem:[#allocation20 + $0x2c0] sm:$0xff] }
 0x3bb   : > { %1805 = vmatprep.subr.bf16.mxu1 %v9467_v18  ;;  %v2140_v18 = vld [vmem:[#allocation20 + $0x2e0] sm:$0xff] }
 0x3bc   : > { %v8405_v20 = vcombine.low %v2136_v17, %v2140_v18 }
 0x3be   : > { %1806 = vmatpush2.bf16.msra.mxu1 %v9465_v19  ;;  %v8406_v19 = vcombine.high %v2136_v17, %v2140_v18  ;;  %v10517_v18 = vld [vmem:[%s10430_s29 + $0x4] ss:$8 sps:$4 sm:$0xff]  }
 0x3bf   : > { %6656 = vmatprep.subr.bf16.mxu1 %v8374_v22 }
 0x3f9   : > { %v1057_v23 = vpop.f32.mrf.mxu1 }
 0x3fb   : > { %v1059_v24 = vpop.f32.mrf.mxu1 }
 0x3fd   : > { %v1061_v3 = vpop.f32.mrf.mxu1 }
 0x3fe   : > { %v1066_v27 = vpack.c.bf16 %v1061_v3, %v1057_v23  ;;  %v2124_v3 = vld [vmem:[#allocation20 + $0x260] sm:$0xff] }
 0x3ff   : > { %v1063_v25 = vpop.f32.mrf.mxu1 }
 0x400   : > { %v1067_v26 = vpack.c.bf16 %v1063_v25, %v1059_v24  ;;  %v2120_v24 = vld [vmem:[#allocation20 + $0x240] sm:$0xff] }
 0x401   : > { %v1102_v28 = vpop.f32.mrf.mxu1  ;;  %v8390_v25 = vcombine.high %v2120_v24, %v2124_v3 }
 0x402   : > { %1764 = vmatprep.mubr.bf16.mxu0 %v1067_v26  ;;  %v8389_v26 = vcombine.low %v2120_v24, %v2124_v3 }
 0x403   : > { %v1104_v29 = vpop.f32.mrf.mxu1  ;;  %1765 = vmatmul.mubr.bf16.vlgmr.msra.gmra.mxu0 %v1066_v27  ;;  %v2112_v27 = vld [vmem:[#allocation20 + $0x200] sm:$0xff] }
 0x404   : > { %1900 = vmatprep.mubr.bf16.mxu0 %v10033_v5 }
 0x405   : > { %v1106_v30 = vpop.f32.mrf.mxu1 }
 0x406   : > { %v1111_v35 = vpack.c.bf16 %v1106_v30, %v1102_v28  ;;  %v2116_v28 = vld [vmem:[#allocation20 + $0x220] sm:$0xff] }
 0x407   : > { %v1108_v33 = vpop.f32.mrf.mxu1  ;;  %v8381_v30 = vcombine.low %v2112_v27, %v2116_v28 }
 0x408   : > { %v1112_v34 = vpack.c.bf16 %v1108_v33, %v1104_v29  ;;  %v8382_v29 = vcombine.high %v2112_v27, %v2116_v28  ;;  %v8630_v33 = vcombine.high %v2360_v31, %v2364_v32  ;;  %v2340_v27 = vld [vmem:[#allocation20 + $0x920] sm:$0xff] }
 0x40a   : > { %1807 = vmatprep.mubr.bf16.mxu1 %v1112_v34 }
 0x40b   : > { %1808 = vmatmul.mubr.bf16.vlgmr.msra.gmra.mxu1 %v1111_v35 }
 0x40c   : > { %6657 = vmatpush1.bf16.msra.mxu1 %v8373_v21  ;;  %v2132_v21 = vld [vmem:[#allocation20 + $0x2a0] sm:$0xff] }
 0x40d   : > { %6658 = vmatprep.subr.bf16.mxu1 %v8366_v36  ;;  %v8398_v22 = vcombine.high %v2128_v2, %v2132_v21  ;;  %v8397_v23 = vcombine.low %v2128_v2, %v2132_v21  ;;  %v1820_v36 = vlaneseq  ;;  %v2344_v21 = vld [vmem:[#allocation20 + $0x940] sm:$0xff] }
 0x410   : > { %6659 = vmatpush1.bf16.msra.mxu1 %v8365_v39 }
 0x411   : > { %6660 = vmatprep.subr.bf16.mxu1 %v8358_v40  ;;  %v10502_v40 = vshrl.u32 %v1820_v36, 7 }
 0x413   : > { %v10505_v41 = vsub.s32 1, %v10502_v40 }
 0x414   : > { %6661 = vmatpush1.bf16.msra.mxu1 %v8357_v43 }
 0x415   : > { %6662 = vmatprep.subr.bf16.mxu1 %v8350_v44  ;;  %v10508_v44 = vsub.s32 0, %v10502_v40  ;;  %v1827_v49 = vrot.slane %v1818_v45, %v10505_v41 }
 0x418   : > { %6663 = vmatpush1.bf16.msra.mxu1 %v8349_v47 }
 0x419   : > { %6664 = vmatprep.subr.bf16.mxu1 %v8342_v48 }
 0x41c   : > { %6665 = vmatpush1.bf16.msra.mxu1 %v8341_v51 }
 0x41d   : > { %6666 = vmatprep.subr.bf16.mxu1 %v8334_v52  ;;  %v1823_v52 = vrot.slane %v1818_v45, %v10508_v44 }
 0x420   : > { %6667 = vmatpush1.bf16.msra.mxu1 %v8333_v55  ;;  %v1834_v55 = vld [vmem:[#allocation19] sm:$0x3] }
 0x421   : > { %6668 = vmatprep.subr.bf16.mxu1 %v8326_v56 }
 0x424   : > { %6669 = vmatpush1.bf16.msra.mxu1 %v8325_v59 }
 0x425   : > { %6670 = vmatprep.subr.bf16.mxu1 %v8318_v60  ;;  %v1843_v60 = vrot.slane %v1834_v55, %v10505_v41 }
 0x428   : > { %6671 = vmatpush1.bf16.msra.mxu1 %v8317_v63  ;;  %v1839_v63 = vrot.slane %v1834_v55, %v10508_v44  ;;  %v2424_v55 = vld [vmem:[#allocation20 + $0xbc0] sm:$0xff] }
 0x429   : > { %6672 = vmatprep.subr.bf16.mxu1 %v8438_v0 }
 0x42c   : > { %6673 = vmatpush2.bf16.msra.mxu1 %v8437_v6 }
 0x42d   : > { %6674 = vmatprep.subr.bf16.mxu1 %v8430_v7 }
 0x430   : > { %6675 = vmatpush2.bf16.msra.mxu1 %v8429_v8 }
 0x431   : > { %6676 = vmatprep.subr.bf16.mxu1 %v8422_v11 }
 0x434   : > { %6677 = vmatpush2.bf16.msra.mxu1 %v8421_v12 }
 0x435   : > { %6678 = vmatprep.subr.bf16.mxu1 %v8414_v15  ;;  %v2356_v15 = vld [vmem:[#allocation20 + $0x9a0] sm:$0xff] }
 0x436   : > { %v8622_v2 = vcombine.high %v2352_v14, %v2356_v15  ;;  %v8621_v24 = vcombine.low %v2352_v14, %v2356_v15  ;;  %v2200_v14 = vld [vmem:[#allocation20 + $0x4c0] sm:$0xff] }
 0x437   : > { %v2204_v15 = vld [vmem:[#allocation20 + $0x4e0] sm:$0xff] }
 0x438   : > { %6679 = vmatpush2.bf16.msra.mxu1 %v8413_v16 }
 0x439   : > { %6680 = vmatprep.subr.bf16.mxu1 %v8406_v19  ;;  %v8629_v19 = vcombine.low %v2360_v31, %v2364_v32  ;;  %v2332_v31 = vld [vmem:[#allocation20 + $0x8e0] sm:$0xff] }
 0x43c   : > { %6681 = vmatpush2.bf16.msra.mxu1 %v8405_v20 }
 0x43d   : > { %6682 = vmatprep.subr.bf16.mxu1 %v8398_v22  ;;  %v2348_v22 = vld [vmem:[#allocation20 + $0x960] sm:$0xff] }
 0x43e   : > { %v8614_v3 = vcombine.high %v2344_v21, %v2348_v22  ;;  %v8613_v28 = vcombine.low %v2344_v21, %v2348_v22  ;;  %v8470_v21 = vcombine.high %v2200_v14, %v2204_v15 }
 0x440   : > { %6683 = vmatpush2.bf16.msra.mxu1 %v8397_v23  ;;  %v10526_v23 = vld [vmem:[%s10430_s29] ss:$8 sps:$4 sm:$0xff]  }
 0x441   : > { %6684 = vmatprep.subr.bf16.mxu1 %v8390_v25  ;;  %v1723_v34 = vpop.f32.mrf.mxu1  ;;  %v9535_v25 = vld [vmem:[#allocation8] sm:$0xff]  }
 0x443   : > { %v1725_v35 = vpop.f32.mrf.mxu1 }
 0x444   : > { %6685 = vmatpush2.bf16.msra.mxu1 %v8389_v26  ;;  %v2336_v26 = vld [vmem:[#allocation20 + $0x900] sm:$0xff] }
 0x445   : > { %6686 = vmatprep.subr.bf16.mxu1 %v8382_v29  ;;  %v1727_v38 = vpop.f32.mrf.mxu1  ;;  %v8606_v29 = vcombine.high %v2336_v26, %v2340_v27  ;;  %v8605_v32 = vcombine.low %v2336_v26, %v2340_v27  ;;  %v2392_v26 = vld [vmem:[#allocation20 + $0xac0] sm:$0xff] }
 0x446   : > { %v2396_v27 = vld [vmem:[#allocation20 + $0xae0] sm:$0xff] }
 0x447   : > { %v1729_v42 = vpop.f32.mrf.mxu1 }
 0x448   : > { %6687 = vmatpush2.bf16.msra.mxu1 %v8381_v30  ;;  %v2328_v30 = vld [vmem:[#allocation20 + $0x8c0] sm:$0xff] }
 0x449   : > { %6742 = vmatprep.subr.bf16.mxu1 %v8630_v33  ;;  %v8598_v33 = vcombine.high %v2328_v30, %v2332_v31  ;;  %v8597_v36 = vcombine.low %v2328_v30, %v2332_v31  ;;  %v2184_v31 = vld [vmem:[#allocation20 + $0x440] sm:$0xff] }
 0x4c3   : > { %v1766_v37 = vpop.f32.mrf.mxu0 }
 0x4c4   : > { %v1767_v46 = vadd.f32 %v1766_v37, %v1723_v34  ;;  %v2320_v34 = vld [vmem:[#allocation20 + $0x880] sm:$0xff] }
 0x4c5   : > { %v1768_v39 = vpop.f32.mrf.mxu0  ;;  %v2232_v37 = vld [vmem:[#allocation20 + $0x5c0] sm:$0xff] }
 0x4c6   : > { %v1769_v48 = vadd.f32 %v1768_v39, %v1725_v35  ;;  %v2324_v35 = vld [vmem:[#allocation20 + $0x8a0] sm:$0xff] }
 0x4c7   : > { %v1770_v43 = vpop.f32.mrf.mxu0  ;;  %v8590_v39 = vcombine.high %v2320_v34, %v2324_v35 }
 0x4c8   : > { %v1771_v54 = vadd.f32 %v1770_v43, %v1727_v38  ;;  %v2236_v38 = vld [vmem:[#allocation20 + $0x5e0] sm:$0xff] }
 0x4c9   : > { %v1772_v50 = vpop.f32.mrf.mxu0  ;;  %v2316_v43 = vld [vmem:[#allocation20 + $0x860] sm:$0xff]  ;;  %v8502_v45 = vcombine.high %v2232_v37, %v2236_v38 }
 0x4ca   : > { %v1773_v58 = vadd.f32 %v1772_v50, %v1729_v42  ;;  %v2312_v42 = vld [vmem:[#allocation20 + $0x840] sm:$0xff] }
 0x4cb   : > { %v1809_v47 = vpop.f32.mrf.mxu1  ;;  %v2308_v50 = vld [vmem:[#allocation20 + $0x820] sm:$0xff] }
 0x4cc   : > { %v1810_v51 = vadd.f32 %v1809_v47, %v1767_v46  ;;  %v8589_v46 = vcombine.low %v2320_v34, %v2324_v35  ;;  %v8582_v47 = vcombine.high %v2312_v42, %v2316_v43 }
 0x4cd   : > { %v1811_v53 = vpop.f32.mrf.mxu1 }
 0x4ce   : > { %v1812_v56 = vadd.f32 %v1811_v53, %v1769_v48  ;;  %v1830_v62 = vmul.f32 %v1823_v52, %v1810_v51  ;;  %v9536_v48 = vld [vmem:[#allocation10] sm:$0xff]   ;;  %v8581_v51 = vcombine.low %v2312_v42, %v2316_v43 }
 0x4cf   : > { %v1813_v57 = vpop.f32.mrf.mxu1  ;;  %v2228_v53 = vld [vmem:[#allocation20 + $0x5a0] sm:$0xff] }
 0x4d0   : > { %v1831_v59 = vmul.f32 %v1827_v49, %v1812_v56  ;;  %v1814_v61 = vadd.f32 %v1813_v57, %v1771_v54  ;;  %v1846_v9 = vadd.f32 %v1839_v63, %v1830_v62  ;;  %v2428_v56 = vld [vmem:[#allocation20 + $0xbe0] sm:$0xff]  ;;  %v8501_v57 = vcombine.low %v2232_v37, %v2236_v38 }
 0x4d1   : > { %v1815_v0 = vpop.f32.mrf.mxu1  ;;  %v8694_v62 = vcombine.high %v2424_v55, %v2428_v56  ;;  %v2176_v37 = vld [vmem:[#allocation20 + $0x400] sm:$0xff] }
 0x4d2   : > { %v1832_v1 = vmul.f32 %v1823_v52, %v1814_v61  ;;  %v1816_v4 = vadd.f32 %v1815_v0, %v1773_v58  ;;  %v1847_v6 = vadd.f32 %v1843_v60, %v1831_v59  ;;  %v1850_v16 = vmax.f32 %v1846_v9, 0.0  ;;  %v2224_v52 = vld [vmem:[#allocation20 + $0x580] sm:$0xff] }
 0x4d3   : > { %v8494_v58 = vcombine.high %v2224_v52, %v2228_v53  ;;  %v2220_v61 = vld [vmem:[#allocation20 + $0x560] sm:$0xff]  ;;  %v8493_v0 = vcombine.low %v2224_v52, %v2228_v53 }
 0x4d4   : > { %v1848_v7 = vadd.f32 %v1839_v63, %v1832_v1  ;;  %v1833_v8 = vmul.f32 %v1827_v49, %v1816_v4  ;;  %v1851_v12 = vmax.f32 %v1847_v6, 0.0  ;;  %v2304_v49 = vld [vmem:[#allocation20 + $0x800] sm:$0xff]  ;;  %v8693_v4 = vcombine.low %v2424_v55, %v2428_v56 }
 0x4d5   : > { %v8574_v54 = vcombine.high %v2304_v49, %v2308_v50  ;;  %v8573_v59 = vcombine.low %v2304_v49, %v2308_v50  ;;  %v2420_v63 = vld [vmem:[#allocation20 + $0xba0] sm:$0xff] }
 0x4d6   : > { %v1849_v10 = vadd.f32 %v1843_v60, %v1833_v8  ;;  %v1852_v11 = vmax.f32 %v1848_v7, 0.0  ;;  %v2216_v60 = vld [vmem:[#allocation20 + $0x540] sm:$0xff] }
 0x4d7   : > { %v8486_v1 = vcombine.high %v2216_v60, %v2220_v61  ;;  %v2208_v6 = vld [vmem:[#allocation20 + $0x500] sm:$0xff] }
 0x4d8   : > { %v1853_v13 = vmax.f32 %v1849_v10, 0.0  ;;  %v10519_v20 = vpack.c.bf16 %v1852_v11, %v1850_v16  ;;  %v2212_v7 = vld [vmem:[#allocation20 + $0x520] sm:$0xff]  ;;  %v8485_v11 = vcombine.low %v2216_v60, %v2220_v61 }
 0x4d9   : > { %v2408_v9 = vld [vmem:[#allocation20 + $0xb40] sm:$0xff] }
 0x4da   : > { %v10514_v17 = vpack.c.bf16 %v1853_v13, %v1851_v12  ;;  %v2412_v10 = vld [vmem:[#allocation20 + $0xb60] sm:$0xff]  ;;  %v8478_v12 = vcombine.high %v2208_v6, %v2212_v7 }
 0x4db   : > { %v8678_v16 = vcombine.high %v2408_v9, %v2412_v10  ;;  %v8677_v22 = vcombine.low %v2408_v9, %v2412_v10  ;;  %v2180_v38 = vld [vmem:[#allocation20 + $0x420] sm:$0xff] }
 0x4dc   : > { %1882 = vmatprep.subr.bf16.mxu0 %v10514_v17  ;;  %6688 = vmatprep.mubr.bf16.mxu1 %v10514_v17  ;;  %v8446_v42 = vcombine.high %v2176_v37, %v2180_v38  ;;  %v2296_v43 = vld [vmem:[#allocation20 + $0x7c0] sm:$0xff] }
 0x4dd   : > { %1883 = vmatpush1.bf16.msra.mxu0 %v10519_v20  ;;  %6689 = vmatmul.mubr.bf16.vlgmr.msra.gmra.mxu1 %v10519_v20  ;;  %v2292_v49 = vld [vmem:[#allocation20 + $0x7a0] sm:$0xff] }
 0x4de   : > { %1925 = vmatprep.subr.bf16.mxu0 %v10517_v18  ;;  %6743 = vmatpush1.bf16.msra.mxu1 %v8629_v19  ;;  %v2404_v19 = vld [vmem:[#allocation20 + $0xb20] sm:$0xff] }
 0x4df   : > { %6744 = vmatprep.subr.bf16.mxu1 %v8622_v2  ;;  %v8477_v2 = vcombine.low %v2208_v6, %v2212_v7  ;;  %v2280_v52 = vld [vmem:[#allocation20 + $0x740] sm:$0xff] }
 0x4e0   : > { %8313 = vmatmul.mubr.msk.bf16.vlgmr.msra.gmra.mxu0 %vm729_vm1, %v9535_v25  ;;  %v2284_v53 = vld [vmem:[#allocation20 + $0x760] sm:$0xff] }
 0x4e1   : > { %1926 = vmatpush1.bf16.msra.mxu0 %v10526_v23  ;;  %1943 = vmatprep.mubr.bf16.mxu0 %v10033_v5  ;;  %v8550_v55 = vcombine.high %v2280_v52, %v2284_v53  ;;  %v2272_v56 = vld [vmem:[#allocation20 + $0x700] sm:$0xff]  ;;  %v8549_v61 = vcombine.low %v2280_v52, %v2284_v53 }
 0x4e2   : > { %1972 = vmatprep.subr.bf16.mxu0 %v10514_v17  ;;  %6745 = vmatpush1.bf16.msra.mxu1 %v8621_v24  ;;  %v2192_v24 = vld [vmem:[#allocation20 + $0x480] sm:$0xff] }
 0x4e3   : > { %6746 = vmatprep.subr.bf16.mxu1 %v8614_v3  ;;  %v2196_v3 = vld [vmem:[#allocation20 + $0x4a0] sm:$0xff] }
 0x4e4   : > { %v8461_v34 = vcombine.low %v2192_v24, %v2196_v3  ;;  %v2256_v10 = vld [vmem:[#allocation20 + $0x680] sm:$0xff] }
 0x4e6   : > { %6747 = vmatpush1.bf16.msra.mxu1 %v8613_v28  ;;  %v8469_v28 = vcombine.low %v2200_v14, %v2204_v15 }
 0x4e7   : > { %6748 = vmatprep.subr.bf16.mxu1 %v8606_v29  ;;  %v8462_v29 = vcombine.high %v2192_v24, %v2196_v3 }
 0x4e8   : > { %8314 = vmatmul.mubr.msk.bf16.vlgmr.msra.gmra.mxu0 %vm729_vm1, %v9535_v25 }
 0x4e9   : > { %1973 = vmatpush1.bf16.msra.mxu0 %v10519_v20  ;;  %1990 = vmatprep.mubr.bf16.mxu0 %v10033_v5 }
 0x4ea   : > { %2015 = vmatprep.subr.bf16.mxu0 %v10517_v18  ;;  %6749 = vmatpush1.bf16.msra.mxu1 %v8605_v32  ;;  %v2188_v32 = vld [vmem:[#allocation20 + $0x460] sm:$0xff] }
 0x4eb   : > { %6750 = vmatprep.subr.bf16.mxu1 %v8598_v33  ;;  %v8662_v33 = vcombine.high %v2392_v26, %v2396_v27  ;;  %v8454_v35 = vcombine.high %v2184_v31, %v2188_v32 }
 0x4ee   : > { %6751 = vmatpush1.bf16.msra.mxu1 %v8597_v36  ;;  %v8661_v36 = vcombine.low %v2392_v26, %v2396_v27  ;;  %v2240_v27 = vld [vmem:[#allocation20 + $0x600] sm:$0xff] }
 0x4ef   : > { %6752 = vmatprep.subr.bf16.mxu1 %v8590_v39  ;;  %v8453_v39 = vcombine.low %v2184_v31, %v2188_v32  ;;  %v2488_v31 = vld [vmem:[#allocation20 + $0xdc0] sm:$0xff] }
 0x4f0   : > { %8315 = vmatmul.mubr.msk.bf16.vlgmr.msra.gmra.mxu0 %vm729_vm1, %v9536_v48  ;;  %v2492_v32 = vld [vmem:[#allocation20 + $0xde0] sm:$0xff] }
 0x4f1   : > { %2016 = vmatpush1.bf16.msra.mxu0 %v10526_v23  ;;  %2033 = vmatprep.mubr.bf16.mxu0 %v10033_v5  ;;  %v2416_v5 = vld [vmem:[#allocation20 + $0xb80] sm:$0xff] }
 0x4f2   : > { %6699 = vmatprep.subr.bf16.mxu0 %v8502_v45  ;;  %6753 = vmatpush1.bf16.msra.mxu1 %v8589_v46  ;;  %v8686_v8 = vcombine.high %v2416_v5, %v2420_v63  ;;  %v8685_v13 = vcombine.low %v2416_v5, %v2420_v63  ;;  %v2300_v45 = vld [vmem:[#allocation20 + $0x7e0] sm:$0xff]  ;;  %v8445_v46 = vcombine.low %v2176_v37, %v2180_v38 }
 0x4f3   : > { %6754 = vmatprep.subr.bf16.mxu1 %v8582_v47  ;;  %v8566_v47 = vcombine.high %v2296_v43, %v2300_v45  ;;  %v8565_v50 = vcombine.low %v2296_v43, %v2300_v45  ;;  %v2264_v63 = vld [vmem:[#allocation20 + $0x6c0] sm:$0xff]  ;;  %v8757_v37 = vcombine.low %v2488_v31, %v2492_v32 }
 0x4f6   : > { %6755 = vmatpush1.bf16.msra.mxu1 %v8581_v51 }
 0x4f7   : > { %6756 = vmatprep.subr.bf16.mxu1 %v8574_v54 }
 0x4f8   : > { %8316 = vmatmul.mubr.msk.bf16.vlgmr.msra.gmra.mxu0 %vm729_vm1, %v9536_v48  ;;  %v2288_v48 = vld [vmem:[#allocation20 + $0x780] sm:$0xff] }
 0x4f9   : > { %6700 = vmatpush1.bf16.msra.mxu0 %v8501_v57  ;;  %6731 = vmatprep.mubr.bf16.mxu0 %v10517_v18  ;;  %v2400_v18 = vld [vmem:[#allocation20 + $0xb00] sm:$0xff]  ;;  %v8558_v51 = vcombine.high %v2288_v48, %v2292_v49  ;;  %v8557_v54 = vcombine.low %v2288_v48, %v2292_v49 }
 0x4fa   : > { %6701 = vmatprep.subr.bf16.mxu0 %v8494_v58  ;;  %6757 = vmatpush1.bf16.msra.mxu1 %v8573_v59  ;;  %v8670_v25 = vcombine.high %v2400_v18, %v2404_v19  ;;  %v8669_v30 = vcombine.low %v2400_v18, %v2404_v19  ;;  %v2276_v57 = vld [vmem:[#allocation20 + $0x720] sm:$0xff] }
 0x4fb   : > { %6758 = vmatprep.subr.bf16.mxu1 %v8694_v62  ;;  %v2384_v58 = vld [vmem:[#allocation20 + $0xa80] sm:$0xff]  ;;  %v8542_v5 = vcombine.high %v2272_v56, %v2276_v57  ;;  %v8541_v7 = vcombine.low %v2272_v56, %v2276_v57 }
 0x4fc   : > { %v2388_v59 = vld [vmem:[#allocation20 + $0xaa0] sm:$0xff] }
 0x4fd   : > { %6702 = vmatpush1.bf16.msra.mxu0 %v8493_v0  ;;  %v8654_v60 = vcombine.high %v2384_v58, %v2388_v59  ;;  %v8653_v62 = vcombine.low %v2384_v58, %v2388_v59  ;;  %v2268_v0 = vld [vmem:[#allocation20 + $0x6e0] sm:$0xff] }
 0x4fe   : > { %6703 = vmatprep.subr.bf16.mxu0 %v8486_v1  ;;  %6759 = vmatpush2.bf16.msra.mxu1 %v8693_v4  ;;  %v2376_v1 = vld [vmem:[#allocation20 + $0xa40] sm:$0xff]  ;;  %v8534_v9 = vcombine.high %v2264_v63, %v2268_v0  ;;  %v8533_v15 = vcombine.low %v2264_v63, %v2268_v0 }
 0x4ff   : > { %6760 = vmatprep.subr.bf16.mxu1 %v8686_v8  ;;  %v2380_v4 = vld [vmem:[#allocation20 + $0xa60] sm:$0xff] }
 0x500   : > { %v8646_v6 = vcombine.high %v2376_v1, %v2380_v4  ;;  %v8645_v8 = vcombine.low %v2376_v1, %v2380_v4  ;;  %v2248_v19 = vld [vmem:[#allocation20 + $0x640] sm:$0xff] }
 0x501   : > { %6704 = vmatpush1.bf16.msra.mxu0 %v8485_v11  ;;  %v2260_v11 = vld [vmem:[#allocation20 + $0x6a0] sm:$0xff] }
 0x502   : > { %6705 = vmatprep.subr.bf16.mxu0 %v8478_v12  ;;  %6761 = vmatpush2.bf16.msra.mxu1 %v8685_v13  ;;  %v2368_v12 = vld [vmem:[#allocation20 + $0xa00] sm:$0xff]  ;;  %v8526_v18 = vcombine.high %v2256_v10, %v2260_v11  ;;  %v8525_v24 = vcombine.low %v2256_v10, %v2260_v11 }
 0x503   : > { %6762 = vmatprep.subr.bf16.mxu1 %v8678_v16  ;;  %v2372_v13 = vld [vmem:[#allocation20 + $0xa20] sm:$0xff] }
 0x504   : > { %v8638_v14 = vcombine.high %v2368_v12, %v2372_v13  ;;  %v8637_v16 = vcombine.low %v2368_v12, %v2372_v13  ;;  %v2440_v57 = vld [vmem:[#allocation20 + $0xc40] sm:$0xff] }
 0x505   : > { %6706 = vmatpush1.bf16.msra.mxu0 %v8477_v2  ;;  %v2252_v2 = vld [vmem:[#allocation20 + $0x660] sm:$0xff] }
 0x506   : > { %6707 = vmatprep.subr.bf16.mxu0 %v8470_v21  ;;  %6763 = vmatpush2.bf16.msra.mxu1 %v8677_v22  ;;  %v10542_v21 = vld [vmem:[#allocation20 + $0x11c0] sm:$0xff]  ;;  %v8518_v26 = vcombine.high %v2248_v19, %v2252_v2 }
 0x507   : > { %6764 = vmatprep.subr.bf16.mxu1 %v8670_v25  ;;  %v10544_v22 = vld [vmem:[#allocation20 + $0x11e0] sm:$0xff] }
 0x508   : > { %v8885_v3 = vcombine.low %v10542_v21, %v10544_v22  ;;  %v8886_v25 = vcombine.high %v10542_v21, %v10544_v22  ;;  %v2444_v58 = vld [vmem:[#allocation20 + $0xc60] sm:$0xff] }
 0x509   : > { %6708 = vmatpush1.bf16.msra.mxu0 %v8469_v28  ;;  %v2244_v28 = vld [vmem:[#allocation20 + $0x620] sm:$0xff] }
 0x50a   : > { %6709 = vmatprep.subr.bf16.mxu0 %v8462_v29  ;;  %6765 = vmatpush2.bf16.msra.mxu1 %v8669_v30  ;;  %v8517_v29 = vcombine.low %v2248_v19, %v2252_v2  ;;  %v8510_v30 = vcombine.high %v2240_v27, %v2244_v28  ;;  %v2552_v0 = vld [vmem:[#allocation20 + $0xfc0] sm:$0xff] }
 0x50b   : > { %6766 = vmatprep.subr.bf16.mxu1 %v8662_v33  ;;  %v8509_v33 = vcombine.low %v2240_v27, %v2244_v28  ;;  %v2556_v1 = vld [vmem:[#allocation20 + $0xfe0] sm:$0xff] }
 0x50c   : > { %v2536_v11 = vld [vmem:[#allocation20 + $0xf40] sm:$0xff] }
 0x50d   : > { %6710 = vmatpush1.bf16.msra.mxu0 %v8461_v34  ;;  %v8758_v34 = vcombine.high %v2488_v31, %v2492_v32  ;;  %v2540_v12 = vld [vmem:[#allocation20 + $0xf60] sm:$0xff] }
 0x50e   : > { %6711 = vmatprep.subr.bf16.mxu0 %v8454_v35  ;;  %6767 = vmatpush2.bf16.msra.mxu1 %v8661_v36  ;;  %v2480_v35 = vld [vmem:[#allocation20 + $0xd80] sm:$0xff] }
 0x50f   : > { %6768 = vmatprep.subr.bf16.mxu1 %v8654_v60  ;;  %v2484_v36 = vld [vmem:[#allocation20 + $0xda0] sm:$0xff]  ;;  %v8710_v60 = vcombine.high %v2440_v57, %v2444_v58 }
 0x510   : > { %v8750_v38 = vcombine.high %v2480_v35, %v2484_v36  ;;  %v8749_v43 = vcombine.low %v2480_v35, %v2484_v36  ;;  %v2520_v2 = vld [vmem:[#allocation20 + $0xec0] sm:$0xff] }
 0x511   : > { %6712 = vmatpush1.bf16.msra.mxu0 %v8453_v39  ;;  %v2472_v39 = vld [vmem:[#allocation20 + $0xd40] sm:$0xff] }
 0x512   : > { %6713 = vmatprep.subr.bf16.mxu0 %v8446_v42  ;;  %6769 = vmatpush2.bf16.msra.mxu1 %v8653_v62  ;;  %v2476_v42 = vld [vmem:[#allocation20 + $0xd60] sm:$0xff] }
 0x513   : > { %6770 = vmatprep.subr.bf16.mxu1 %v8646_v6  ;;  %v8742_v45 = vcombine.high %v2472_v39, %v2476_v42  ;;  %v8741_v48 = vcombine.low %v2472_v39, %v2476_v42  ;;  %v2436_v62 = vld [vmem:[#allocation20 + $0xc20] sm:$0xff]  ;;  %v8822_v6 = vcombine.high %v2552_v0, %v2556_v1 }
 0x514   : > { %v2512_v27 = vld [vmem:[#allocation20 + $0xe80] sm:$0xff] }
 0x515   : > { %6714 = vmatpush1.bf16.msra.mxu0 %v8445_v46  ;;  %v2464_v46 = vld [vmem:[#allocation20 + $0xd00] sm:$0xff] }
 0x516   : > { %6715 = vmatprep.subr.bf16.mxu0 %v8566_v47  ;;  %6771 = vmatpush2.bf16.msra.mxu1 %v8645_v8  ;;  %v2468_v47 = vld [vmem:[#allocation20 + $0xd20] sm:$0xff] }
 0x517   : > { %6772 = vmatprep.subr.bf16.mxu1 %v8638_v14  ;;  %v8734_v49 = vcombine.high %v2464_v46, %v2468_v47  ;;  %v8733_v52 = vcombine.low %v2464_v46, %v2468_v47  ;;  %v2548_v8 = vld [vmem:[#allocation20 + $0xfa0] sm:$0xff]  ;;  %v8806_v14 = vcombine.high %v2536_v11, %v2540_v12 }
 0x518   : > { %v2516_v28 = vld [vmem:[#allocation20 + $0xea0] sm:$0xff] }
 0x519   : > { %6716 = vmatpush2.bf16.msra.mxu0 %v8565_v50  ;;  %v2456_v50 = vld [vmem:[#allocation20 + $0xcc0] sm:$0xff] }
 0x51a   : > { %6717 = vmatprep.subr.bf16.mxu0 %v8558_v51  ;;  %6773 = vmatpush2.bf16.msra.mxu1 %v8637_v16  ;;  %v2460_v51 = vld [vmem:[#allocation20 + $0xce0] sm:$0xff] }
 0x51b   : > { %6828 = vmatprep.subr.bf16.mxu1 %v8886_v25  ;;  %v8726_v53 = vcombine.high %v2456_v50, %v2460_v51  ;;  %v2532_v16 = vld [vmem:[#allocation20 + $0xf20] sm:$0xff] }
 0x51c   : > { %v2504_v31 = vld [vmem:[#allocation20 + $0xe40] sm:$0xff] }
 0x51d   : > { %6718 = vmatpush2.bf16.msra.mxu0 %v8557_v54  ;;  %v2448_v54 = vld [vmem:[#allocation20 + $0xc80] sm:$0xff] }
 0x51e   : > { %6719 = vmatprep.subr.bf16.mxu0 %v8550_v55  ;;  %v2452_v55 = vld [vmem:[#allocation20 + $0xca0] sm:$0xff] }
 0x51f   : > { %v8718_v56 = vcombine.high %v2448_v54, %v2452_v55  ;;  %v8717_v59 = vcombine.low %v2448_v54, %v2452_v55  ;;  %v2508_v32 = vld [vmem:[#allocation20 + $0xe60] sm:$0xff] }
 0x520   : > { %v2496_v35 = vld [vmem:[#allocation20 + $0xe00] sm:$0xff] }
 0x521   : > { %6720 = vmatpush2.bf16.msra.mxu0 %v8549_v61  ;;  %v2432_v61 = vld [vmem:[#allocation20 + $0xc00] sm:$0xff] }
 0x522   : > { %6721 = vmatprep.subr.bf16.mxu0 %v8542_v5  ;;  %v8709_v5 = vcombine.low %v2440_v57, %v2444_v58  ;;  %v8702_v63 = vcombine.high %v2432_v61, %v2436_v62  ;;  %v8701_v4 = vcombine.low %v2432_v61, %v2436_v62  ;;  %v2500_v36 = vld [vmem:[#allocation20 + $0xe20] sm:$0xff] }
 0x523   : > { %v2744_v39 = vld [vmem:[#allocation20 + $0x15c0] sm:$0xff] }
 0x524   : > { %v2748_v42 = vld [vmem:[#allocation20 + $0x15e0] sm:$0xff] }
 0x525   : > { %6722 = vmatpush2.bf16.msra.mxu0 %v8541_v7  ;;  %v2544_v7 = vld [vmem:[#allocation20 + $0xf80] sm:$0xff] }
 0x526   : > { %6723 = vmatprep.subr.bf16.mxu0 %v8534_v9  ;;  %v8821_v9 = vcombine.low %v2552_v0, %v2556_v1  ;;  %v8814_v10 = vcombine.high %v2544_v7, %v2548_v8  ;;  %v8813_v13 = vcombine.low %v2544_v7, %v2548_v8  ;;  %v2592_v61 = vld [vmem:[#allocation20 + $0x1100] sm:$0xff] }
 0x527   : > { %v2596_v62 = vld [vmem:[#allocation20 + $0x1120] sm:$0xff] }
 0x528   : > { %v8862_v8 = vcombine.high %v2592_v61, %v2596_v62  ;;  %v2584_v22 = vld [vmem:[#allocation20 + $0x10c0] sm:$0xff] }
 0x529   : > { %6724 = vmatpush2.bf16.msra.mxu0 %v8533_v15  ;;  %v2528_v15 = vld [vmem:[#allocation20 + $0xf00] sm:$0xff] }
 0x52a   : > { %6725 = vmatprep.subr.bf16.mxu0 %v8526_v18  ;;  %v8805_v18 = vcombine.low %v2536_v11, %v2540_v12  ;;  %v8798_v19 = vcombine.high %v2528_v15, %v2532_v16  ;;  %v8797_v25 = vcombine.low %v2528_v15, %v2532_v16  ;;  %v2732_v11 = vld [vmem:[#allocation20 + $0x1560] sm:$0xff] }
 0x52d   : > { %6726 = vmatpush2.bf16.msra.mxu0 %v8525_v24  ;;  %v2524_v24 = vld [vmem:[#allocation20 + $0xee0] sm:$0xff] }
 0x52e   : > { %6727 = vmatprep.subr.bf16.mxu0 %v8518_v26  ;;  %v8790_v26 = vcombine.high %v2520_v2, %v2524_v24 }
 0x531   : > { %6728 = vmatpush2.bf16.msra.mxu0 %v8517_v29  ;;  %v8789_v29 = vcombine.low %v2520_v2, %v2524_v24  ;;  %v2580_v2 = vld [vmem:[#allocation20 + $0x10a0] sm:$0xff] }
 0x532   : > { %6729 = vmatprep.subr.bf16.mxu0 %v8510_v30  ;;  %v8782_v30 = vcombine.high %v2512_v27, %v2516_v28  ;;  %v2720_v24 = vld [vmem:[#allocation20 + $0x1500] sm:$0xff] }
 0x535   : > { %6730 = vmatpush2.bf16.msra.mxu0 %v8509_v33  ;;  %v8781_v33 = vcombine.low %v2512_v27, %v2516_v28 }
 0x536   : > { %6785 = vmatprep.subr.bf16.mxu0 %v8758_v34  ;;  %v8774_v34 = vcombine.high %v2504_v31, %v2508_v32 }
 0x538   : > { %6732 = vmatmul.mubr.bf16.vlgmr.msra.gmra.mxu0 %v10526_v23  ;;  %v8725_v23 = vcombine.low %v2456_v50, %v2460_v51  ;;  %v2612_v50 = vld [vmem:[#allocation20 + $0x11a0] sm:$0xff] }
 0x539   : > { %6786 = vmatpush1.bf16.msra.mxu0 %v8757_v37  ;;  %v8773_v37 = vcombine.low %v2504_v31, %v2508_v32  ;;  %v2568_v32 = vld [vmem:[#allocation20 + $0x1040] sm:$0xff] }
 0x53a   : > { %6787 = vmatprep.subr.bf16.mxu0 %v8750_v38  ;;  %v8766_v38 = vcombine.high %v2496_v35, %v2500_v36 }
 0x53d   : > { %6788 = vmatpush1.bf16.msra.mxu0 %v8749_v43  ;;  %v8765_v43 = vcombine.low %v2496_v35, %v2500_v36  ;;  %v2712_v35 = vld [vmem:[#allocation20 + $0x14c0] sm:$0xff] }
 0x53e   : > { %6789 = vmatprep.subr.bf16.mxu0 %v8742_v45  ;;  %v9014_v45 = vcombine.high %v2744_v39, %v2748_v42  ;;  %v2716_v36 = vld [vmem:[#allocation20 + $0x14e0] sm:$0xff] }
 0x541   : > { %6790 = vmatpush1.bf16.msra.mxu0 %v8741_v48 }
 0x542   : > { %6791 = vmatprep.subr.bf16.mxu0 %v8734_v49  ;;  %v2608_v49 = vld [vmem:[#allocation20 + $0x1180] sm:$0xff] }
 0x543   : > { %v8878_v55 = vcombine.high %v2608_v49, %v2612_v50  ;;  %v8877_v58 = vcombine.low %v2608_v49, %v2612_v50  ;;  %v2708_v49 = vld [vmem:[#allocation20 + $0x14a0] sm:$0xff] }
 0x545   : > { %6792 = vmatpush1.bf16.msra.mxu0 %v8733_v52 }
 0x546   : > { %6793 = vmatprep.subr.bf16.mxu0 %v8726_v53 }
 0x549   : > { %6794 = vmatpush1.bf16.msra.mxu0 %v8725_v23  ;;  %v2600_v23 = vld [vmem:[#allocation20 + $0x1140] sm:$0xff] }
 0x54a   : > { %6795 = vmatprep.subr.bf16.mxu0 %v8718_v56  ;;  %v2604_v56 = vld [vmem:[#allocation20 + $0x1160] sm:$0xff] }
 0x54d   : > { %6796 = vmatpush1.bf16.msra.mxu0 %v8717_v59 }
 0x54e   : > { %6797 = vmatprep.subr.bf16.mxu0 %v8710_v60  ;;  %v8870_v60 = vcombine.high %v2600_v23, %v2604_v56 }
 0x551   : > { %6798 = vmatpush1.bf16.msra.mxu0 %v8709_v5  ;;  %v2736_v5 = vld [vmem:[#allocation20 + $0x1580] sm:$0xff] }
 0x552   : > { %6799 = vmatprep.subr.bf16.mxu0 %v8702_v63  ;;  %v2740_v63 = vld [vmem:[#allocation20 + $0x15a0] sm:$0xff] }
 0x553   : > { %v9006_v21 = vcombine.high %v2736_v5, %v2740_v63 }
 0x555   : > { %6800 = vmatpush1.bf16.msra.mxu0 %v8701_v4  ;;  %v8869_v4 = vcombine.low %v2600_v23, %v2604_v56 }
 0x556   : > { %6801 = vmatprep.subr.bf16.mxu0 %v8822_v6  ;;  %v9013_v6 = vcombine.low %v2744_v39, %v2748_v42 }
 0x559   : > { %6802 = vmatpush2.bf16.msra.mxu0 %v8821_v9  ;;  %v2588_v9 = vld [vmem:[#allocation20 + $0x10e0] sm:$0xff] }
 0x55a   : > { %6803 = vmatprep.subr.bf16.mxu0 %v8814_v10  ;;  %v2728_v10 = vld [vmem:[#allocation20 + $0x1540] sm:$0xff]  ;;  %v8854_v15 = vcombine.high %v2584_v22, %v2588_v9  ;;  %v8853_v27 = vcombine.low %v2584_v22, %v2588_v9 }
 0x55b   : > { %v8998_v16 = vcombine.high %v2728_v10, %v2732_v11  ;;  %v8997_v28 = vcombine.low %v2728_v10, %v2732_v11  ;;  %v2664_v11 = vld [vmem:[#allocation20 + $0x1340] sm:$0xff] }
 0x55d   : > { %6804 = vmatpush2.bf16.msra.mxu0 %v8813_v13  ;;  %v8861_v13 = vcombine.low %v2592_v61, %v2596_v62 }
 0x55e   : > { %6805 = vmatprep.subr.bf16.mxu0 %v8806_v14  ;;  %v9005_v14 = vcombine.low %v2736_v5, %v2740_v63 }
 0x561   : > { %6806 = vmatpush2.bf16.msra.mxu0 %v8805_v18  ;;  %v2576_v18 = vld [vmem:[#allocation20 + $0x1080] sm:$0xff] }
 0x562   : > { %6807 = vmatprep.subr.bf16.mxu0 %v8798_v19 }
 0x565   : > { %6808 = vmatpush2.bf16.msra.mxu0 %v8797_v25  ;;  %v2724_v25 = vld [vmem:[#allocation20 + $0x1520] sm:$0xff] }
 0x566   : > { %6809 = vmatprep.subr.bf16.mxu0 %v8790_v26  ;;  %v8990_v31 = vcombine.high %v2720_v24, %v2724_v25  ;;  %v8989_v39 = vcombine.low %v2720_v24, %v2724_v25  ;;  %v2656_v24 = vld [vmem:[#allocation20 + $0x1300] sm:$0xff] }
 0x567   : > { %v2660_v25 = vld [vmem:[#allocation20 + $0x1320] sm:$0xff] }
 0x569   : > { %6810 = vmatpush2.bf16.msra.mxu0 %v8789_v29 }
 0x56a   : > { %6811 = vmatprep.subr.bf16.mxu0 %v8782_v30  ;;  %v8846_v30 = vcombine.high %v2576_v18, %v2580_v2 }
 0x56d   : > { %6812 = vmatpush2.bf16.msra.mxu0 %v8781_v33 }
 0x56e   : > { %6813 = vmatprep.subr.bf16.mxu0 %v8774_v34  ;;  %v2572_v34 = vld [vmem:[#allocation20 + $0x1060] sm:$0xff] }
 0x56f   : > { %v8838_v42 = vcombine.high %v2568_v32, %v2572_v34 }
 0x571   : > { %6814 = vmatpush2.bf16.msra.mxu0 %v8773_v37 }
 0x572   : > { %6815 = vmatprep.subr.bf16.mxu0 %v8766_v38  ;;  %v8845_v38 = vcombine.low %v2576_v18, %v2580_v2 }
 0x575   : > { %6816 = vmatpush2.bf16.msra.mxu0 %v8765_v43  ;;  %v8982_v43 = vcombine.high %v2712_v35, %v2716_v36 }
 0x576   : > { %6871 = vmatprep.subr.bf16.mxu0 %v9014_v45  ;;  %v2560_v45 = vld [vmem:[#allocation20 + $0x1000] sm:$0xff] }
 0x5a0   : > { %v1902_v46 = vpop.f32.mrf.mxu0 }
 0x5a2   : > { %v1904_v47 = vpop.f32.mrf.mxu0 }
 0x5a4   : > { %v1906_v48 = vpop.f32.mrf.mxu0 }
 0x5a5   : > { %v10553_v53 = vpack.c.bf16 %v1906_v48, %v1902_v46  ;;  %v2704_v48 = vld [vmem:[#allocation20 + $0x1480] sm:$0xff] }
 0x5a6   : > { %v1908_v51 = vpop.f32.mrf.mxu0  ;;  %v8974_v56 = vcombine.high %v2704_v48, %v2708_v49  ;;  %v8973_v62 = vcombine.low %v2704_v48, %v2708_v49  ;;  %v2784_v48 = vld [vmem:[#allocation20 + $0x1700] sm:$0xff] }
 0x5a7   : > { %v10551_v52 = vpack.c.bf16 %v1908_v51, %v1904_v47  ;;  %v2564_v47 = vld [vmem:[#allocation20 + $0x1020] sm:$0xff]  ;;  %v8837_v51 = vcombine.low %v2568_v32, %v2572_v34 }
 0x5a8   : > { %v1945_v54 = vpop.f32.mrf.mxu0  ;;  %v8830_v23 = vcombine.high %v2560_v45, %v2564_v47  ;;  %v8829_v61 = vcombine.low %v2560_v45, %v2564_v47  ;;  %v2648_v34 = vld [vmem:[#allocation20 + $0x12c0] sm:$0xff] }
 0x5a9   : > { %6774 = vmatprep.mubr.bf16.mxu1 %v10551_v52  ;;  %v2640_v45 = vld [vmem:[#allocation20 + $0x1280] sm:$0xff] }
 0x5aa   : > { %v1947_v57 = vpop.f32.mrf.mxu0  ;;  %6775 = vmatmul.mubr.bf16.vlgmr.msra.gmra.mxu1 %v10553_v53  ;;  %v2644_v47 = vld [vmem:[#allocation20 + $0x12a0] sm:$0xff] }
 0x5ab   : > { %6829 = vmatpush1.bf16.msra.mxu1 %v8885_v3  ;;  %v2788_v49 = vld [vmem:[#allocation20 + $0x1720] sm:$0xff] }
 0x5ac   : > { %v1949_v59 = vpop.f32.mrf.mxu0  ;;  %6830 = vmatprep.subr.bf16.mxu1 %v8878_v55 }
 0x5ad   : > { %v10562_v7 = vpack.c.bf16 %v1949_v59, %v1945_v54  ;;  %v8981_v54 = vcombine.low %v2712_v35, %v2716_v36  ;;  %v2696_v59 = vld [vmem:[#allocation20 + $0x1440] sm:$0xff] }
 0x5ae   : > { %v1951_v0 = vpop.f32.mrf.mxu0  ;;  %v2652_v35 = vld [vmem:[#allocation20 + $0x12e0] sm:$0xff] }
 0x5af   : > { %v10560_v1 = vpack.c.bf16 %v1951_v0, %v1947_v57  ;;  %6831 = vmatpush1.bf16.msra.mxu1 %v8877_v58  ;;  %v2680_v57 = vld [vmem:[#allocation20 + $0x13c0] sm:$0xff] }
 0x5b0   : > { %6832 = vmatprep.subr.bf16.mxu1 %v8870_v60  ;;  %v10564_v3 = vpop.f32.mrf.mxu0  ;;  %v2684_v58 = vld [vmem:[#allocation20 + $0x13e0] sm:$0xff] }
 0x5b1   : > { %6817 = vmatprep.mubr.bf16.mxu0 %v10560_v1  ;;  %v2700_v60 = vld [vmem:[#allocation20 + $0x1460] sm:$0xff]  ;;  %v8950_v5 = vcombine.high %v2680_v57, %v2684_v58 }
 0x5b2   : > { %6818 = vmatmul.mubr.bf16.vlgmr.msra.gmra.mxu0 %v10562_v7  ;;  %v1994_v12 = vpop.f32.mrf.mxu0  ;;  %v8966_v63 = vcombine.high %v2696_v59, %v2700_v60  ;;  %v2672_v0 = vld [vmem:[#allocation20 + $0x1380] sm:$0xff]  ;;  %v8965_v22 = vcombine.low %v2696_v59, %v2700_v60  ;;  %v8909_v60 = vcombine.low %v2640_v45, %v2644_v47 }
 0x5b3   : > { %6833 = vmatpush1.bf16.msra.mxu1 %v8869_v4  ;;  %6872 = vmatpush1.bf16.msra.mxu0 %v9013_v6  ;;  %v2676_v4 = vld [vmem:[#allocation20 + $0x13a0] sm:$0xff] }
 0x5b4   : > { %6834 = vmatprep.subr.bf16.mxu1 %v8862_v8  ;;  %6873 = vmatprep.subr.bf16.mxu0 %v9006_v21  ;;  %v10568_v19 = vpop.f32.mrf.mxu0  ;;  %v2688_v6 = vld [vmem:[#allocation20 + $0x1400] sm:$0xff]  ;;  %v8949_v21 = vcombine.low %v2680_v57, %v2684_v58  ;;  %v8942_v9 = vcombine.high %v2672_v0, %v2676_v4 }
 0x5b5   : > { %v2692_v8 = vld [vmem:[#allocation20 + $0x1420] sm:$0xff] }
 0x5b6   : > { %v1998_v26 = vpop.f32.mrf.mxu0  ;;  %v8958_v10 = vcombine.high %v2688_v6, %v2692_v8  ;;  %v2792_v36 = vld [vmem:[#allocation20 + $0x1740] sm:$0xff] }
 0x5b7   : > { %6835 = vmatpush1.bf16.msra.mxu1 %v8861_v13  ;;  %6874 = vmatpush1.bf16.msra.mxu0 %v9005_v14  ;;  %v10570_v29 = vpack.c.bf16 %v1998_v26, %v1994_v12  ;;  %v2668_v12 = vld [vmem:[#allocation20 + $0x1360] sm:$0xff] }
 0x5b8   : > { %6836 = vmatprep.subr.bf16.mxu1 %v8854_v15  ;;  %6875 = vmatprep.subr.bf16.mxu0 %v8998_v16  ;;  %v10572_v33 = vpop.f32.mrf.mxu0  ;;  %v2808_v13 = vld [vmem:[#allocation20 + $0x17c0] sm:$0xff]  ;;  %v8941_v15 = vcombine.low %v2672_v0, %v2676_v4  ;;  %v8957_v16 = vcombine.low %v2688_v6, %v2692_v8  ;;  %v8934_v18 = vcombine.high %v2664_v11, %v2668_v12 }
 0x5b9   : > { %6860 = vmatprep.mubr.bf16.mxu1 %v10570_v29  ;;  %v2812_v14 = vld [vmem:[#allocation20 + $0x17e0] sm:$0xff] }
 0x5ba   : > { %v2037_v37 = vpop.f32.mrf.mxu0  ;;  %v9078_v2 = vcombine.high %v2808_v13, %v2812_v14  ;;  %v2800_v26 = vld [vmem:[#allocation20 + $0x1780] sm:$0xff] }
 0x5bb   : > { %6837 = vmatpush1.bf16.msra.mxu1 %v8853_v27  ;;  %6876 = vmatpush1.bf16.msra.mxu0 %v8997_v28  ;;  %v2804_v27 = vld [vmem:[#allocation20 + $0x17a0] sm:$0xff]  ;;  %v8933_v28 = vcombine.low %v2664_v11, %v2668_v12  ;;  %v2105_v12 = vld [vmem:[#allocation20 + $0x1c8] sm:$0xff] }
 0x5bc   : > { %6838 = vmatprep.subr.bf16.mxu1 %v8846_v30  ;;  %6877 = vmatprep.subr.bf16.mxu0 %v8990_v31  ;;  %v10575_v46 = vpop.f32.mrf.mxu0  ;;  %v9077_v30 = vcombine.low %v2808_v13, %v2812_v14  ;;  %v8926_v31 = vcombine.high %v2656_v24, %v2660_v25  ;;  %v9070_v32 = vcombine.high %v2800_v26, %v2804_v27  ;;  %v2636_v57 = vld [vmem:[#allocation20 + $0x1260] sm:$0xff]  ;;  %v2109_v13 = vld [vmem:[#allocation20 + $0x1e8] sm:$0xff] }
 0x5bd   : > { %v2776_v58 = vld [vmem:[#allocation20 + $0x16c0] sm:$0xff] }
 0x5be   : > { %v2041_v50 = vpop.f32.mrf.mxu0  ;;  %v2780_v59 = vld [vmem:[#allocation20 + $0x16e0] sm:$0xff] }
 0x5bf   : > { %6839 = vmatpush1.bf16.msra.mxu1 %v8845_v38  ;;  %6878 = vmatpush1.bf16.msra.mxu0 %v8989_v39  ;;  %v10577_v55 = vpack.c.bf16 %v2041_v50, %v2037_v37  ;;  %v2796_v37 = vld [vmem:[#allocation20 + $0x1760] sm:$0xff]  ;;  %v8925_v38 = vcombine.low %v2656_v24, %v2660_v25  ;;  %v9069_v39 = vcombine.low %v2800_v26, %v2804_v27  ;;  %v2097_v25 = vld [vmem:[#allocation20 + $0x188] sm:$0xff] }
 0x5c0   : > { %6840 = vmatprep.subr.bf16.mxu1 %v8838_v42  ;;  %6879 = vmatprep.subr.bf16.mxu0 %v8982_v43  ;;  %v8918_v42 = vcombine.high %v2648_v34, %v2652_v35  ;;  %v9062_v43 = vcombine.high %v2792_v36, %v2796_v37  ;;  %v8917_v50 = vcombine.low %v2648_v34, %v2652_v35  ;;  %v2628_v0 = vld [vmem:[#allocation20 + $0x1220] sm:$0xff]  ;;  %v2101_v26 = vld [vmem:[#allocation20 + $0x1a8] sm:$0xff] }
 0x5c1   : > { %6903 = vmatprep.mubr.bf16.mxu0 %v10577_v55  ;;  %v2768_v4 = vld [vmem:[#allocation20 + $0x1680] sm:$0xff]  ;;  %v8368_v34 = vcombine.high %v2097_v25, %v2101_v26  ;;  %v2093_v35 = vld [vmem:[#allocation20 + $0x168] sm:$0xff] }
 0x5c2   : > { %v2772_v6 = vld [vmem:[#allocation20 + $0x16a0] sm:$0xff] }
 0x5c3   : > { %6841 = vmatpush1.bf16.msra.mxu1 %v8837_v51  ;;  %6880 = vmatpush1.bf16.msra.mxu0 %v8981_v54  ;;  %v9061_v51 = vcombine.low %v2792_v36, %v2796_v37  ;;  %v8910_v54 = vcombine.high %v2640_v45, %v2644_v47  ;;  %v2764_v11 = vld [vmem:[#allocation20 + $0x1660] sm:$0xff]  ;;  %v2233_v36 = vld [vmem:[#allocation20 + $0x5c8] sm:$0xff] }
 0x5c4   : > { %6842 = vmatprep.subr.bf16.mxu1 %v8830_v23  ;;  %6881 = vmatprep.subr.bf16.mxu0 %v8974_v56  ;;  %v9054_v23 = vcombine.high %v2784_v48, %v2788_v49  ;;  %v2632_v56 = vld [vmem:[#allocation20 + $0x1240] sm:$0xff]  ;;  %v2237_v37 = vld [vmem:[#allocation20 + $0x5e8] sm:$0xff] }
 0x5c5   : > { %v8901_v8 = vcombine.low %v2632_v56, %v2636_v57  ;;  %v2756_v24 = vld [vmem:[#allocation20 + $0x1620] sm:$0xff]  ;;  %v2225_v45 = vld [vmem:[#allocation20 + $0x588] sm:$0xff] }
 0x5c6   : > { %v2229_v47 = vld [vmem:[#allocation20 + $0x5a8] sm:$0xff] }
 0x5c7   : > { %6843 = vmatpush1.bf16.msra.mxu1 %v8829_v61  ;;  %6882 = vmatpush1.bf16.msra.mxu0 %v8973_v62  ;;  %v9053_v61 = vcombine.low %v2784_v48, %v2788_v49  ;;  %v8902_v62 = vcombine.high %v2632_v56, %v2636_v57  ;;  %v8503_v49 = vcombine.low %v2233_v36, %v2237_v37  ;;  %v2077_v56 = vld [vmem:[#allocation20 + $0xe8] sm:$0xff] }
 0x5c8   : > { %6844 = vmatprep.subr.bf16.mxu1 %v8950_v5  ;;  %6883 = vmatprep.subr.bf16.mxu0 %v8966_v63  ;;  %v9046_v5 = vcombine.high %v2776_v58, %v2780_v59  ;;  %v2624_v63 = vld [vmem:[#allocation20 + $0x1200] sm:$0xff]  ;;  %v2217_v57 = vld [vmem:[#allocation20 + $0x548] sm:$0xff] }
 0x5c9   : > { %v8893_v14 = vcombine.low %v2624_v63, %v2628_v0 }
 0x5cb   : > { %6845 = vmatpush2.bf16.msra.mxu1 %v8949_v21  ;;  %6884 = vmatpush1.bf16.msra.mxu0 %v8965_v22  ;;  %v9045_v21 = vcombine.low %v2776_v58, %v2780_v59  ;;  %v8894_v22 = vcombine.high %v2624_v63, %v2628_v0  ;;  %v2221_v58 = vld [vmem:[#allocation20 + $0x568] sm:$0xff] }
 0x5cc   : > { %6846 = vmatprep.subr.bf16.mxu1 %v8942_v9  ;;  %6885 = vmatprep.subr.bf16.mxu0 %v8958_v10  ;;  %v9038_v9 = vcombine.high %v2768_v4, %v2772_v6  ;;  %v2760_v10 = vld [vmem:[#allocation20 + $0x1640] sm:$0xff]  ;;  %v2213_v63 = vld [vmem:[#allocation20 + $0x528] sm:$0xff] }
 0x5cd   : > { %v9029_v27 = vcombine.low %v2760_v10, %v2764_v11  ;;  %v9537_v0 = vld [vmem:[%s10430_s29 + $0x4] ss:$8 sps:$4 sm:$0xff]  }
 0x5cf   : > { %6847 = vmatpush2.bf16.msra.mxu1 %v8941_v15  ;;  %6886 = vmatpush1.bf16.msra.mxu0 %v8957_v16  ;;  %v9037_v15 = vcombine.low %v2768_v4, %v2772_v6  ;;  %v9030_v16 = vcombine.high %v2760_v10, %v2764_v11  ;;  %v8487_v6 = vcombine.low %v2217_v57, %v2221_v58  ;;  %v2201_v10 = vld [vmem:[#allocation20 + $0x4c8] sm:$0xff] }
 0x5d0   : > { %6848 = vmatprep.subr.bf16.mxu1 %v8934_v18  ;;  %6887 = vmatprep.subr.bf16.mxu0 %v9078_v2  ;;  %v8376_v18 = vcombine.high %v2105_v12, %v2109_v13  ;;  %v2752_v2 = vld [vmem:[#allocation20 + $0x1600] sm:$0xff]  ;;  %v2205_v11 = vld [vmem:[#allocation20 + $0x4e8] sm:$0xff] }
 0x5d3   : > { %6849 = vmatpush2.bf16.msra.mxu1 %v8933_v28  ;;  %6888 = vmatpush2.bf16.msra.mxu0 %v9077_v30  ;;  %v8375_v28 = vcombine.low %v2105_v12, %v2109_v13  ;;  %v10582_v30 = vpack.c.bf16 %v10568_v19, %v10564_v3  ;;  %v8504_v3 = vcombine.high %v2233_v36, %v2237_v37  ;;  %v2081_v19 = vld [vmem:[#allocation20 + $0x108] sm:$0xff] }
 0x5d4   : > { %6850 = vmatprep.subr.bf16.mxu1 %v8926_v31  ;;  %6889 = vmatprep.subr.bf16.mxu0 %v9070_v32  ;;  %v9022_v31 = vcombine.high %v2752_v2, %v2756_v24  ;;  %v2089_v32 = vld [vmem:[#allocation20 + $0x148] sm:$0xff] }
 0x5d5   : > { %v8359_v48 = vcombine.low %v2089_v32, %v2093_v35 }
 0x5d7   : > { %6851 = vmatpush2.bf16.msra.mxu1 %v8925_v38  ;;  %6890 = vmatpush2.bf16.msra.mxu0 %v9069_v39  ;;  %v9021_v38 = vcombine.low %v2752_v2, %v2756_v24  ;;  %v8367_v39 = vcombine.low %v2097_v25, %v2101_v26  ;;  %v2193_v2 = vld [vmem:[#allocation20 + $0x488] sm:$0xff]  ;;  %v8471_v26 = vcombine.low %v2201_v10, %v2205_v11 }
 0x5d8   : > { %6852 = vmatprep.subr.bf16.mxu1 %v8918_v42  ;;  %6891 = vmatprep.subr.bf16.mxu0 %v9062_v43  ;;  %v8360_v42 = vcombine.high %v2089_v32, %v2093_v35  ;;  %v2085_v43 = vld [vmem:[#allocation20 + $0x128] sm:$0xff] }
 0x5d9   : > { %v8351_v59 = vcombine.low %v2081_v19, %v2085_v43  ;;  %v2197_v24 = vld [vmem:[#allocation20 + $0x4a8] sm:$0xff] }
 0x5da   : > { %v2173_v32 = vld [vmem:[#allocation20 + $0x3e8] sm:$0xff]  ;;  %v8463_v37 = vcombine.low %v2193_v2, %v2197_v24 }
 0x5db   : > { %6853 = vmatpush2.bf16.msra.mxu1 %v8917_v50  ;;  %6892 = vmatpush2.bf16.msra.mxu0 %v9061_v51  ;;  %v10588_v50 = vpack.c.bf16 %v10575_v46, %v10572_v33  ;;  %v8352_v51 = vcombine.high %v2081_v19, %v2085_v43  ;;  %v8488_v33 = vcombine.high %v2217_v57, %v2221_v58  ;;  %v2065_v46 = vld [vmem:[#allocation20 + $0x88] sm:$0xff] }
 0x5dc   : > { %6854 = vmatprep.subr.bf16.mxu1 %v8910_v54  ;;  %6893 = vmatprep.subr.bf16.mxu0 %v9054_v23  ;;  %v8496_v54 = vcombine.high %v2225_v45, %v2229_v47  ;;  %v2073_v23 = vld [vmem:[#allocation20 + $0xc8] sm:$0xff] }
 0x5dd   : > { %v8343_v4 = vcombine.low %v2073_v23, %v2077_v56  ;;  %v2189_v35 = vld [vmem:[#allocation20 + $0x468] sm:$0xff] }
 0x5de   : > { %v2177_v19 = vld [vmem:[#allocation20 + $0x408] sm:$0xff] }
 0x5df   : > { %6855 = vmatpush2.bf16.msra.mxu1 %v8909_v60  ;;  %6894 = vmatpush2.bf16.msra.mxu0 %v9053_v61  ;;  %v8495_v60 = vcombine.low %v2225_v45, %v2229_v47  ;;  %v8344_v61 = vcombine.high %v2073_v23, %v2077_v56  ;;  %v2181_v43 = vld [vmem:[#allocation20 + $0x428] sm:$0xff] }
 0x5e0   : > { %6856 = vmatprep.subr.bf16.mxu1 %v8902_v62  ;;  %6895 = vmatprep.subr.bf16.mxu0 %v9046_v5  ;;  %v2069_v62 = vld [vmem:[#allocation20 + $0xa8] sm:$0xff]  ;;  %v8447_v58 = vcombine.low %v2177_v19, %v2181_v43 }
 0x5e1   : > { %v2209_v5 = vld [vmem:[#allocation20 + $0x508] sm:$0xff]  ;;  %v8335_v12 = vcombine.low %v2065_v46, %v2069_v62 }
 0x5e2   : > { %v8479_v13 = vcombine.low %v2209_v5, %v2213_v63  ;;  %v2297_v23 = vld [vmem:[#allocation20 + $0x7c8] sm:$0xff] }
 0x5e3   : > { %6857 = vmatpush2.bf16.msra.mxu1 %v8901_v8  ;;  %6896 = vmatpush2.bf16.msra.mxu0 %v9045_v21  ;;  %v8336_v8 = vcombine.high %v2065_v46, %v2069_v62  ;;  %v8480_v21 = vcombine.high %v2209_v5, %v2213_v63  ;;  %v2301_v56 = vld [vmem:[#allocation20 + $0x7e8] sm:$0xff] }
 0x5e4   : > { %6858 = vmatprep.subr.bf16.mxu1 %v8894_v22  ;;  %6897 = vmatprep.subr.bf16.mxu0 %v9038_v9  ;;  %v2057_v22 = vld [vmem:[#allocation20 + $0x48] sm:$0xff]  ;;  %v8567_v63 = vcombine.low %v2297_v23, %v2301_v56 }
 0x5e5   : > { %v2061_v9 = vld [vmem:[#allocation20 + $0x68] sm:$0xff] }
 0x5e6   : > { %v8327_v25 = vcombine.low %v2057_v22, %v2061_v9  ;;  %v2289_v46 = vld [vmem:[#allocation20 + $0x788] sm:$0xff] }
 0x5e7   : > { %6859 = vmatpush2.bf16.msra.mxu1 %v8893_v14  ;;  %6898 = vmatpush2.bf16.msra.mxu0 %v9037_v15  ;;  %v8328_v14 = vcombine.high %v2057_v22, %v2061_v9  ;;  %v8472_v15 = vcombine.high %v2201_v10, %v2205_v11  ;;  %v2293_v62 = vld [vmem:[#allocation20 + $0x7a8] sm:$0xff] }
 0x5e8   : > { %6899 = vmatprep.subr.bf16.mxu0 %v9030_v16  ;;  %6914 = vmatprep.subr.bf16.mxu1 %v8376_v18  ;;  %v2049_v16 = vld [vmem:[#allocation20 + $0x8] sm:$0xff]  ;;  %v8559_v10 = vcombine.low %v2289_v46, %v2293_v62 }
 0x5e9   : > { %v2053_v18 = vld [vmem:[#allocation20 + $0x28] sm:$0xff] }
 0x5ea   : > { %6861 = vmatmul.mubr.bf16.vlgmr.msra.gmra.mxu1 %v10582_v30  ;;  %v8319_v36 = vcombine.low %v2049_v16, %v2053_v18  ;;  %v2285_v22 = vld [vmem:[#allocation20 + $0x768] sm:$0xff] }
 0x5eb   : > { %6900 = vmatpush2.bf16.msra.mxu0 %v9029_v27  ;;  %6915 = vmatpush1.bf16.msra.mxu1 %v8375_v28  ;;  %v8320_v27 = vcombine.high %v2049_v16, %v2053_v18  ;;  %v8464_v28 = vcombine.high %v2193_v2, %v2197_v24  ;;  %v2277_v16 = vld [vmem:[#allocation20 + $0x728] sm:$0xff] }
 0x5ec   : > { %6946 = vmatprep.mubr.bf16.mxu1 %v10514_v17  ;;  %6901 = vmatprep.subr.bf16.mxu0 %v9022_v31  ;;  %v2169_v31 = vld [vmem:[#allocation20 + $0x3c8] sm:$0xff] }
 0x5ed   : > { %6916 = vmatprep.subr.bf16.mxu1 %v8368_v34  ;;  %v2185_v34 = vld [vmem:[#allocation20 + $0x448] sm:$0xff]  ;;  %v8439_v45 = vcombine.low %v2169_v31, %v2173_v32 }
 0x5ee   : > { %v8455_v47 = vcombine.low %v2185_v34, %v2189_v35 }
 0x5ef   : > { %6902 = vmatpush2.bf16.msra.mxu0 %v9021_v38  ;;  %6917 = vmatpush1.bf16.msra.mxu1 %v8367_v39  ;;  %v8440_v38 = vcombine.high %v2169_v31, %v2173_v32  ;;  %v8456_v39 = vcombine.high %v2185_v34, %v2189_v35  ;;  %v2269_v31 = vld [vmem:[#allocation20 + $0x6e8] sm:$0xff] }
 0x5f0   : > { %6918 = vmatprep.subr.bf16.mxu1 %v8360_v42  ;;  %6957 = vmatprep.subr.bf16.mxu0 %v8504_v3  ;;  %v2161_v42 = vld [vmem:[#allocation20 + $0x388] sm:$0xff] }
 0x5f1   : > { %v2165_v3 = vld [vmem:[#allocation20 + $0x3a8] sm:$0xff] }
 0x5f2   : > { %6904 = vmatmul.mubr.bf16.vlgmr.msra.gmra.mxu0 %v10588_v50  ;;  %v8431_v57 = vcombine.low %v2161_v42, %v2165_v3 }
 0x5f3   : > { %6919 = vmatpush1.bf16.msra.mxu1 %v8359_v48  ;;  %6958 = vmatpush1.bf16.msra.mxu0 %v8503_v49  ;;  %v8432_v48 = vcombine.high %v2161_v42, %v2165_v3  ;;  %v8448_v49 = vcombine.high %v2177_v19, %v2181_v43  ;;  %v2261_v42 = vld [vmem:[#allocation20 + $0x6a8] sm:$0xff] }
 0x5f4   : > { %6920 = vmatprep.subr.bf16.mxu1 %v8352_v51  ;;  %6959 = vmatprep.subr.bf16.mxu0 %v8496_v54  ;;  %v2153_v51 = vld [vmem:[#allocation20 + $0x348] sm:$0xff] }
 0x5f5   : > { %6989 = vmatprep.mubr.bf16.mxu0 %v9537_v0  ;;  %v2157_v54 = vld [vmem:[#allocation20 + $0x368] sm:$0xff] }
 0x5f6   : > { %v8423_v5 = vcombine.low %v2153_v51, %v2157_v54 }
 0x5f7   : > { %6921 = vmatpush1.bf16.msra.mxu1 %v8351_v59  ;;  %6960 = vmatpush1.bf16.msra.mxu0 %v8495_v60  ;;  %v8424_v59 = vcombine.high %v2153_v51, %v2157_v54  ;;  %v8568_v60 = vcombine.high %v2297_v23, %v2301_v56  ;;  %v2365_v51 = vld [vmem:[#allocation20 + $0x9e8] sm:$0xff] }
 0x5f8   : > { %6922 = vmatprep.subr.bf16.mxu1 %v8344_v61  ;;  %6961 = vmatprep.subr.bf16.mxu0 %v8488_v33  ;;  %v2145_v61 = vld [vmem:[#allocation20 + $0x308] sm:$0xff] }
 0x5f9   : > { %v2149_v33 = vld [vmem:[#allocation20 + $0x328] sm:$0xff] }
 0x5fa   : > { %v8416_v0 = vcombine.high %v2145_v61, %v2149_v33  ;;  %v8415_v9 = vcombine.low %v2145_v61, %v2149_v33  ;;  %v2357_v61 = vld [vmem:[#allocation20 + $0x9a8] sm:$0xff] }
 0x5fb   : > { %6923 = vmatpush1.bf16.msra.mxu1 %v8343_v4  ;;  %6962 = vmatpush1.bf16.msra.mxu0 %v8487_v6  ;;  %v8560_v4 = vcombine.high %v2289_v46, %v2293_v62  ;;  %v2137_v6 = vld [vmem:[#allocation20 + $0x2c8] sm:$0xff] }
 0x5fc   : > { %6924 = vmatprep.subr.bf16.mxu1 %v8336_v8  ;;  %6963 = vmatprep.subr.bf16.mxu0 %v8480_v21  ;;  %v2141_v8 = vld [vmem:[#allocation20 + $0x2e8] sm:$0xff] }
 0x5fd   : > { %v2281_v21 = vld [vmem:[#allocation20 + $0x748] sm:$0xff]  ;;  %v8408_v11 = vcombine.high %v2137_v6, %v2141_v8  ;;  %v8407_v18 = vcombine.low %v2137_v6, %v2141_v8 }
 0x5fe   : > { %v8551_v2 = vcombine.low %v2281_v21, %v2285_v22  ;;  %v2493_v6 = vld [vmem:[#allocation20 + $0xde8] sm:$0xff] }
 0x5ff   : > { %6925 = vmatpush1.bf16.msra.mxu1 %v8335_v12  ;;  %6964 = vmatpush1.bf16.msra.mxu0 %v8479_v13  ;;  %v8552_v12 = vcombine.high %v2281_v21, %v2285_v22  ;;  %v2129_v13 = vld [vmem:[#allocation20 + $0x288] sm:$0xff] }
 0x600   : > { %6926 = vmatprep.subr.bf16.mxu1 %v8328_v14  ;;  %6965 = vmatprep.subr.bf16.mxu0 %v8472_v15  ;;  %v2133_v14 = vld [vmem:[#allocation20 + $0x2a8] sm:$0xff] }
 0x601   : > { %v2273_v15 = vld [vmem:[#allocation20 + $0x708] sm:$0xff]  ;;  %v8400_v24 = vcombine.high %v2129_v13, %v2133_v14  ;;  %v8399_v32 = vcombine.low %v2129_v13, %v2133_v14 }
 0x602   : > { %v8543_v34 = vcombine.low %v2273_v15, %v2277_v16  ;;  %v2485_v13 = vld [vmem:[#allocation20 + $0xda8] sm:$0xff] }
 0x603   : > { %6927 = vmatpush1.bf16.msra.mxu1 %v8327_v25  ;;  %6966 = vmatpush1.bf16.msra.mxu0 %v8471_v26  ;;  %v8544_v25 = vcombine.high %v2273_v15, %v2277_v16  ;;  %v2121_v26 = vld [vmem:[#allocation20 + $0x248] sm:$0xff] }
 0x604   : > { %6928 = vmatprep.subr.bf16.mxu1 %v8320_v27  ;;  %6967 = vmatprep.subr.bf16.mxu0 %v8464_v28  ;;  %v2125_v27 = vld [vmem:[#allocation20 + $0x268] sm:$0xff] }
 0x605   : > { %v2265_v28 = vld [vmem:[#allocation20 + $0x6c8] sm:$0xff]  ;;  %v8392_v35 = vcombine.high %v2121_v26, %v2125_v27  ;;  %v8391_v3 = vcombine.low %v2121_v26, %v2125_v27 }
 0x606   : > { %v8535_v19 = vcombine.low %v2265_v28, %v2269_v31  ;;  %v2477_v26 = vld [vmem:[#allocation20 + $0xd68] sm:$0xff] }
 0x607   : > { %6929 = vmatpush1.bf16.msra.mxu1 %v8319_v36  ;;  %6968 = vmatpush1.bf16.msra.mxu0 %v8463_v37  ;;  %v8536_v36 = vcombine.high %v2265_v28, %v2269_v31  ;;  %v2113_v37 = vld [vmem:[#allocation20 + $0x208] sm:$0xff] }
 0x608   : > { %6930 = vmatprep.subr.bf16.mxu1 %v8440_v38  ;;  %6969 = vmatprep.subr.bf16.mxu0 %v8456_v39  ;;  %v2117_v38 = vld [vmem:[#allocation20 + $0x228] sm:$0xff] }
 0x609   : > { %v2257_v39 = vld [vmem:[#allocation20 + $0x688] sm:$0xff]  ;;  %v8384_v43 = vcombine.high %v2113_v37, %v2117_v38  ;;  %v8383_v54 = vcombine.low %v2113_v37, %v2117_v38 }
 0x60a   : > { %v8527_v23 = vcombine.low %v2257_v39, %v2261_v42  ;;  %v9538_v27 = vld [vmem:[%s10430_s29] ss:$8 sps:$4 sm:$0xff]  }
 0x60b   : > { %6931 = vmatpush2.bf16.msra.mxu1 %v8439_v45  ;;  %6970 = vmatpush1.bf16.msra.mxu0 %v8455_v47  ;;  %v8528_v45 = vcombine.high %v2257_v39, %v2261_v42  ;;  %v2249_v47 = vld [vmem:[#allocation20 + $0x648] sm:$0xff] }
 0x60c   : > { %6932 = vmatprep.subr.bf16.mxu1 %v8432_v48  ;;  %6971 = vmatprep.subr.bf16.mxu0 %v8448_v49  ;;  %v2253_v48 = vld [vmem:[#allocation20 + $0x668] sm:$0xff] }
 0x60d   : > { %v2361_v49 = vld [vmem:[#allocation20 + $0x9c8] sm:$0xff]  ;;  %v8520_v56 = vcombine.high %v2249_v47, %v2253_v48  ;;  %v8519_v33 = vcombine.low %v2249_v47, %v2253_v48 }
 0x60e   : > { %v8631_v46 = vcombine.low %v2361_v49, %v2365_v51  ;;  %v2465_v37 = vld [vmem:[#allocation20 + $0xd08] sm:$0xff] }
 0x60f   : > { %6933 = vmatpush2.bf16.msra.mxu1 %v8431_v57  ;;  %6972 = vmatpush1.bf16.msra.mxu0 %v8447_v58  ;;  %v8632_v57 = vcombine.high %v2361_v49, %v2365_v51  ;;  %v2241_v58 = vld [vmem:[#allocation20 + $0x608] sm:$0xff] }
 0x610   : > { %6934 = vmatprep.subr.bf16.mxu1 %v8424_v59  ;;  %6973 = vmatprep.subr.bf16.mxu0 %v8568_v60  ;;  %v2245_v59 = vld [vmem:[#allocation20 + $0x628] sm:$0xff] }
 0x611   : > { %v2353_v60 = vld [vmem:[#allocation20 + $0x988] sm:$0xff]  ;;  %v8512_v62 = vcombine.high %v2241_v58, %v2245_v59  ;;  %v8511_v8 = vcombine.low %v2241_v58, %v2245_v59 }
 0x612   : > { %v8623_v21 = vcombine.low %v2353_v60, %v2357_v61  ;;  %v2469_v38 = vld [vmem:[#allocation20 + $0xd28] sm:$0xff] }
 0x613   : > { %6935 = vmatpush2.bf16.msra.mxu1 %v8423_v5  ;;  %6974 = vmatpush2.bf16.msra.mxu0 %v8567_v63  ;;  %v2345_v5 = vld [vmem:[#allocation20 + $0x948] sm:$0xff]  ;;  %v8624_v63 = vcombine.high %v2353_v60, %v2357_v61  ;;  %v8735_v51 = vcombine.low %v2465_v37, %v2469_v38 }
 0x614   : > { %6936 = vmatprep.subr.bf16.mxu1 %v8416_v0  ;;  %6975 = vmatprep.subr.bf16.mxu0 %v8560_v4  ;;  %v2349_v0 = vld [vmem:[#allocation20 + $0x968] sm:$0xff] }
 0x615   : > { %v2489_v4 = vld [vmem:[#allocation20 + $0xdc8] sm:$0xff]  ;;  %v8616_v22 = vcombine.high %v2345_v5, %v2349_v0  ;;  %v8615_v14 = vcombine.low %v2345_v5, %v2349_v0 }
 0x616   : > { %v8759_v15 = vcombine.low %v2489_v4, %v2493_v6  ;;  %v2457_v47 = vld [vmem:[#allocation20 + $0xcc8] sm:$0xff] }
 0x617   : > { %6937 = vmatpush2.bf16.msra.mxu1 %v8415_v9  ;;  %6976 = vmatpush2.bf16.msra.mxu0 %v8559_v10  ;;  %v8760_v9 = vcombine.high %v2489_v4, %v2493_v6  ;;  %v2337_v10 = vld [vmem:[#allocation20 + $0x908] sm:$0xff] }
 0x618   : > { %6938 = vmatprep.subr.bf16.mxu1 %v8408_v11  ;;  %6977 = vmatprep.subr.bf16.mxu0 %v8552_v12  ;;  %v2341_v11 = vld [vmem:[#allocation20 + $0x928] sm:$0xff] }
 0x619   : > { %v2481_v12 = vld [vmem:[#allocation20 + $0xd88] sm:$0xff]  ;;  %v8608_v16 = vcombine.high %v2337_v10, %v2341_v11  ;;  %v8607_v28 = vcombine.low %v2337_v10, %v2341_v11 }
 0x61a   : > { %v8751_v31 = vcombine.low %v2481_v12, %v2485_v13  ;;  %v2461_v48 = vld [vmem:[#allocation20 + $0xce8] sm:$0xff] }
 0x61b   : > { %6939 = vmatpush2.bf16.msra.mxu1 %v8407_v18  ;;  %6978 = vmatpush2.bf16.msra.mxu0 %v8551_v2  ;;  %v2329_v18 = vld [vmem:[#allocation20 + $0x8c8] sm:$0xff]  ;;  %v8752_v2 = vcombine.high %v2481_v12, %v2485_v13  ;;  %v8727_v61 = vcombine.low %v2457_v47, %v2461_v48 }
 0x61c   : > { %6940 = vmatprep.subr.bf16.mxu1 %v8400_v24  ;;  %6979 = vmatprep.subr.bf16.mxu0 %v8544_v25  ;;  %v2333_v24 = vld [vmem:[#allocation20 + $0x8e8] sm:$0xff] }
 0x61d   : > { %v2473_v25 = vld [vmem:[#allocation20 + $0xd48] sm:$0xff]  ;;  %v8599_v39 = vcombine.low %v2329_v18, %v2333_v24 }
 0x61e   : > { %v8743_v42 = vcombine.low %v2473_v25, %v2477_v26  ;;  %v2449_v58 = vld [vmem:[#allocation20 + $0xc88] sm:$0xff] }
 0x61f   : > { %6941 = vmatpush2.bf16.msra.mxu1 %v8399_v32  ;;  %6980 = vmatpush2.bf16.msra.mxu0 %v8543_v34  ;;  %v8600_v32 = vcombine.high %v2329_v18, %v2333_v24  ;;  %v8744_v34 = vcombine.high %v2473_v25, %v2477_v26  ;;  %v2453_v59 = vld [vmem:[#allocation20 + $0xca8] sm:$0xff] }
 0x620   : > { %6942 = vmatprep.subr.bf16.mxu1 %v8392_v35  ;;  %6981 = vmatprep.subr.bf16.mxu0 %v8536_v36  ;;  %v2321_v35 = vld [vmem:[#allocation20 + $0x888] sm:$0xff]  ;;  %v8719_v6 = vcombine.low %v2449_v58, %v2453_v59 }
 0x621   : > { %v2325_v36 = vld [vmem:[#allocation20 + $0x8a8] sm:$0xff] }
 0x622   : > { %v8591_v49 = vcombine.low %v2321_v35, %v2325_v36  ;;  %v2429_v5 = vld [vmem:[#allocation20 + $0xbe8] sm:$0xff] }
 0x623   : > { %6943 = vmatpush2.bf16.msra.mxu1 %v8391_v3  ;;  %6982 = vmatpush2.bf16.msra.mxu0 %v8535_v19  ;;  %v8592_v3 = vcombine.high %v2321_v35, %v2325_v36  ;;  %v8736_v19 = vcombine.high %v2465_v37, %v2469_v38  ;;  %v2445_v0 = vld [vmem:[#allocation20 + $0xc68] sm:$0xff] }
 0x624   : > { %6944 = vmatprep.subr.bf16.mxu1 %v8384_v43  ;;  %6983 = vmatprep.subr.bf16.mxu0 %v8528_v45  ;;  %v2313_v43 = vld [vmem:[#allocation20 + $0x848] sm:$0xff] }
 0x625   : > { %v2317_v45 = vld [vmem:[#allocation20 + $0x868] sm:$0xff] }
 0x626   : > { %v8583_v60 = vcombine.low %v2313_v43, %v2317_v45  ;;  %v2433_v10 = vld [vmem:[#allocation20 + $0xc08] sm:$0xff] }
 0x627   : > { %6945 = vmatpush2.bf16.msra.mxu1 %v8383_v54  ;;  %6984 = vmatpush2.bf16.msra.mxu0 %v8527_v23  ;;  %v8584_v54 = vcombine.high %v2313_v43, %v2317_v45  ;;  %v8728_v23 = vcombine.high %v2457_v47, %v2461_v48  ;;  %v2437_v11 = vld [vmem:[#allocation20 + $0xc28] sm:$0xff] }
 0x628   : > { %6985 = vmatprep.subr.bf16.mxu0 %v8520_v56  ;;  %7000 = vmatprep.subr.bf16.mxu1 %v8632_v57  ;;  %v2305_v56 = vld [vmem:[#allocation20 + $0x808] sm:$0xff]  ;;  %v8703_v26 = vcombine.low %v2433_v10, %v2437_v11 }
 0x629   : > { %v2309_v57 = vld [vmem:[#allocation20 + $0x828] sm:$0xff] }
 0x62a   : > { %6947 = vmatmul.mubr.bf16.vlgmr.msra.gmra.mxu1 %v10519_v20  ;;  %v8575_v4 = vcombine.low %v2305_v56, %v2309_v57  ;;  %v2413_v18 = vld [vmem:[#allocation20 + $0xb68] sm:$0xff] }
 0x62b   : > { %6986 = vmatpush2.bf16.msra.mxu0 %v8519_v33  ;;  %7001 = vmatpush1.bf16.msra.mxu1 %v8631_v46  ;;  %v8576_v33 = vcombine.high %v2305_v56, %v2309_v57  ;;  %v8720_v46 = vcombine.high %v2449_v58, %v2453_v59  ;;  %v2557_v24 = vld [vmem:[#allocation20 + $0xfe8] sm:$0xff] }
 0x62c   : > { %7032 = vmatprep.mubr.bf16.mxu1 %v10551_v52  ;;  %6987 = vmatprep.subr.bf16.mxu0 %v8512_v62  ;;  %v2425_v62 = vld [vmem:[#allocation20 + $0xbc8] sm:$0xff] }
 0x62d   : > { %7002 = vmatprep.subr.bf16.mxu1 %v8624_v63  ;;  %v2441_v63 = vld [vmem:[#allocation20 + $0xc48] sm:$0xff]  ;;  %v8695_v12 = vcombine.low %v2425_v62, %v2429_v5 }
 0x62e   : > { %v8711_v13 = vcombine.low %v2441_v63, %v2445_v0  ;;  %v2549_v35 = vld [vmem:[#allocation20 + $0xfa8] sm:$0xff] }
 0x62f   : > { %6988 = vmatpush2.bf16.msra.mxu0 %v8511_v8  ;;  %7003 = vmatpush1.bf16.msra.mxu1 %v8623_v21  ;;  %v8696_v8 = vcombine.high %v2425_v62, %v2429_v5  ;;  %v8712_v21 = vcombine.high %v2441_v63, %v2445_v0  ;;  %v2541_v43 = vld [vmem:[#allocation20 + $0xf68] sm:$0xff] }
 0x630   : > { %7004 = vmatprep.subr.bf16.mxu1 %v8616_v22  ;;  %7043 = vmatprep.subr.bf16.mxu0 %v8760_v9  ;;  %v2417_v22 = vld [vmem:[#allocation20 + $0xb88] sm:$0xff] }
 0x631   : > { %v2421_v9 = vld [vmem:[#allocation20 + $0xba8] sm:$0xff] }
 0x632   : > { %6990 = vmatmul.mubr.bf16.vlgmr.msra.gmra.mxu0 %v9538_v27  ;;  %v8687_v25 = vcombine.low %v2417_v22, %v2421_v9  ;;  %v2533_v56 = vld [vmem:[#allocation20 + $0xf28] sm:$0xff] }
 0x633   : > { %7005 = vmatpush1.bf16.msra.mxu1 %v8615_v14  ;;  %7044 = vmatpush1.bf16.msra.mxu0 %v8759_v15  ;;  %v8688_v14 = vcombine.high %v2417_v22, %v2421_v9  ;;  %v8704_v15 = vcombine.high %v2433_v10, %v2437_v11  ;;  %v2525_v62 = vld [vmem:[#allocation20 + $0xee8] sm:$0xff] }
 0x634   : > { %7075 = vmatprep.mubr.bf16.mxu0 %v10560_v1  ;;  %7006 = vmatprep.subr.bf16.mxu1 %v8608_v16  ;;  %v2409_v16 = vld [vmem:[#allocation20 + $0xb48] sm:$0xff] }
 0x635   : > { %7045 = vmatprep.subr.bf16.mxu0 %v8752_v2  ;;  %v2553_v2 = vld [vmem:[#allocation20 + $0xfc8] sm:$0xff]  ;;  %v8680_v27 = vcombine.high %v2409_v16, %v2413_v18  ;;  %v8679_v36 = vcombine.low %v2409_v16, %v2413_v18 }
 0x636   : > { %v8823_v37 = vcombine.low %v2553_v2, %v2557_v24  ;;  %v2517_v22 = vld [vmem:[#allocation20 + $0xea8] sm:$0xff] }
 0x637   : > { %7007 = vmatpush1.bf16.msra.mxu1 %v8607_v28  ;;  %7046 = vmatpush1.bf16.msra.mxu0 %v8751_v31  ;;  %v8824_v28 = vcombine.high %v2553_v2, %v2557_v24  ;;  %v2401_v31 = vld [vmem:[#allocation20 + $0xb08] sm:$0xff] }
 0x638   : > { %7008 = vmatprep.subr.bf16.mxu1 %v8600_v32  ;;  %7047 = vmatprep.subr.bf16.mxu0 %v8744_v34  ;;  %v2405_v32 = vld [vmem:[#allocation20 + $0xb28] sm:$0xff] }
 0x639   : > { %v2545_v34 = vld [vmem:[#allocation20 + $0xf88] sm:$0xff]  ;;  %v8672_v38 = vcombine.high %v2401_v31, %v2405_v32  ;;  %v8671_v45 = vcombine.low %v2401_v31, %v2405_v32 }
 0x63a   : > { %v8815_v47 = vcombine.low %v2545_v34, %v2549_v35  ;;  %v2621_v16 = vld [vmem:[#allocation20 + $0x11e8] sm:$0xff] }
 0x63b   : > { %7009 = vmatpush1.bf16.msra.mxu1 %v8599_v39  ;;  %7048 = vmatpush1.bf16.msra.mxu0 %v8743_v42  ;;  %v8816_v39 = vcombine.high %v2545_v34, %v2549_v35  ;;  %v2393_v42 = vld [vmem:[#allocation20 + $0xac8] sm:$0xff] }
 0x63c   : > { %7010 = vmatprep.subr.bf16.mxu1 %v8592_v3  ;;  %7049 = vmatprep.subr.bf16.mxu0 %v8736_v19  ;;  %v2397_v3 = vld [vmem:[#allocation20 + $0xae8] sm:$0xff] }
 0x63d   : > { %v2537_v19 = vld [vmem:[#allocation20 + $0xf48] sm:$0xff]  ;;  %v8664_v48 = vcombine.high %v2393_v42, %v2397_v3  ;;  %v8663_v57 = vcombine.low %v2393_v42, %v2397_v3 }
 0x63e   : > { %v8807_v58 = vcombine.low %v2537_v19, %v2541_v43  ;;  %v2613_v31 = vld [vmem:[#allocation20 + $0x11a8] sm:$0xff] }
 0x63f   : > { %7011 = vmatpush1.bf16.msra.mxu1 %v8591_v49  ;;  %7050 = vmatpush1.bf16.msra.mxu0 %v8735_v51  ;;  %v8808_v49 = vcombine.high %v2537_v19, %v2541_v43  ;;  %v2385_v51 = vld [vmem:[#allocation20 + $0xa88] sm:$0xff] }
 0x640   : > { %7012 = vmatprep.subr.bf16.mxu1 %v8584_v54  ;;  %7051 = vmatprep.subr.bf16.mxu0 %v8728_v23  ;;  %v2389_v54 = vld [vmem:[#allocation20 + $0xaa8] sm:$0xff] }
 0x641   : > { %v2529_v23 = vld [vmem:[#allocation20 + $0xf08] sm:$0xff]  ;;  %v8656_v59 = vcombine.high %v2385_v51, %v2389_v54  ;;  %v8655_v5 = vcombine.low %v2385_v51, %v2389_v54 }
 0x642   : > { %v8799_v63 = vcombine.low %v2529_v23, %v2533_v56  ;;  %v2749_v42 = vld [vmem:[#allocation20 + $0x15e8] sm:$0xff] }
 0x643   : > { %7013 = vmatpush1.bf16.msra.mxu1 %v8583_v60  ;;  %7052 = vmatpush1.bf16.msra.mxu0 %v8727_v61  ;;  %v8800_v60 = vcombine.high %v2529_v23, %v2533_v56  ;;  %v2377_v61 = vld [vmem:[#allocation20 + $0xa48] sm:$0xff] }
 0x644   : > { %7014 = vmatprep.subr.bf16.mxu1 %v8576_v33  ;;  %7053 = vmatprep.subr.bf16.mxu0 %v8720_v46  ;;  %v2381_v33 = vld [vmem:[#allocation20 + $0xa68] sm:$0xff] }
 0x645   : > { %v2521_v46 = vld [vmem:[#allocation20 + $0xec8] sm:$0xff]  ;;  %v8648_v0 = vcombine.high %v2377_v61, %v2381_v33  ;;  %v8647_v9 = vcombine.low %v2377_v61, %v2381_v33 }
 0x646   : > { %v8791_v10 = vcombine.low %v2521_v46, %v2525_v62  ;;  %v2741_v51 = vld [vmem:[#allocation20 + $0x15a8] sm:$0xff] }
 0x647   : > { %7015 = vmatpush1.bf16.msra.mxu1 %v8575_v4  ;;  %7054 = vmatpush1.bf16.msra.mxu0 %v8719_v6  ;;  %v8792_v4 = vcombine.high %v2521_v46, %v2525_v62  ;;  %v2369_v6 = vld [vmem:[#allocation20 + $0xa08] sm:$0xff] }
 0x648   : > { %7016 = vmatprep.subr.bf16.mxu1 %v8696_v8  ;;  %7055 = vmatprep.subr.bf16.mxu0 %v8712_v21  ;;  %v2373_v8 = vld [vmem:[#allocation20 + $0xa28] sm:$0xff] }
 0x649   : > { %v2513_v21 = vld [vmem:[#allocation20 + $0xe88] sm:$0xff]  ;;  %v8640_v11 = vcombine.high %v2369_v6, %v2373_v8  ;;  %v8639_v18 = vcombine.low %v2369_v6, %v2373_v8 }
 0x64a   : > { %v8783_v2 = vcombine.low %v2513_v21, %v2517_v22  ;;  %v2733_v61 = vld [vmem:[#allocation20 + $0x1568] sm:$0xff] }
 0x64b   : > { %7017 = vmatpush2.bf16.msra.mxu1 %v8695_v12  ;;  %7056 = vmatpush1.bf16.msra.mxu0 %v8711_v13  ;;  %v8784_v12 = vcombine.high %v2513_v21, %v2517_v22  ;;  %v2505_v13 = vld [vmem:[#allocation20 + $0xe48] sm:$0xff] }
 0x64c   : > { %7018 = vmatprep.subr.bf16.mxu1 %v8688_v14  ;;  %7057 = vmatprep.subr.bf16.mxu0 %v8704_v15  ;;  %v2509_v14 = vld [vmem:[#allocation20 + $0xe68] sm:$0xff] }
 0x64d   : > { %v2617_v15 = vld [vmem:[#allocation20 + $0x11c8] sm:$0xff]  ;;  %v8776_v24 = vcombine.high %v2505_v13, %v2509_v14  ;;  %v8775_v32 = vcombine.low %v2505_v13, %v2509_v14 }
 0x64e   : > { %v8887_v34 = vcombine.low %v2617_v15, %v2621_v16  ;;  %v2725_v6 = vld [vmem:[#allocation20 + $0x1528] sm:$0xff] }
 0x64f   : > { %7019 = vmatpush2.bf16.msra.mxu1 %v8687_v25  ;;  %7058 = vmatpush1.bf16.msra.mxu0 %v8703_v26  ;;  %v8888_v25 = vcombine.high %v2617_v15, %v2621_v16  ;;  %v2497_v26 = vld [vmem:[#allocation20 + $0xe08] sm:$0xff] }
 0x650   : > { %7020 = vmatprep.subr.bf16.mxu1 %v8680_v27  ;;  %7059 = vmatprep.subr.bf16.mxu0 %v8824_v28  ;;  %v2501_v27 = vld [vmem:[#allocation20 + $0xe28] sm:$0xff] }
 0x651   : > { %v2609_v28 = vld [vmem:[#allocation20 + $0x1188] sm:$0xff]  ;;  %v8768_v35 = vcombine.high %v2497_v26, %v2501_v27  ;;  %v8767_v3 = vcombine.low %v2497_v26, %v2501_v27 }
 0x652   : > { %v8879_v19 = vcombine.low %v2609_v28, %v2613_v31  ;;  %v2717_v13 = vld [vmem:[#allocation20 + $0x14e8] sm:$0xff] }
 0x653   : > { %7021 = vmatpush2.bf16.msra.mxu1 %v8679_v36  ;;  %7060 = vmatpush2.bf16.msra.mxu0 %v8823_v37  ;;  %v2601_v36 = vld [vmem:[#allocation20 + $0x1148] sm:$0xff]  ;;  %v8880_v37 = vcombine.high %v2609_v28, %v2613_v31 }
 0x654   : > { %7022 = vmatprep.subr.bf16.mxu1 %v8672_v38  ;;  %7061 = vmatprep.subr.bf16.mxu0 %v8816_v39  ;;  %v2605_v38 = vld [vmem:[#allocation20 + $0x1168] sm:$0xff] }
 0x655   : > { %v2745_v39 = vld [vmem:[#allocation20 + $0x15c8] sm:$0xff]  ;;  %v8872_v43 = vcombine.high %v2601_v36, %v2605_v38  ;;  %v8871_v54 = vcombine.low %v2601_v36, %v2605_v38 }
 0x656   : > { %v9015_v23 = vcombine.low %v2745_v39, %v2749_v42  ;;  %v2709_v26 = vld [vmem:[#allocation20 + $0x14a8] sm:$0xff] }
 0x657   : > { %7023 = vmatpush2.bf16.msra.mxu1 %v8671_v45  ;;  %7062 = vmatpush2.bf16.msra.mxu0 %v8815_v47  ;;  %v9016_v45 = vcombine.high %v2745_v39, %v2749_v42  ;;  %v2593_v47 = vld [vmem:[#allocation20 + $0x1108] sm:$0xff] }
 0x658   : > { %7024 = vmatprep.subr.bf16.mxu1 %v8664_v48  ;;  %7063 = vmatprep.subr.bf16.mxu0 %v8808_v49  ;;  %v2597_v48 = vld [vmem:[#allocation20 + $0x1128] sm:$0xff] }
 0x659   : > { %v2737_v49 = vld [vmem:[#allocation20 + $0x1588] sm:$0xff]  ;;  %v8864_v56 = vcombine.high %v2593_v47, %v2597_v48  ;;  %v8863_v33 = vcombine.low %v2593_v47, %v2597_v48 }
 0x65a   : > { %v9007_v46 = vcombine.low %v2737_v49, %v2741_v51  ;;  %v2697_v36 = vld [vmem:[#allocation20 + $0x1448] sm:$0xff] }
 0x65b   : > { %7025 = vmatpush2.bf16.msra.mxu1 %v8663_v57  ;;  %7064 = vmatpush2.bf16.msra.mxu0 %v8807_v58  ;;  %v2585_v57 = vld [vmem:[#allocation20 + $0x10c8] sm:$0xff]  ;;  %v9008_v58 = vcombine.high %v2737_v49, %v2741_v51 }
 0x65c   : > { %7026 = vmatprep.subr.bf16.mxu1 %v8656_v59  ;;  %7065 = vmatprep.subr.bf16.mxu0 %v8800_v60  ;;  %v2589_v59 = vld [vmem:[#allocation20 + $0x10e8] sm:$0xff] }
 0x65d   : > { %v2729_v60 = vld [vmem:[#allocation20 + $0x1548] sm:$0xff]  ;;  %v8856_v62 = vcombine.high %v2585_v57, %v2589_v59  ;;  %v8855_v8 = vcombine.low %v2585_v57, %v2589_v59 }
 0x65e   : > { %v8999_v21 = vcombine.low %v2729_v60, %v2733_v61  ;;  %v2693_v47 = vld [vmem:[#allocation20 + $0x1428] sm:$0xff] }
 0x65f   : > { %7027 = vmatpush2.bf16.msra.mxu1 %v8655_v5  ;;  %7066 = vmatpush2.bf16.msra.mxu0 %v8799_v63  ;;  %v9000_v5 = vcombine.high %v2729_v60, %v2733_v61  ;;  %v2577_v63 = vld [vmem:[#allocation20 + $0x1088] sm:$0xff] }
 0x660   : > { %7028 = vmatprep.subr.bf16.mxu1 %v8648_v0  ;;  %7067 = vmatprep.subr.bf16.mxu0 %v8792_v4  ;;  %v2581_v0 = vld [vmem:[#allocation20 + $0x10a8] sm:$0xff] }
 0x661   : > { %v2721_v4 = vld [vmem:[#allocation20 + $0x1508] sm:$0xff]  ;;  %v8848_v22 = vcombine.high %v2577_v63, %v2581_v0  ;;  %v8847_v14 = vcombine.low %v2577_v63, %v2581_v0  ;;  %v10600_v0 = vpop.f32.mrf.mxu1 }
 0x662   : > { %v8991_v15 = vcombine.low %v2721_v4, %v2725_v6  ;;  %v2809_v57 = vld [vmem:[#allocation20 + $0x17c8] sm:$0xff] }
 0x663   : > { %7029 = vmatpush2.bf16.msra.mxu1 %v8647_v9  ;;  %7068 = vmatpush2.bf16.msra.mxu0 %v8791_v10  ;;  %v8992_v9 = vcombine.high %v2721_v4, %v2725_v6  ;;  %v2569_v10 = vld [vmem:[#allocation20 + $0x1048] sm:$0xff] }
 0x664   : > { %7030 = vmatprep.subr.bf16.mxu1 %v8640_v11  ;;  %7069 = vmatprep.subr.bf16.mxu0 %v8784_v12  ;;  %v2573_v11 = vld [vmem:[#allocation20 + $0x1068] sm:$0xff] }
 0x665   : > { %v2713_v12 = vld [vmem:[#allocation20 + $0x14c8] sm:$0xff]  ;;  %v8840_v16 = vcombine.high %v2569_v10, %v2573_v11  ;;  %v8839_v27 = vcombine.low %v2569_v10, %v2573_v11 }
 0x666   : > { %v8983_v28 = vcombine.low %v2713_v12, %v2717_v13  ;;  %v2805_v63 = vld [vmem:[#allocation20 + $0x17a8] sm:$0xff] }
 0x667   : > { %7031 = vmatpush2.bf16.msra.mxu1 %v8639_v18  ;;  %7070 = vmatpush2.bf16.msra.mxu0 %v8783_v2  ;;  %v8984_v18 = vcombine.high %v2713_v12, %v2717_v13  ;;  %v2561_v2 = vld [vmem:[#allocation20 + $0x1008] sm:$0xff]  ;;  %v10602_v12 = vpop.f32.mrf.mxu1 }
 0x668   : > { %7071 = vmatprep.subr.bf16.mxu0 %v8776_v24  ;;  %7086 = vmatprep.subr.bf16.mxu1 %v8888_v25  ;;  %v2565_v24 = vld [vmem:[#allocation20 + $0x1028] sm:$0xff] }
 0x669   : > { %v2705_v25 = vld [vmem:[#allocation20 + $0x1488] sm:$0xff]  ;;  %v8832_v31 = vcombine.high %v2561_v2, %v2565_v24  ;;  %v8831_v38 = vcombine.low %v2561_v2, %v2565_v24 }
 0x66a   : > { %7033 = vmatmul.mubr.bf16.vlgmr.msra.gmra.mxu1 %v10553_v53  ;;  %v8975_v39 = vcombine.low %v2705_v25, %v2709_v26  ;;  %v2793_v10 = vld [vmem:[#allocation20 + $0x1748] sm:$0xff] }
 0x66b   : > { %7072 = vmatpush2.bf16.msra.mxu0 %v8775_v32  ;;  %7087 = vmatpush1.bf16.msra.mxu1 %v8887_v34  ;;  %v8976_v32 = vcombine.high %v2705_v25, %v2709_v26  ;;  %v2681_v34 = vld [vmem:[#allocation20 + $0x13c8] sm:$0xff]  ;;  %v10604_v26 = vpop.f32.mrf.mxu1 }
 0x66c   : > { %7118 = vmatprep.mubr.bf16.mxu1 %v10570_v29  ;;  %7073 = vmatprep.subr.bf16.mxu0 %v8768_v35  ;;  %v2685_v35 = vld [vmem:[#allocation20 + $0x13e8] sm:$0xff] }
 0x66d   : > { %7088 = vmatprep.subr.bf16.mxu1 %v8880_v37  ;;  %v2701_v37 = vld [vmem:[#allocation20 + $0x1468] sm:$0xff]  ;;  %v8952_v42 = vcombine.high %v2681_v34, %v2685_v35  ;;  %v8951_v48 = vcombine.low %v2681_v34, %v2685_v35 }
 0x66e   : > { %v8967_v49 = vcombine.low %v2697_v36, %v2701_v37  ;;  %v2797_v11 = vld [vmem:[#allocation20 + $0x1768] sm:$0xff] }
 0x66f   : > { %7074 = vmatpush2.bf16.msra.mxu0 %v8767_v3  ;;  %7089 = vmatpush1.bf16.msra.mxu1 %v8879_v19  ;;  %v8968_v3 = vcombine.high %v2697_v36, %v2701_v37  ;;  %v2673_v19 = vld [vmem:[#allocation20 + $0x1388] sm:$0xff] }
 0x670   : > { %7090 = vmatprep.subr.bf16.mxu1 %v8872_v43  ;;  %7129 = vmatprep.subr.bf16.mxu0 %v9016_v45  ;;  %v2677_v43 = vld [vmem:[#allocation20 + $0x13a8] sm:$0xff] }
 0x671   : > { %v2689_v45 = vld [vmem:[#allocation20 + $0x1408] sm:$0xff]  ;;  %v8944_v51 = vcombine.high %v2673_v19, %v2677_v43  ;;  %v8943_v59 = vcombine.low %v2673_v19, %v2677_v43 }
 0x672   : > { %7076 = vmatmul.mubr.bf16.vlgmr.msra.gmra.mxu0 %v10562_v7  ;;  %v8959_v60 = vcombine.low %v2689_v45, %v2693_v47  ;;  %v2645_v2 = vld [vmem:[#allocation20 + $0x12a8] sm:$0xff] }
 0x673   : > { %7091 = vmatpush1.bf16.msra.mxu1 %v8871_v54  ;;  %7130 = vmatpush1.bf16.msra.mxu0 %v9015_v23  ;;  %v8960_v54 = vcombine.high %v2689_v45, %v2693_v47  ;;  %v2665_v23 = vld [vmem:[#allocation20 + $0x1348] sm:$0xff] }
 0x674   : > { %7161 = vmatprep.mubr.bf16.mxu0 %v10577_v55  ;;  %7092 = vmatprep.subr.bf16.mxu1 %v8864_v56  ;;  %v2669_v56 = vld [vmem:[#allocation20 + $0x1368] sm:$0xff] }
 0x675   : > { %7131 = vmatprep.subr.bf16.mxu0 %v9008_v58  ;;  %v2813_v58 = vld [vmem:[#allocation20 + $0x17e8] sm:$0xff]  ;;  %v8936_v61 = vcombine.high %v2665_v23, %v2669_v56  ;;  %v8935_v4 = vcombine.low %v2665_v23, %v2669_v56 }
 0x676   : > { %v9079_v6 = vcombine.low %v2809_v57, %v2813_v58  ;;  %v2785_v24 = vld [vmem:[#allocation20 + $0x1708] sm:$0xff] }
 0x677   : > { %7093 = vmatpush1.bf16.msra.mxu1 %v8863_v33  ;;  %7132 = vmatpush1.bf16.msra.mxu0 %v9007_v46  ;;  %v9080_v33 = vcombine.high %v2809_v57, %v2813_v58  ;;  %v2657_v46 = vld [vmem:[#allocation20 + $0x1308] sm:$0xff] }
 0x678   : > { %7094 = vmatprep.subr.bf16.mxu1 %v8856_v62  ;;  %7133 = vmatprep.subr.bf16.mxu0 %v9000_v5  ;;  %v2661_v62 = vld [vmem:[#allocation20 + $0x1328] sm:$0xff] }
 0x679   : > { %v2801_v5 = vld [vmem:[#allocation20 + $0x1788] sm:$0xff]  ;;  %v8927_v13 = vcombine.low %v2657_v46, %v2661_v62 }
 0x67a   : > { %v2789_v25 = vld [vmem:[#allocation20 + $0x1728] sm:$0xff] }
 0x67b   : > { %7095 = vmatpush1.bf16.msra.mxu1 %v8855_v8  ;;  %7134 = vmatpush1.bf16.msra.mxu0 %v8999_v21  ;;  %v8928_v8 = vcombine.high %v2657_v46, %v2661_v62  ;;  %v9072_v21 = vcombine.high %v2801_v5, %v2805_v63  ;;  %v9056_v34 = vcombine.high %v2785_v24, %v2789_v25  ;;  %v2633_v35 = vld [vmem:[#allocation20 + $0x1248] sm:$0xff]  ;;  %v2106_v46 = vld [vmem:[#allocation20 + $0x1d0] sm:$0xff] }
 0x67c   : > { %7096 = vmatprep.subr.bf16.mxu1 %v8848_v22  ;;  %7135 = vmatprep.subr.bf16.mxu0 %v8992_v9  ;;  %v2649_v22 = vld [vmem:[#allocation20 + $0x12c8] sm:$0xff]  ;;  %v9055_v19 = vcombine.low %v2785_v24, %v2789_v25  ;;  %v2110_v62 = vld [vmem:[#allocation20 + $0x1f0] sm:$0xff] }
 0x67d   : > { %v2653_v9 = vld [vmem:[#allocation20 + $0x12e8] sm:$0xff]  ;;  %v2090_v24 = vld [vmem:[#allocation20 + $0x150] sm:$0xff] }
 0x67e   : > { %v2637_v36 = vld [vmem:[#allocation20 + $0x1268] sm:$0xff] }
 0x67f   : > { %7097 = vmatpush1.bf16.msra.mxu1 %v8847_v14  ;;  %7136 = vmatpush1.bf16.msra.mxu0 %v8991_v15  ;;  %v9071_v14 = vcombine.low %v2801_v5, %v2805_v63  ;;  %v8920_v15 = vcombine.high %v2649_v22, %v2653_v9  ;;  %v2777_v37 = vld [vmem:[#allocation20 + $0x16c8] sm:$0xff]  ;;  %v8904_v45 = vcombine.high %v2633_v35, %v2637_v36 }
 0x680   : > { %7098 = vmatprep.subr.bf16.mxu1 %v8840_v16  ;;  %7137 = vmatprep.subr.bf16.mxu0 %v8984_v18  ;;  %v9064_v16 = vcombine.high %v2793_v10, %v2797_v11  ;;  %v2641_v18 = vld [vmem:[#allocation20 + $0x1288] sm:$0xff]  ;;  %v8903_v56 = vcombine.low %v2633_v35, %v2637_v36 }
 0x683   : > { %7099 = vmatpush1.bf16.msra.mxu1 %v8839_v27  ;;  %7138 = vmatpush1.bf16.msra.mxu0 %v8983_v28  ;;  %v10606_v27 = vpop.f32.mrf.mxu0  ;;  %v8919_v28 = vcombine.low %v2649_v22, %v2653_v9  ;;  %v8378_v22 = vcombine.high %v2106_v46, %v2110_v62  ;;  %v2753_v9 = vld [vmem:[#allocation20 + $0x1608] sm:$0xff] }
 0x684   : > { %7100 = vmatprep.subr.bf16.mxu1 %v8832_v31  ;;  %7139 = vmatprep.subr.bf16.mxu0 %v8976_v32  ;;  %v9063_v31 = vcombine.low %v2793_v10, %v2797_v11  ;;  %v8912_v32 = vcombine.high %v2641_v18, %v2645_v2  ;;  %v2757_v10 = vld [vmem:[#allocation20 + $0x1628] sm:$0xff]  ;;  %v2098_v11 = vld [vmem:[#allocation20 + $0x190] sm:$0xff]  ;;  %v6734_v35 = vadd.f32 %v10606_v27, %v10600_v0 }
 0x685   : > { %v9023_v36 = vcombine.low %v2753_v9, %v2757_v10  ;;  %v2086_v0 = vld [vmem:[#allocation20 + $0x130] sm:$0xff] }
 0x686   : > { %v2226_v27 = vld [vmem:[#allocation20 + $0x590] sm:$0xff] }
 0x687   : > { %7101 = vmatpush1.bf16.msra.mxu1 %v8831_v38  ;;  %7140 = vmatpush1.bf16.msra.mxu0 %v8975_v39  ;;  %v2781_v38 = vld [vmem:[#allocation20 + $0x16e8] sm:$0xff]  ;;  %v10608_v39 = vpop.f32.mrf.mxu1 }
 0x688   : > { %7102 = vmatprep.subr.bf16.mxu1 %v8952_v42  ;;  %7141 = vmatprep.subr.bf16.mxu0 %v8968_v3  ;;  %v10610_v42 = vpop.f32.mrf.mxu0  ;;  %v8911_v3 = vcombine.low %v2641_v18, %v2645_v2  ;;  %v9048_v47 = vcombine.high %v2777_v37, %v2781_v38  ;;  %v9047_v57 = vcombine.low %v2777_v37, %v2781_v38 }
 0x689   : > { %v10612_v43 = vpop.f32.mrf.mxu1  ;;  %v9024_v2 = vcombine.high %v2753_v9, %v2757_v10 }
 0x68a   : > { %v10614_v23 = vpop.f32.mrf.mxu0 }
 0x68b   : > { %7103 = vmatpush2.bf16.msra.mxu1 %v8951_v48  ;;  %7142 = vmatpush1.bf16.msra.mxu0 %v8967_v49  ;;  %v2625_v48 = vld [vmem:[#allocation20 + $0x1208] sm:$0xff]  ;;  %v10616_v58 = vpop.f32.mrf.mxu1 }
 0x68c   : > { %7104 = vmatprep.subr.bf16.mxu1 %v8944_v51  ;;  %7143 = vmatprep.subr.bf16.mxu0 %v8960_v54  ;;  %v2629_v49 = vld [vmem:[#allocation20 + $0x1228] sm:$0xff]  ;;  %v6739_v5 = vpop.f32.mrf.mxu0 }
 0x68d   : > { %v2769_v51 = vld [vmem:[#allocation20 + $0x1688] sm:$0xff]  ;;  %v8895_v63 = vcombine.low %v2625_v48, %v2629_v49 }
 0x68e   : > { %v2773_v54 = vld [vmem:[#allocation20 + $0x16a8] sm:$0xff] }
 0x68f   : > { %7105 = vmatpush2.bf16.msra.mxu1 %v8943_v59  ;;  %7144 = vmatpush1.bf16.msra.mxu0 %v8959_v60  ;;  %v8896_v59 = vcombine.high %v2625_v48, %v2629_v49  ;;  %v9040_v60 = vcombine.high %v2769_v51, %v2773_v54  ;;  %v10622_v48 = vld [vmem:[#allocation20 + $0x110] sm:$0xff]  ;;  %v6736_v49 = vadd.f32 %v10610_v42, %v10602_v12 }
 0x690   : > { %7106 = vmatprep.subr.bf16.mxu1 %v8936_v61  ;;  %7145 = vmatprep.subr.bf16.mxu0 %v9080_v33  ;;  %v2761_v61 = vld [vmem:[#allocation20 + $0x1648] sm:$0xff] }
 0x691   : > { %v2765_v33 = vld [vmem:[#allocation20 + $0x1668] sm:$0xff] }
 0x693   : > { %7107 = vmatpush2.bf16.msra.mxu1 %v8935_v4  ;;  %7146 = vmatpush2.bf16.msra.mxu0 %v9079_v6  ;;  %v9039_v4 = vcombine.low %v2769_v51, %v2773_v54  ;;  %v6780_v6 = vpop.f32.mrf.mxu1  ;;  %v6777_v51 = vadd.f32 %v10612_v43, %v6734_v35  ;;  %v2230_v54 = vld [vmem:[#allocation20 + $0x5b0] sm:$0xff] }
 0x694   : > { %7108 = vmatprep.subr.bf16.mxu1 %v8928_v8  ;;  %7147 = vmatprep.subr.bf16.mxu0 %v9072_v21  ;;  %v6819_v8 = vpop.f32.mrf.mxu0  ;;  %v9032_v21 = vcombine.high %v2761_v61, %v2765_v33  ;;  %v2070_v35 = vld [vmem:[#allocation20 + $0xb0] sm:$0xff] }
 0x696   : > { %v6821_v18 = vpop.f32.mrf.mxu0 }
 0x697   : > { %7109 = vmatpush2.bf16.msra.mxu1 %v8927_v13  ;;  %7148 = vmatpush2.bf16.msra.mxu0 %v9071_v14  ;;  %v2102_v13 = vld [vmem:[#allocation20 + $0x1b0] sm:$0xff]  ;;  %v9031_v14 = vcombine.low %v2761_v61, %v2765_v33  ;;  %v6779_v61 = vadd.f32 %v10616_v58, %v6736_v49  ;;  %v6820_v33 = vadd.f32 %v6819_v8, %v6777_v51 }
 0x698   : > { %7110 = vmatprep.subr.bf16.mxu1 %v8920_v15  ;;  %7149 = vmatprep.subr.bf16.mxu0 %v9064_v16  ;;  %v8377_v15 = vcombine.low %v2106_v46, %v2110_v62  ;;  %v6782_v16 = vpop.f32.mrf.mxu1  ;;  %v8370_v25 = vcombine.high %v2098_v11, %v2102_v13  ;;  %v8369_v37 = vcombine.low %v2098_v11, %v2102_v13  ;;  %v6823_v38 = vpop.f32.mrf.mxu0  ;;  %v2218_v8 = vld [vmem:[#allocation20 + $0x550] sm:$0xff] }
 0x699   : > { %v8354_v62 = vcombine.high %v10622_v48, %v2086_v0  ;;  %v8353_v11 = vcombine.low %v10622_v48, %v2086_v0  ;;  %v8497_v13 = vcombine.low %v2226_v27, %v2230_v54 }
 0x69a   : > { %v6825_v42 = vpop.f32.mrf.mxu0 }
 0x69b   : > { %7111 = vmatpush2.bf16.msra.mxu1 %v8919_v28  ;;  %7150 = vmatpush2.bf16.msra.mxu0 %v9063_v31  ;;  %v2094_v28 = vld [vmem:[#allocation20 + $0x170] sm:$0xff] }
 0x69c   : > { %7112 = vmatprep.subr.bf16.mxu1 %v8912_v32  ;;  %7151 = vmatprep.subr.bf16.mxu0 %v9056_v34  ;;  %v2234_v31 = vld [vmem:[#allocation20 + $0x5d0] sm:$0xff] }
 0x69d   : > { %v2238_v32 = vld [vmem:[#allocation20 + $0x5f0] sm:$0xff] }
 0x69e   : > { %v8505_v12 = vcombine.low %v2234_v31, %v2238_v32 }
 0x69f   : > { %7113 = vmatpush2.bf16.msra.mxu1 %v8911_v3  ;;  %7152 = vmatpush2.bf16.msra.mxu0 %v9055_v19  ;;  %v7688_v19 = vld [vmem:[#allocation22] sm:$0xff] }
 0x6a0   : > { %7114 = vmatprep.subr.bf16.mxu1 %v8904_v45  ;;  %7153 = vmatprep.subr.bf16.mxu0 %v9048_v47  ;;  %v8362_v45 = vcombine.high %v2090_v24, %v2094_v28  ;;  %v8506_v47 = vcombine.high %v2234_v31, %v2238_v32  ;;  %v7693_v43 = vrot.slane %v7688_v19, %v10508_v44 }
 0x6a1   : > { %v7697_v10 = vrot.slane %v7688_v19, %v10505_v41 }
 0x6a3   : > { %7115 = vmatpush2.bf16.msra.mxu1 %v8903_v56  ;;  %7154 = vmatpush2.bf16.msra.mxu0 %v9047_v57  ;;  %v6738_v56 = vadd.f32 %v10614_v23, %v10604_v26  ;;  %v6740_v57 = vadd.f32 %v6739_v5, %v10608_v39  ;;  %v10633_v26 = vld [vmem:[#allocation20 + $0xd0] sm:$0xff]  ;;  %v6822_v23 = vadd.f32 %v6821_v18, %v6779_v61 }
 0x6a4   : > { %7116 = vmatprep.subr.bf16.mxu1 %v8896_v59  ;;  %7155 = vmatprep.subr.bf16.mxu0 %v9040_v60  ;;  %v7746_v59 = vld [vmem:[#allocation23] sm:$0xff]  ;;  %v8361_v60 = vcombine.low %v2090_v24, %v2094_v28  ;;  %v2062_v61 = vld [vmem:[#allocation20 + $0x70] sm:$0xff] }
 0x6a5   : > { %v6781_v39 = vadd.f32 %v6780_v6, %v6738_v56  ;;  %v7751_v58 = vrot.slane %v7746_v59, %v10508_v44 }
 0x6a7   : > { %7117 = vmatpush2.bf16.msra.mxu1 %v8895_v63  ;;  %7156 = vmatpush2.bf16.msra.mxu0 %v9039_v4  ;;  %v8498_v63 = vcombine.high %v2226_v27, %v2230_v54  ;;  %v2078_v4 = vld [vmem:[#allocation20 + $0xf0] sm:$0xff] }
 0x6a8   : > { %7157 = vmatprep.subr.bf16.mxu0 %v9032_v21  ;;  %7172 = vmatprep.subr.bf16.mxu1 %v8378_v22  ;;  %v2222_v21 = vld [vmem:[#allocation20 + $0x570] sm:$0xff]  ;;  %v6783_v22 = vadd.f32 %v6782_v16, %v6740_v57  ;;  %v8346_v16 = vcombine.high %v10633_v26, %v2078_v4 }
 0x6a9   : > { %v8490_v24 = vcombine.high %v2218_v8, %v2222_v21  ;;  %v2058_v54 = vld [vmem:[#allocation20 + $0x50] sm:$0xff] }
 0x6aa   : > { %v6862_v34 = vpop.f32.mrf.mxu1  ;;  %7119 = vmatmul.mubr.bf16.vlgmr.msra.gmra.mxu1 %v10582_v30  ;;  %v6826_v44 = vadd.f32 %v6825_v42, %v6783_v22  ;;  %v2198_v22 = vld [vmem:[#allocation20 + $0x4b0] sm:$0xff] }
 0x6ab   : > { %7158 = vmatpush2.bf16.msra.mxu0 %v9031_v14  ;;  %7173 = vmatpush1.bf16.msra.mxu1 %v8377_v15  ;;  %v6863_v5 = vadd.f32 %v6862_v34, %v6820_v33  ;;  %v6824_v14 = vadd.f32 %v6823_v38, %v6781_v39  ;;  %v7755_v34 = vrot.slane %v7746_v59, %v10505_v41  ;;  %v9539_v38 = vld [vmem:[%s10430_s29 + $0x4] ss:$8 sps:$4 sm:$0xff]  }
 0x6ac   : > { %7204 = vmatprep.mubr.bf16.mxu1 %v10514_v17  ;;  %v6864_v3 = vpop.f32.mrf.mxu1  ;;  %7159 = vmatprep.subr.bf16.mxu0 %v9024_v2  ;;  %v2202_v33 = vld [vmem:[#allocation20 + $0x4d0] sm:$0xff]  ;;  %v8330_v39 = vcombine.high %v2058_v54, %v2062_v61 }
 0x6ad   : > { %7174 = vmatprep.subr.bf16.mxu1 %v8370_v25  ;;  %v6865_v15 = vadd.f32 %v6864_v3, %v6822_v23  ;;  %v2066_v25 = vld [vmem:[#allocation20 + $0x90] sm:$0xff] }
 0x6ae   : > { %v6866_v46 = vpop.f32.mrf.mxu1  ;;  %v8338_v27 = vcombine.high %v2066_v25, %v2070_v35 }
 0x6af   : > { %7160 = vmatpush2.bf16.msra.mxu0 %v9023_v36  ;;  %7175 = vmatpush1.bf16.msra.mxu1 %v8369_v37  ;;  %v6867_v28 = vadd.f32 %v6866_v46, %v6824_v14  ;;  %v2210_v36 = vld [vmem:[#allocation20 + $0x510] sm:$0xff] }
 0x6b0   : > { %7176 = vmatprep.subr.bf16.mxu1 %v8362_v45  ;;  %7215 = vmatprep.subr.bf16.mxu0 %v8506_v47  ;;  %v6868_v2 = vpop.f32.mrf.mxu1  ;;  %v2214_v37 = vld [vmem:[#allocation20 + $0x530] sm:$0xff]  ;;  %v8345_v45 = vcombine.low %v10633_v26, %v2078_v4  ;;  %v8489_v47 = vcombine.low %v2218_v8, %v2222_v21 }
 0x6b1   : > { %v6869_v3 = vadd.f32 %v6868_v2, %v6826_v44  ;;  %v8482_v41 = vcombine.high %v2210_v36, %v2214_v37  ;;  %v2206_v46 = vld [vmem:[#allocation20 + $0x4f0] sm:$0xff]  ;;  %v8481_v42 = vcombine.low %v2210_v36, %v2214_v37 }
 0x6b2   : > { %v6905_v9 = vpop.f32.mrf.mxu0  ;;  %7162 = vmatmul.mubr.bf16.vlgmr.msra.gmra.mxu0 %v10588_v50  ;;  %v8474_v23 = vcombine.high %v2202_v33, %v2206_v46  ;;  %v2054_v8 = vld [vmem:[#allocation20 + $0x30] sm:$0xff] }
 0x6b3   : > { %v6906_v6 = vadd.f32 %v6905_v9, %v6863_v5  ;;  %7177 = vmatpush1.bf16.msra.mxu1 %v8361_v60  ;;  %7216 = vmatpush1.bf16.msra.mxu0 %v8505_v12  ;;  %v8337_v12 = vcombine.low %v2066_v25, %v2070_v35  ;;  %v2050_v5 = vld [vmem:[#allocation20 + $0x10] sm:$0xff] }
 0x6b4   : > { %v6907_v18 = vpop.f32.mrf.mxu0  ;;  %7178 = vmatprep.subr.bf16.mxu1 %v8354_v62  ;;  %7217 = vmatprep.subr.bf16.mxu0 %v8498_v63  ;;  %v2194_v21 = vld [vmem:[#allocation20 + $0x490] sm:$0xff]  ;;  %v8321_v44 = vcombine.low %v2050_v5, %v2054_v8 }
 0x6b5   : > { %v7730_v31 = vmul.f32 %v7693_v43, %v6906_v6  ;;  %v6908_v32 = vadd.f32 %v6907_v18, %v6865_v15  ;;  %7247 = vmatprep.mubr.bf16.mxu0 %v9539_v38  ;;  %v2170_v14 = vld [vmem:[#allocation20 + $0x3d0] sm:$0xff]  ;;  %v8465_v18 = vcombine.low %v2194_v21, %v2198_v22 }
 0x6b6   : > { %v6909_v19 = vpop.f32.mrf.mxu0  ;;  %v2174_v15 = vld [vmem:[#allocation20 + $0x3f0] sm:$0xff] }
 0x6b7   : > { %v7788_v48 = vadd.f32 %v7751_v58, %v7730_v31  ;;  %v7731_v49 = vmul.f32 %v7697_v10, %v6908_v32  ;;  %v6910_v51 = vadd.f32 %v6909_v19, %v6867_v28  ;;  %7179 = vmatpush1.bf16.msra.mxu1 %v8353_v11  ;;  %7218 = vmatpush1.bf16.msra.mxu0 %v8497_v13  ;;  %v2186_v2 = vld [vmem:[#allocation20 + $0x450] sm:$0xff] }
 0x6b8   : > { %v6911_v0 = vpop.f32.mrf.mxu0  ;;  %7180 = vmatprep.subr.bf16.mxu1 %v8346_v16  ;;  %7219 = vmatprep.subr.bf16.mxu0 %v8490_v24  ;;  %v8329_v11 = vcombine.low %v2058_v54, %v2062_v61  ;;  %v8466_v13 = vcombine.high %v2194_v21, %v2198_v22  ;;  %v2190_v6 = vld [vmem:[#allocation20 + $0x470] sm:$0xff]  ;;  %v8442_v16 = vcombine.high %v2170_v14, %v2174_v15 }
 0x6b9   : > { %v9085_v56 = vmul.f32 -1.442695, %v7788_v48  ;;  %v7789_v57 = vadd.f32 %v7755_v34, %v7731_v49  ;;  %v7738_v59 = vmul.f32 %v7693_v43, %v6910_v51  ;;  %v6912_v60 = vadd.f32 %v6911_v0, %v6869_v3  ;;  %v2162_v25 = vld [vmem:[#allocation20 + $0x390] sm:$0xff] }
 0x6ba   : > { %v8458_v24 = vcombine.high %v2186_v2, %v2190_v6  ;;  %v2166_v28 = vld [vmem:[#allocation20 + $0x3b0] sm:$0xff]  ;;  %v8457_v35 = vcombine.low %v2186_v2, %v2190_v6 }
 0x6bb   : > { %9471 = vpow2.f32 %v9085_v56  ;;  %v9086_v62 = vmul.f32 -1.442695, %v7789_v57  ;;  %v7796_v63 = vadd.f32 %v7751_v58, %v7738_v59  ;;  %v7739_v26 = vmul.f32 %v7697_v10, %v6912_v60  ;;  %7181 = vmatpush1.bf16.msra.mxu1 %v8345_v45  ;;  %7220 = vmatpush1.bf16.msra.mxu0 %v8489_v47  ;;  %v2178_v31 = vld [vmem:[#allocation20 + $0x410] sm:$0xff] }
 0x6bc   : > { %7182 = vmatprep.subr.bf16.mxu1 %v8338_v27  ;;  %7221 = vmatprep.subr.bf16.mxu0 %v8482_v41  ;;  %v8473_v58 = vcombine.low %v2202_v33, %v2206_v46  ;;  %v8322_v10 = vcombine.high %v2050_v5, %v2054_v8  ;;  %v2182_v32 = vld [vmem:[#allocation20 + $0x430] sm:$0xff]  ;;  %v8434_v37 = vcombine.high %v2162_v25, %v2166_v28 }
 0x6bd   : > { %9473 = vpow2.f32 %v9086_v62  ;;  %v9093_v4 = vmul.f32 -1.442695, %v7796_v63  ;;  %v7797_v43 = vadd.f32 %v7755_v34, %v7739_v26  ;;  %v8441_v34 = vcombine.low %v2170_v14, %v2174_v15  ;;  %v2154_v3 = vld [vmem:[#allocation20 + $0x350] sm:$0xff] }
 0x6be   : > { %v8450_v38 = vcombine.high %v2178_v31, %v2182_v32  ;;  %v2158_v45 = vld [vmem:[#allocation20 + $0x370] sm:$0xff]  ;;  %v8433_v0 = vcombine.low %v2162_v25, %v2166_v28  ;;  %v8449_v27 = vcombine.low %v2178_v31, %v2182_v32 }
 0x6bf   : > { %9475 = vpow2.f32 %v9093_v4  ;;  %v9094_v9 = vmul.f32 -1.442695, %v7797_v43  ;;  %7183 = vmatpush1.bf16.msra.mxu1 %v8337_v12  ;;  %7222 = vmatpush1.bf16.msra.mxu0 %v8481_v42  ;;  %v2298_v47 = vld [vmem:[#allocation20 + $0x7d0] sm:$0xff]  ;;  %v8426_v54 = vcombine.high %v2154_v3, %v2158_v45  ;;  %v8425_v42 = vcombine.low %v2154_v3, %v2158_v45 }
 0x6c0   : > { %7184 = vmatprep.subr.bf16.mxu1 %v8330_v39  ;;  %7223 = vmatprep.subr.bf16.mxu0 %v8474_v23  ;;  %v2302_v48 = vld [vmem:[#allocation20 + $0x7f0] sm:$0xff] }
 0x6c1   : > { %9477 = vpow2.f32 %v9094_v9  ;;  %v8570_v56 = vcombine.high %v2298_v47, %v2302_v48  ;;  %v2146_v57 = vld [vmem:[#allocation20 + $0x310] sm:$0xff]  ;;  %v8569_v62 = vcombine.low %v2298_v47, %v2302_v48 }
 0x6c2   : > { %v2150_v60 = vld [vmem:[#allocation20 + $0x330] sm:$0xff] }
 0x6c3   : > { %7185 = vmatpush1.bf16.msra.mxu1 %v8329_v11  ;;  %7224 = vmatpush1.bf16.msra.mxu0 %v8473_v58  ;;  %v2290_v61 = vld [vmem:[#allocation20 + $0x790] sm:$0xff]  ;;  %v8418_v63 = vcombine.high %v2146_v57, %v2150_v60  ;;  %v8417_v43 = vcombine.low %v2146_v57, %v2150_v60 }
 0x6c4   : > { %7186 = vmatprep.subr.bf16.mxu1 %v8322_v10  ;;  %7225 = vmatprep.subr.bf16.mxu0 %v8466_v13  ;;  %v2294_v33 = vld [vmem:[#allocation20 + $0x7b0] sm:$0xff] }
 0x6c5   : > { %v8562_v26 = vcombine.high %v2290_v61, %v2294_v33  ;;  %v2138_v39 = vld [vmem:[#allocation20 + $0x2d0] sm:$0xff]  ;;  %v8561_v8 = vcombine.low %v2290_v61, %v2294_v33 }
 0x6c6   : > { %v2142_v23 = vld [vmem:[#allocation20 + $0x2f0] sm:$0xff] }
 0x6c7   : > { %7187 = vmatpush1.bf16.msra.mxu1 %v8321_v44  ;;  %7226 = vmatpush1.bf16.msra.mxu0 %v8465_v18  ;;  %v2282_v5 = vld [vmem:[#allocation20 + $0x750] sm:$0xff]  ;;  %v8410_v21 = vcombine.high %v2138_v39, %v2142_v23  ;;  %v8409_v13 = vcombine.low %v2138_v39, %v2142_v23 }
 0x6c8   : > { %v9472_v36 = vpop.eup %9471  ;;  %7188 = vmatprep.subr.bf16.mxu1 %v8442_v16  ;;  %7227 = vmatprep.subr.bf16.mxu0 %v8458_v24  ;;  %v2286_v4 = vld [vmem:[#allocation20 + $0x770] sm:$0xff] }
 0x6c9   : > { %v7852_v19 = vadd.f32 1.0, %v9472_v36  ;;  %v8554_v22 = vcombine.high %v2282_v5, %v2286_v4  ;;  %v2130_v9 = vld [vmem:[#allocation20 + $0x290] sm:$0xff]  ;;  %v8553_v14 = vcombine.low %v2282_v5, %v2286_v4 }
 0x6ca   : > { %v9474_v49 = vpop.eup %9473  ;;  %v2134_v11 = vld [vmem:[#allocation20 + $0x2b0] sm:$0xff] }
 0x6cb   : > { %9479 = vrcp.f32 %v7852_v19  ;;  %v7853_v51 = vadd.f32 1.0, %v9474_v49  ;;  %7189 = vmatpush2.bf16.msra.mxu1 %v8441_v34  ;;  %7228 = vmatpush1.bf16.msra.mxu0 %v8457_v35  ;;  %v2274_v58 = vld [vmem:[#allocation20 + $0x710] sm:$0xff]  ;;  %v8402_v2 = vcombine.high %v2130_v9, %v2134_v11  ;;  %v8401_v28 = vcombine.low %v2130_v9, %v2134_v11 }
 0x6cc   : > { %v9476_v41 = vpop.eup %9475  ;;  %7190 = vmatprep.subr.bf16.mxu1 %v8434_v37  ;;  %7229 = vmatprep.subr.bf16.mxu0 %v8450_v38  ;;  %v2278_v10 = vld [vmem:[#allocation20 + $0x730] sm:$0xff] }
 0x6cd   : > { %9481 = vrcp.f32 %v7853_v51  ;;  %v7860_v59 = vadd.f32 1.0, %v9476_v41  ;;  %v8546_v6 = vcombine.high %v2274_v58, %v2278_v10  ;;  %v2122_v44 = vld [vmem:[#allocation20 + $0x250] sm:$0xff]  ;;  %v8545_v31 = vcombine.low %v2274_v58, %v2278_v10 }
 0x6ce   : > { %v9478_v46 = vpop.eup %9477  ;;  %v2126_v18 = vld [vmem:[#allocation20 + $0x270] sm:$0xff] }
 0x6cf   : > { %9483 = vrcp.f32 %v7860_v59  ;;  %v7861_v12 = vadd.f32 1.0, %v9478_v46  ;;  %7191 = vmatpush2.bf16.msra.mxu1 %v8433_v0  ;;  %7230 = vmatpush1.bf16.msra.mxu0 %v8449_v27  ;;  %v2266_v16 = vld [vmem:[#allocation20 + $0x6d0] sm:$0xff]  ;;  %v8394_v34 = vcombine.high %v2122_v44, %v2126_v18  ;;  %v8393_v45 = vcombine.low %v2122_v44, %v2126_v18 }
 0x6d0   : > { %7192 = vmatprep.subr.bf16.mxu1 %v8426_v54  ;;  %7231 = vmatprep.subr.bf16.mxu0 %v8570_v56  ;;  %v2270_v24 = vld [vmem:[#allocation20 + $0x6f0] sm:$0xff] }
 0x6d1   : > { %9485 = vrcp.f32 %v7861_v12  ;;  %v8538_v35 = vcombine.high %v2266_v16, %v2270_v24  ;;  %v2114_v36 = vld [vmem:[#allocation20 + $0x210] sm:$0xff]  ;;  %v8537_v47 = vcombine.low %v2266_v16, %v2270_v24 }
 0x6d2   : > { %v2118_v37 = vld [vmem:[#allocation20 + $0x230] sm:$0xff] }
 0x6d3   : > { %7193 = vmatpush2.bf16.msra.mxu1 %v8425_v42  ;;  %7232 = vmatpush2.bf16.msra.mxu0 %v8569_v62  ;;  %v2258_v38 = vld [vmem:[#allocation20 + $0x690] sm:$0xff]  ;;  %v8386_v48 = vcombine.high %v2114_v36, %v2118_v37  ;;  %v8385_v54 = vcombine.low %v2114_v36, %v2118_v37 }
 0x6d4   : > { %7194 = vmatprep.subr.bf16.mxu1 %v8418_v63  ;;  %7233 = vmatprep.subr.bf16.mxu0 %v8562_v26  ;;  %v2262_v3 = vld [vmem:[#allocation20 + $0x6b0] sm:$0xff] }
 0x6d5   : > { %v8530_v49 = vcombine.high %v2258_v38, %v2262_v3  ;;  %v2250_v51 = vld [vmem:[#allocation20 + $0x650] sm:$0xff]  ;;  %v8529_v56 = vcombine.low %v2258_v38, %v2262_v3 }
 0x6d6   : > { %v2254_v0 = vld [vmem:[#allocation20 + $0x670] sm:$0xff] }
 0x6d7   : > { %7195 = vmatpush2.bf16.msra.mxu1 %v8417_v43  ;;  %7234 = vmatpush2.bf16.msra.mxu0 %v8561_v8  ;;  %v2362_v27 = vld [vmem:[#allocation20 + $0x9d0] sm:$0xff]  ;;  %v8522_v57 = vcombine.high %v2250_v51, %v2254_v0  ;;  %v8521_v12 = vcombine.low %v2250_v51, %v2254_v0 }
 0x6d8   : > { %v9480_v15 = vpop.eup %9479  ;;  %7196 = vmatprep.subr.bf16.mxu1 %v8410_v21  ;;  %7235 = vmatprep.subr.bf16.mxu0 %v8554_v22  ;;  %v2366_v41 = vld [vmem:[#allocation20 + $0x9f0] sm:$0xff] }
 0x6d9   : > { %7900 = vst [vmem:[%s10644_s28] sm:$0xff] %v9480_v15  ;;  %v8634_v59 = vcombine.high %v2362_v27, %v2366_v41  ;;  %v2242_v60 = vld [vmem:[#allocation20 + $0x610] sm:$0xff]  ;;  %v8633_v42 = vcombine.low %v2362_v27, %v2366_v41 }
 0x6da   : > { %v9482_v25 = vpop.eup %9481  ;;  %v2246_v61 = vld [vmem:[#allocation20 + $0x630] sm:$0xff] }
 0x6db   : > { %7901 = vst [vmem:[%s10644_s28 + $0x8] sm:$0xff] %v9482_v25  ;;  %7197 = vmatpush2.bf16.msra.mxu1 %v8409_v13  ;;  %7236 = vmatpush2.bf16.msra.mxu0 %v8553_v14  ;;  %v2354_v33 = vld [vmem:[#allocation20 + $0x990] sm:$0xff]  ;;  %v8514_v62 = vcombine.high %v2242_v60, %v2246_v61  ;;  %v8513_v4 = vcombine.low %v2242_v60, %v2246_v61 }
 0x6dc   : > { %v9484_v32 = vpop.eup %9483  ;;  %7198 = vmatprep.subr.bf16.mxu1 %v8402_v2  ;;  %7237 = vmatprep.subr.bf16.mxu0 %v8546_v6  ;;  %v2358_v46 = vld [vmem:[#allocation20 + $0x9b0] sm:$0xff] }
 0x6dd   : > { %7908 = vst [vmem:[%s10644_s28 + $0x40] sm:$0xff] %v9484_v32  ;;  %v2346_v63 = vld [vmem:[#allocation20 + $0x950] sm:$0xff]  ;;  %v8626_v26 = vcombine.high %v2354_v33, %v2358_v46  ;;  %v8625_v43 = vcombine.low %v2354_v33, %v2358_v46 }
 0x6de   : > { %v9486_v19 = vpop.eup %9485  ;;  %v2350_v39 = vld [vmem:[#allocation20 + $0x970] sm:$0xff] }
 0x6df   : > { %7909 = vst [vmem:[%s10644_s28 + $0x48] sm:$0xff] %v9486_v19  ;;  %7199 = vmatpush2.bf16.msra.mxu1 %v8401_v28  ;;  %7238 = vmatpush2.bf16.msra.mxu0 %v8545_v31  ;;  %v2490_v23 = vld [vmem:[#allocation20 + $0xdd0] sm:$0xff]  ;;  %v8618_v8 = vcombine.high %v2346_v63, %v2350_v39  ;;  %v8617_v10 = vcombine.low %v2346_v63, %v2350_v39 }
 0x6e0   : > { %7200 = vmatprep.subr.bf16.mxu1 %v8394_v34  ;;  %7239 = vmatprep.subr.bf16.mxu0 %v8538_v35  ;;  %v2494_v5 = vld [vmem:[#allocation20 + $0xdf0] sm:$0xff] }
 0x6e1   : > { %v8762_v21 = vcombine.high %v2490_v23, %v2494_v5  ;;  %v2338_v22 = vld [vmem:[#allocation20 + $0x910] sm:$0xff]  ;;  %v8761_v13 = vcombine.low %v2490_v23, %v2494_v5 }
 0x6e2   : > { %v2342_v9 = vld [vmem:[#allocation20 + $0x930] sm:$0xff] }
 0x6e3   : > { %7201 = vmatpush2.bf16.msra.mxu1 %v8393_v45  ;;  %7240 = vmatpush2.bf16.msra.mxu0 %v8537_v47  ;;  %v2482_v11 = vld [vmem:[#allocation20 + $0xd90] sm:$0xff]  ;;  %v8610_v14 = vcombine.high %v2338_v22, %v2342_v9  ;;  %v8609_v24 = vcombine.low %v2338_v22, %v2342_v9 }
 0x6e4   : > { %7202 = vmatprep.subr.bf16.mxu1 %v8386_v48  ;;  %7241 = vmatprep.subr.bf16.mxu0 %v8530_v49  ;;  %v2486_v58 = vld [vmem:[#allocation20 + $0xdb0] sm:$0xff] }
 0x6e5   : > { %v2330_v15 = vld [vmem:[#allocation20 + $0x8d0] sm:$0xff]  ;;  %v8754_v2 = vcombine.high %v2482_v11, %v2486_v58  ;;  %v8753_v25 = vcombine.low %v2482_v11, %v2486_v58 }
 0x6e6   : > { %v2334_v6 = vld [vmem:[#allocation20 + $0x8f0] sm:$0xff] }
 0x6e7   : > { %7203 = vmatpush2.bf16.msra.mxu1 %v8385_v54  ;;  %7242 = vmatpush2.bf16.msra.mxu0 %v8529_v56  ;;  %v2474_v44 = vld [vmem:[#allocation20 + $0xd50] sm:$0xff]  ;;  %v8602_v28 = vcombine.high %v2330_v15, %v2334_v6  ;;  %v8601_v37 = vcombine.low %v2330_v15, %v2334_v6 }
 0x6e8   : > { %7243 = vmatprep.subr.bf16.mxu0 %v8522_v57  ;;  %7258 = vmatprep.subr.bf16.mxu1 %v8634_v59  ;;  %v2478_v18 = vld [vmem:[#allocation20 + $0xd70] sm:$0xff] }
 0x6e9   : > { %v9540_v16 = vld [vmem:[%s10430_s29] ss:$8 sps:$4 sm:$0xff]   ;;  %v8746_v31 = vcombine.high %v2474_v44, %v2478_v18  ;;  %v8745_v38 = vcombine.low %v2474_v44, %v2478_v18 }
 0x6ea   : > { %7205 = vmatmul.mubr.bf16.vlgmr.msra.gmra.mxu1 %v10519_v20  ;;  %v2322_v32 = vld [vmem:[#allocation20 + $0x890] sm:$0xff] }
 0x6eb   : > { %7244 = vmatpush2.bf16.msra.mxu0 %v8521_v12  ;;  %7259 = vmatpush1.bf16.msra.mxu1 %v8633_v42  ;;  %v2326_v34 = vld [vmem:[#allocation20 + $0x8b0] sm:$0xff] }
 0x6ec   : > { %7290 = vmatprep.mubr.bf16.mxu1 %v10551_v52  ;;  %7245 = vmatprep.subr.bf16.mxu0 %v8514_v62  ;;  %v2466_v35 = vld [vmem:[#allocation20 + $0xd10] sm:$0xff]  ;;  %v8594_v3 = vcombine.high %v2322_v32, %v2326_v34  ;;  %v8593_v51 = vcombine.low %v2322_v32, %v2326_v34 }
 0x6ed   : > { %7260 = vmatprep.subr.bf16.mxu1 %v8626_v26  ;;  %v2470_v36 = vld [vmem:[#allocation20 + $0xd30] sm:$0xff] }
 0x6ee   : > { %v8738_v19 = vcombine.high %v2466_v35, %v2470_v36  ;;  %v2314_v45 = vld [vmem:[#allocation20 + $0x850] sm:$0xff]  ;;  %v8737_v0 = vcombine.low %v2466_v35, %v2470_v36 }
 0x6ef   : > { %7246 = vmatpush2.bf16.msra.mxu0 %v8513_v4  ;;  %7261 = vmatpush1.bf16.msra.mxu1 %v8625_v43  ;;  %v2318_v47 = vld [vmem:[#allocation20 + $0x870] sm:$0xff] }
 0x6f0   : > { %7262 = vmatprep.subr.bf16.mxu1 %v8618_v8  ;;  %7301 = vmatprep.subr.bf16.mxu0 %v8762_v21  ;;  %v2458_v48 = vld [vmem:[#allocation20 + $0xcd0] sm:$0xff]  ;;  %v8586_v27 = vcombine.high %v2314_v45, %v2318_v47  ;;  %v8585_v60 = vcombine.low %v2314_v45, %v2318_v47 }
 0x6f1   : > { %v2462_v49 = vld [vmem:[#allocation20 + $0xcf0] sm:$0xff] }
 0x6f2   : > { %7248 = vmatmul.mubr.bf16.vlgmr.msra.gmra.mxu0 %v9540_v16  ;;  %v8730_v41 = vcombine.high %v2458_v48, %v2462_v49  ;;  %v2306_v54 = vld [vmem:[#allocation20 + $0x810] sm:$0xff]  ;;  %v8729_v61 = vcombine.low %v2458_v48, %v2462_v49 }
 0x6f3   : > { %7263 = vmatpush1.bf16.msra.mxu1 %v8617_v10  ;;  %7302 = vmatpush1.bf16.msra.mxu0 %v8761_v13  ;;  %v2310_v56 = vld [vmem:[#allocation20 + $0x830] sm:$0xff] }
 0x6f4   : > { %7333 = vmatprep.mubr.bf16.mxu0 %v10560_v1  ;;  %7264 = vmatprep.subr.bf16.mxu1 %v8610_v14  ;;  %v2450_v57 = vld [vmem:[#allocation20 + $0xc90] sm:$0xff]  ;;  %v8578_v33 = vcombine.high %v2306_v54, %v2310_v56  ;;  %v8577_v26 = vcombine.low %v2306_v54, %v2310_v56 }
 0x6f5   : > { %7303 = vmatprep.subr.bf16.mxu0 %v8754_v2  ;;  %v2454_v59 = vld [vmem:[#allocation20 + $0xcb0] sm:$0xff] }
 0x6f6   : > { %v8722_v46 = vcombine.high %v2450_v57, %v2454_v59  ;;  %v2426_v12 = vld [vmem:[#allocation20 + $0xbd0] sm:$0xff]  ;;  %v8721_v39 = vcombine.low %v2450_v57, %v2454_v59 }
 0x6f7   : > { %7265 = vmatpush1.bf16.msra.mxu1 %v8609_v24  ;;  %7304 = vmatpush1.bf16.msra.mxu0 %v8753_v25  ;;  %v2430_v42 = vld [vmem:[#allocation20 + $0xbf0] sm:$0xff] }
 0x6f8   : > { %7266 = vmatprep.subr.bf16.mxu1 %v8602_v28  ;;  %7305 = vmatprep.subr.bf16.mxu0 %v8746_v31  ;;  %v2442_v62 = vld [vmem:[#allocation20 + $0xc50] sm:$0xff]  ;;  %v8698_v23 = vcombine.high %v2426_v12, %v2430_v42  ;;  %v8697_v22 = vcombine.low %v2426_v12, %v2430_v42 }
 0x6f9   : > { %v2446_v63 = vld [vmem:[#allocation20 + $0xc70] sm:$0xff] }
 0x6fa   : > { %v8714_v5 = vcombine.high %v2442_v62, %v2446_v63  ;;  %v2418_v4 = vld [vmem:[#allocation20 + $0xb90] sm:$0xff]  ;;  %v8713_v9 = vcombine.low %v2442_v62, %v2446_v63 }
 0x6fb   : > { %7267 = vmatpush1.bf16.msra.mxu1 %v8601_v37  ;;  %7306 = vmatpush1.bf16.msra.mxu0 %v8745_v38  ;;  %v2422_v43 = vld [vmem:[#allocation20 + $0xbb0] sm:$0xff] }
 0x6fc   : > { %7268 = vmatprep.subr.bf16.mxu1 %v8594_v3  ;;  %7307 = vmatprep.subr.bf16.mxu0 %v8738_v19  ;;  %v2434_v8 = vld [vmem:[#allocation20 + $0xc10] sm:$0xff]  ;;  %v8690_v11 = vcombine.high %v2418_v4, %v2422_v43  ;;  %v8689_v2 = vcombine.low %v2418_v4, %v2422_v43 }
 0x6fd   : > { %v2438_v21 = vld [vmem:[#allocation20 + $0xc30] sm:$0xff] }
 0x6fe   : > { %v8706_v58 = vcombine.high %v2434_v8, %v2438_v21  ;;  %v2410_v10 = vld [vmem:[#allocation20 + $0xb50] sm:$0xff]  ;;  %v8705_v6 = vcombine.low %v2434_v8, %v2438_v21 }
 0x6ff   : > { %7269 = vmatpush1.bf16.msra.mxu1 %v8593_v51  ;;  %7308 = vmatpush1.bf16.msra.mxu0 %v8737_v0  ;;  %v2414_v13 = vld [vmem:[#allocation20 + $0xb70] sm:$0xff] }
 0x700   : > { %7270 = vmatprep.subr.bf16.mxu1 %v8586_v27  ;;  %7309 = vmatprep.subr.bf16.mxu0 %v8730_v41  ;;  %v2554_v14 = vld [vmem:[#allocation20 + $0xfd0] sm:$0xff]  ;;  %v8682_v44 = vcombine.high %v2410_v10, %v2414_v13  ;;  %v8681_v31 = vcombine.low %v2410_v10, %v2414_v13 }
 0x701   : > { %v2558_v15 = vld [vmem:[#allocation20 + $0xff0] sm:$0xff] }
 0x702   : > { %v8826_v18 = vcombine.high %v2554_v14, %v2558_v15  ;;  %v2402_v16 = vld [vmem:[#allocation20 + $0xb10] sm:$0xff]  ;;  %v8825_v32 = vcombine.low %v2554_v14, %v2558_v15 }
 0x703   : > { %7271 = vmatpush1.bf16.msra.mxu1 %v8585_v60  ;;  %7310 = vmatpush1.bf16.msra.mxu0 %v8729_v61  ;;  %v2406_v24 = vld [vmem:[#allocation20 + $0xb30] sm:$0xff] }
 0x704   : > { %7272 = vmatprep.subr.bf16.mxu1 %v8578_v33  ;;  %7311 = vmatprep.subr.bf16.mxu0 %v8722_v46  ;;  %v2546_v25 = vld [vmem:[#allocation20 + $0xf90] sm:$0xff]  ;;  %v8674_v34 = vcombine.high %v2402_v16, %v2406_v24  ;;  %v8673_v19 = vcombine.low %v2402_v16, %v2406_v24 }
 0x705   : > { %v2550_v28 = vld [vmem:[#allocation20 + $0xfb0] sm:$0xff] }
 0x706   : > { %v8818_v35 = vcombine.high %v2546_v25, %v2550_v28  ;;  %v2394_v36 = vld [vmem:[#allocation20 + $0xad0] sm:$0xff]  ;;  %v8817_v45 = vcombine.low %v2546_v25, %v2550_v28 }
 0x707   : > { %7273 = vmatpush1.bf16.msra.mxu1 %v8577_v26  ;;  %7312 = vmatpush1.bf16.msra.mxu0 %v8721_v39  ;;  %v2398_v37 = vld [vmem:[#allocation20 + $0xaf0] sm:$0xff] }
 0x708   : > { %7274 = vmatprep.subr.bf16.mxu1 %v8698_v23  ;;  %7313 = vmatprep.subr.bf16.mxu0 %v8714_v5  ;;  %v2538_v38 = vld [vmem:[#allocation20 + $0xf50] sm:$0xff]  ;;  %v8666_v47 = vcombine.high %v2394_v36, %v2398_v37  ;;  %v8665_v41 = vcombine.low %v2394_v36, %v2398_v37 }
 0x709   : > { %v2542_v3 = vld [vmem:[#allocation20 + $0xf70] sm:$0xff] }
 0x70a   : > { %v8810_v48 = vcombine.high %v2538_v38, %v2542_v3  ;;  %v2386_v49 = vld [vmem:[#allocation20 + $0xa90] sm:$0xff]  ;;  %v8809_v54 = vcombine.low %v2538_v38, %v2542_v3 }
 0x70b   : > { %7275 = vmatpush2.bf16.msra.mxu1 %v8697_v22  ;;  %7314 = vmatpush1.bf16.msra.mxu0 %v8713_v9  ;;  %v2390_v51 = vld [vmem:[#allocation20 + $0xab0] sm:$0xff] }
 0x70c   : > { %7276 = vmatprep.subr.bf16.mxu1 %v8690_v11  ;;  %7315 = vmatprep.subr.bf16.mxu0 %v8706_v58  ;;  %v2530_v0 = vld [vmem:[#allocation20 + $0xf10] sm:$0xff]  ;;  %v8658_v56 = vcombine.high %v2386_v49, %v2390_v51  ;;  %v8657_v46 = vcombine.low %v2386_v49, %v2390_v51 }
 0x70d   : > { %v2534_v27 = vld [vmem:[#allocation20 + $0xf30] sm:$0xff] }
 0x70e   : > { %v8802_v57 = vcombine.high %v2530_v0, %v2534_v27  ;;  %v2378_v59 = vld [vmem:[#allocation20 + $0xa50] sm:$0xff]  ;;  %v8801_v12 = vcombine.low %v2530_v0, %v2534_v27 }
 0x70f   : > { %7277 = vmatpush2.bf16.msra.mxu1 %v8689_v2  ;;  %7316 = vmatpush1.bf16.msra.mxu0 %v8705_v6  ;;  %v2382_v60 = vld [vmem:[#allocation20 + $0xa70] sm:$0xff] }
 0x710   : > { %7278 = vmatprep.subr.bf16.mxu1 %v8682_v44  ;;  %7317 = vmatprep.subr.bf16.mxu0 %v8826_v18  ;;  %v2522_v61 = vld [vmem:[#allocation20 + $0xed0] sm:$0xff]  ;;  %v8650_v42 = vcombine.high %v2378_v59, %v2382_v60  ;;  %v8649_v5 = vcombine.low %v2378_v59, %v2382_v60 }
 0x711   : > { %v2526_v33 = vld [vmem:[#allocation20 + $0xef0] sm:$0xff] }
 0x712   : > { %v8794_v62 = vcombine.high %v2522_v61, %v2526_v33  ;;  %v2370_v63 = vld [vmem:[#allocation20 + $0xa10] sm:$0xff]  ;;  %v8793_v4 = vcombine.low %v2522_v61, %v2526_v33 }
 0x713   : > { %7279 = vmatpush2.bf16.msra.mxu1 %v8681_v31  ;;  %7318 = vmatpush2.bf16.msra.mxu0 %v8825_v32  ;;  %v2374_v26 = vld [vmem:[#allocation20 + $0xa30] sm:$0xff] }
 0x714   : > { %7280 = vmatprep.subr.bf16.mxu1 %v8674_v34  ;;  %7319 = vmatprep.subr.bf16.mxu0 %v8818_v35  ;;  %v2514_v39 = vld [vmem:[#allocation20 + $0xe90] sm:$0xff]  ;;  %v8642_v43 = vcombine.high %v2370_v63, %v2374_v26  ;;  %v8641_v58 = vcombine.low %v2370_v63, %v2374_v26 }
 0x715   : > { %v2518_v23 = vld [vmem:[#allocation20 + $0xeb0] sm:$0xff] }
 0x716   : > { %v8786_v8 = vcombine.high %v2514_v39, %v2518_v23  ;;  %v2506_v21 = vld [vmem:[#allocation20 + $0xe50] sm:$0xff]  ;;  %v8785_v10 = vcombine.low %v2514_v39, %v2518_v23 }
 0x717   : > { %7281 = vmatpush2.bf16.msra.mxu1 %v8673_v19  ;;  %7320 = vmatpush2.bf16.msra.mxu0 %v8817_v45  ;;  %v2510_v22 = vld [vmem:[#allocation20 + $0xe70] sm:$0xff] }
 0x718   : > { %7282 = vmatprep.subr.bf16.mxu1 %v8666_v47  ;;  %7321 = vmatprep.subr.bf16.mxu0 %v8810_v48  ;;  %v2618_v9 = vld [vmem:[#allocation20 + $0x11d0] sm:$0xff]  ;;  %v8778_v13 = vcombine.high %v2506_v21, %v2510_v22  ;;  %v8777_v18 = vcombine.low %v2506_v21, %v2510_v22 }
 0x719   : > { %v2622_v11 = vld [vmem:[#allocation20 + $0x11f0] sm:$0xff] }
 0x71a   : > { %v8890_v14 = vcombine.high %v2618_v9, %v2622_v11  ;;  %v2498_v15 = vld [vmem:[#allocation20 + $0xe10] sm:$0xff]  ;;  %v8889_v16 = vcombine.low %v2618_v9, %v2622_v11 }
 0x71b   : > { %7283 = vmatpush2.bf16.msra.mxu1 %v8665_v41  ;;  %7322 = vmatpush2.bf16.msra.mxu0 %v8809_v54  ;;  %v2502_v2 = vld [vmem:[#allocation20 + $0xe30] sm:$0xff] }
 0x71c   : > { %7284 = vmatprep.subr.bf16.mxu1 %v8658_v56  ;;  %7323 = vmatprep.subr.bf16.mxu0 %v8802_v57  ;;  %v2610_v6 = vld [vmem:[#allocation20 + $0x1190] sm:$0xff]  ;;  %v8770_v24 = vcombine.high %v2498_v15, %v2502_v2  ;;  %v8769_v35 = vcombine.low %v2498_v15, %v2502_v2 }
 0x71d   : > { %v2614_v44 = vld [vmem:[#allocation20 + $0x11b0] sm:$0xff] }
 0x71e   : > { %v2602_v25 = vld [vmem:[#allocation20 + $0x1150] sm:$0xff]  ;;  %v8882_v28 = vcombine.high %v2610_v6, %v2614_v44  ;;  %v8881_v36 = vcombine.low %v2610_v6, %v2614_v44 }
 0x71f   : > { %7285 = vmatpush2.bf16.msra.mxu1 %v8657_v46  ;;  %7324 = vmatpush2.bf16.msra.mxu0 %v8801_v12  ;;  %v2606_v31 = vld [vmem:[#allocation20 + $0x1170] sm:$0xff] }
 0x720   : > { %7286 = vmatprep.subr.bf16.mxu1 %v8650_v42  ;;  %7325 = vmatprep.subr.bf16.mxu0 %v8794_v62  ;;  %v2746_v32 = vld [vmem:[#allocation20 + $0x15d0] sm:$0xff]  ;;  %v8874_v37 = vcombine.high %v2602_v25, %v2606_v31  ;;  %v8873_v48 = vcombine.low %v2602_v25, %v2606_v31 }
 0x721   : > { %v2750_v34 = vld [vmem:[#allocation20 + $0x15f0] sm:$0xff] }
 0x722   : > { %v9018_v38 = vcombine.high %v2746_v32, %v2750_v34  ;;  %v2594_v3 = vld [vmem:[#allocation20 + $0x1110] sm:$0xff]  ;;  %v9017_v49 = vcombine.low %v2746_v32, %v2750_v34 }
 0x723   : > { %7287 = vmatpush2.bf16.msra.mxu1 %v8649_v5  ;;  %7326 = vmatpush2.bf16.msra.mxu0 %v8793_v4  ;;  %v2598_v19 = vld [vmem:[#allocation20 + $0x1130] sm:$0xff] }
 0x724   : > { %7288 = vmatprep.subr.bf16.mxu1 %v8642_v43  ;;  %7327 = vmatprep.subr.bf16.mxu0 %v8786_v8  ;;  %v2738_v45 = vld [vmem:[#allocation20 + $0x1590] sm:$0xff]  ;;  %v8866_v51 = vcombine.high %v2594_v3, %v2598_v19  ;;  %v8865_v57 = vcombine.low %v2594_v3, %v2598_v19 }
 0x725   : > { %v2742_v47 = vld [vmem:[#allocation20 + $0x15b0] sm:$0xff] }
 0x726   : > { %v2586_v0 = vld [vmem:[#allocation20 + $0x10d0] sm:$0xff]  ;;  %v9010_v27 = vcombine.high %v2738_v45, %v2742_v47  ;;  %v9009_v59 = vcombine.low %v2738_v45, %v2742_v47 }
 0x727   : > { %7289 = vmatpush2.bf16.msra.mxu1 %v8641_v58  ;;  %7328 = vmatpush2.bf16.msra.mxu0 %v8785_v10  ;;  %v2590_v41 = vld [vmem:[#allocation20 + $0x10f0] sm:$0xff] }
 0x728   : > { %7329 = vmatprep.subr.bf16.mxu0 %v8778_v13  ;;  %7344 = vmatprep.subr.bf16.mxu1 %v8890_v14  ;;  %v2730_v54 = vld [vmem:[#allocation20 + $0x1550] sm:$0xff]  ;;  %v8858_v60 = vcombine.high %v2586_v0, %v2590_v41  ;;  %v8857_v62 = vcombine.low %v2586_v0, %v2590_v41 }
 0x729   : > { %v2734_v56 = vld [vmem:[#allocation20 + $0x1570] sm:$0xff] }
 0x72a   : > { %7291 = vmatmul.mubr.bf16.vlgmr.msra.gmra.mxu1 %v10553_v53  ;;  %v9002_v61 = vcombine.high %v2730_v54, %v2734_v56  ;;  %v2578_v33 = vld [vmem:[#allocation20 + $0x1090] sm:$0xff]  ;;  %v9001_v63 = vcombine.low %v2730_v54, %v2734_v56 }
 0x72b   : > { %7330 = vmatpush2.bf16.msra.mxu0 %v8777_v18  ;;  %7345 = vmatpush1.bf16.msra.mxu1 %v8889_v16  ;;  %v2582_v46 = vld [vmem:[#allocation20 + $0x10b0] sm:$0xff] }
 0x72c   : > { %7376 = vmatprep.mubr.bf16.mxu1 %v10570_v29  ;;  %7331 = vmatprep.subr.bf16.mxu0 %v8770_v24  ;;  %v2722_v12 = vld [vmem:[#allocation20 + $0x1510] sm:$0xff]  ;;  %v8850_v26 = vcombine.high %v2578_v33, %v2582_v46  ;;  %v8849_v8 = vcombine.low %v2578_v33, %v2582_v46 }
 0x72d   : > { %7346 = vmatprep.subr.bf16.mxu1 %v8882_v28  ;;  %v2726_v42 = vld [vmem:[#allocation20 + $0x1530] sm:$0xff] }
 0x72e   : > { %v8994_v39 = vcombine.high %v2722_v12, %v2726_v42  ;;  %v2570_v23 = vld [vmem:[#allocation20 + $0x1050] sm:$0xff]  ;;  %v8993_v21 = vcombine.low %v2722_v12, %v2726_v42 }
 0x72f   : > { %7332 = vmatpush2.bf16.msra.mxu0 %v8769_v35  ;;  %7347 = vmatpush1.bf16.msra.mxu1 %v8881_v36  ;;  %v2574_v5 = vld [vmem:[#allocation20 + $0x1070] sm:$0xff] }
 0x730   : > { %7348 = vmatprep.subr.bf16.mxu1 %v8874_v37  ;;  %7387 = vmatprep.subr.bf16.mxu0 %v9018_v38  ;;  %v2714_v4 = vld [vmem:[#allocation20 + $0x14d0] sm:$0xff]  ;;  %v8842_v22 = vcombine.high %v2570_v23, %v2574_v5  ;;  %v8841_v14 = vcombine.low %v2570_v23, %v2574_v5 }
 0x731   : > { %v2718_v43 = vld [vmem:[#allocation20 + $0x14f0] sm:$0xff] }
 0x732   : > { %7334 = vmatmul.mubr.bf16.vlgmr.msra.gmra.mxu0 %v10562_v7  ;;  %v8986_v9 = vcombine.high %v2714_v4, %v2718_v43  ;;  %v2562_v11 = vld [vmem:[#allocation20 + $0x1010] sm:$0xff]  ;;  %v8985_v15 = vcombine.low %v2714_v4, %v2718_v43 }
 0x733   : > { %7349 = vmatpush1.bf16.msra.mxu1 %v8873_v48  ;;  %7388 = vmatpush1.bf16.msra.mxu0 %v9017_v49  ;;  %v2566_v58 = vld [vmem:[#allocation20 + $0x1030] sm:$0xff] }
 0x734   : > { %7419 = vmatprep.mubr.bf16.mxu0 %v10577_v55  ;;  %7350 = vmatprep.subr.bf16.mxu1 %v8866_v51  ;;  %v2706_v10 = vld [vmem:[#allocation20 + $0x1490] sm:$0xff]  ;;  %v8834_v2 = vcombine.high %v2562_v11, %v2566_v58  ;;  %v8833_v25 = vcombine.low %v2562_v11, %v2566_v58 }
 0x735   : > { %7389 = vmatprep.subr.bf16.mxu0 %v9010_v27  ;;  %v2710_v13 = vld [vmem:[#allocation20 + $0x14b0] sm:$0xff] }
 0x736   : > { %v8978_v6 = vcombine.high %v2706_v10, %v2710_v13  ;;  %v2682_v44 = vld [vmem:[#allocation20 + $0x13d0] sm:$0xff]  ;;  %v8977_v28 = vcombine.low %v2706_v10, %v2710_v13  ;;  %v10664_v10 = vpop.f32.mrf.mxu0 }
 0x737   : > { %7351 = vmatpush1.bf16.msra.mxu1 %v8865_v57  ;;  %7390 = vmatpush1.bf16.msra.mxu0 %v9009_v59  ;;  %v2686_v18 = vld [vmem:[#allocation20 + $0x13f0] sm:$0xff] }
 0x738   : > { %7352 = vmatprep.subr.bf16.mxu1 %v8858_v60  ;;  %7391 = vmatprep.subr.bf16.mxu0 %v9002_v61  ;;  %v2698_v16 = vld [vmem:[#allocation20 + $0x1450] sm:$0xff]  ;;  %v8954_v31 = vcombine.high %v2682_v44, %v2686_v18  ;;  %v8953_v38 = vcombine.low %v2682_v44, %v2686_v18  ;;  %v10658_v61 = vpop.f32.mrf.mxu1 }
 0x739   : > { %v2702_v24 = vld [vmem:[#allocation20 + $0x1470] sm:$0xff] }
 0x73a   : > { %v8970_v32 = vcombine.high %v2698_v16, %v2702_v24  ;;  %v2674_v34 = vld [vmem:[#allocation20 + $0x1390] sm:$0xff]  ;;  %v8969_v3 = vcombine.low %v2698_v16, %v2702_v24  ;;  %v10660_v23 = vpop.f32.mrf.mxu1 }
 0x73b   : > { %7353 = vmatpush1.bf16.msra.mxu1 %v8857_v62  ;;  %7392 = vmatpush1.bf16.msra.mxu0 %v9001_v63  ;;  %v2678_v35 = vld [vmem:[#allocation20 + $0x13b0] sm:$0xff] }
 0x73c   : > { %7354 = vmatprep.subr.bf16.mxu1 %v8850_v26  ;;  %7393 = vmatprep.subr.bf16.mxu0 %v8994_v39  ;;  %v2690_v36 = vld [vmem:[#allocation20 + $0x1410] sm:$0xff]  ;;  %v8946_v19 = vcombine.high %v2674_v34, %v2678_v35  ;;  %v8945_v0 = vcombine.low %v2674_v34, %v2678_v35  ;;  %v10662_v58 = vpop.f32.mrf.mxu1 }
 0x73d   : > { %v2694_v37 = vld [vmem:[#allocation20 + $0x1430] sm:$0xff] }
 0x73e   : > { %v8962_v45 = vcombine.high %v2690_v36, %v2694_v37  ;;  %v2666_v47 = vld [vmem:[#allocation20 + $0x1350] sm:$0xff]  ;;  %v8961_v27 = vcombine.low %v2690_v36, %v2694_v37  ;;  %v10666_v24 = vpop.f32.mrf.mxu1 }
 0x73f   : > { %7355 = vmatpush1.bf16.msra.mxu1 %v8849_v8  ;;  %7394 = vmatpush1.bf16.msra.mxu0 %v8993_v21  ;;  %v2670_v48 = vld [vmem:[#allocation20 + $0x1370] sm:$0xff] }
 0x740   : > { %7356 = vmatprep.subr.bf16.mxu1 %v8842_v22  ;;  %7395 = vmatprep.subr.bf16.mxu0 %v8986_v9  ;;  %v2810_v49 = vld [vmem:[#allocation20 + $0x17d0] sm:$0xff]  ;;  %v8938_v41 = vcombine.high %v2666_v47, %v2670_v48  ;;  %v8937_v33 = vcombine.low %v2666_v47, %v2670_v48 }
 0x741   : > { %v2814_v51 = vld [vmem:[#allocation20 + $0x17f0] sm:$0xff] }
 0x742   : > { %v9082_v54 = vcombine.high %v2810_v49, %v2814_v51  ;;  %v2658_v56 = vld [vmem:[#allocation20 + $0x1310] sm:$0xff]  ;;  %v9081_v46 = vcombine.low %v2810_v49, %v2814_v51 }
 0x743   : > { %7357 = vmatpush1.bf16.msra.mxu1 %v8841_v14  ;;  %7396 = vmatpush1.bf16.msra.mxu0 %v8985_v15  ;;  %v2662_v57 = vld [vmem:[#allocation20 + $0x1330] sm:$0xff] }
 0x744   : > { %7358 = vmatprep.subr.bf16.mxu1 %v8834_v2  ;;  %7397 = vmatprep.subr.bf16.mxu0 %v8978_v6  ;;  %v2802_v59 = vld [vmem:[#allocation20 + $0x1790] sm:$0xff]  ;;  %v8930_v12 = vcombine.high %v2658_v56, %v2662_v57  ;;  %v8929_v5 = vcombine.low %v2658_v56, %v2662_v57 }
 0x745   : > { %v2806_v60 = vld [vmem:[#allocation20 + $0x17b0] sm:$0xff] }
 0x746   : > { %v9074_v42 = vcombine.high %v2802_v59, %v2806_v60  ;;  %v2650_v62 = vld [vmem:[#allocation20 + $0x12d0] sm:$0xff]  ;;  %v9073_v4 = vcombine.low %v2802_v59, %v2806_v60 }
 0x747   : > { %7359 = vmatpush1.bf16.msra.mxu1 %v8833_v25  ;;  %7398 = vmatpush1.bf16.msra.mxu0 %v8977_v28  ;;  %v2654_v63 = vld [vmem:[#allocation20 + $0x12f0] sm:$0xff]  ;;  %v10668_v25 = vpop.f32.mrf.mxu0 }
 0x748   : > { %7360 = vmatprep.subr.bf16.mxu1 %v8954_v31  ;;  %7399 = vmatprep.subr.bf16.mxu0 %v8970_v32  ;;  %v2794_v26 = vld [vmem:[#allocation20 + $0x1750] sm:$0xff]  ;;  %v8922_v43 = vcombine.high %v2650_v62, %v2654_v63  ;;  %v8921_v13 = vcombine.low %v2650_v62, %v2654_v63  ;;  %v10670_v32 = vpop.f32.mrf.mxu1  ;;  %v2099_v63 = vld [vmem:[#allocation20 + $0x198] sm:$0xff] }
 0x749   : > { %v2798_v39 = vld [vmem:[#allocation20 + $0x1770] sm:$0xff] }
 0x74a   : > { %v9066_v8 = vcombine.high %v2794_v26, %v2798_v39  ;;  %v2642_v21 = vld [vmem:[#allocation20 + $0x1290] sm:$0xff]  ;;  %v9065_v14 = vcombine.low %v2794_v26, %v2798_v39  ;;  %v10674_v48 = vpop.f32.mrf.mxu1  ;;  %v2103_v26 = vld [vmem:[#allocation20 + $0x1b8] sm:$0xff] }
 0x74b   : > { %7361 = vmatpush2.bf16.msra.mxu1 %v8953_v38  ;;  %7400 = vmatpush1.bf16.msra.mxu0 %v8969_v3  ;;  %v2646_v22 = vld [vmem:[#allocation20 + $0x12b0] sm:$0xff] }
 0x74c   : > { %7362 = vmatprep.subr.bf16.mxu1 %v8946_v19  ;;  %7401 = vmatprep.subr.bf16.mxu0 %v8962_v45  ;;  %v2786_v9 = vld [vmem:[#allocation20 + $0x1710] sm:$0xff]  ;;  %v8914_v15 = vcombine.high %v2642_v21, %v2646_v22  ;;  %v8913_v28 = vcombine.low %v2642_v21, %v2646_v22  ;;  %v10672_v19 = vpop.f32.mrf.mxu0  ;;  %v10676_v60 = vpop.f32.mrf.mxu1  ;;  %v2091_v21 = vld [vmem:[#allocation20 + $0x158] sm:$0xff]  ;;  %v8372_v22 = vcombine.high %v2099_v63, %v2103_v26 }
 0x74d   : > { %v2790_v11 = vld [vmem:[#allocation20 + $0x1730] sm:$0xff] }
 0x74e   : > { %v9058_v2 = vcombine.high %v2786_v9, %v2790_v11  ;;  %v2634_v6 = vld [vmem:[#allocation20 + $0x1250] sm:$0xff]  ;;  %v9057_v31 = vcombine.low %v2786_v9, %v2790_v11  ;;  %v6997_v56 = vpop.f32.mrf.mxu0  ;;  %v2095_v9 = vld [vmem:[#allocation20 + $0x178] sm:$0xff] }
 0x74f   : > { %7363 = vmatpush2.bf16.msra.mxu1 %v8945_v0  ;;  %7402 = vmatpush1.bf16.msra.mxu0 %v8961_v27  ;;  %v2638_v44 = vld [vmem:[#allocation20 + $0x1270] sm:$0xff]  ;;  %v2235_v11 = vld [vmem:[#allocation20 + $0x5d8] sm:$0xff] }
 0x750   : > { %7364 = vmatprep.subr.bf16.mxu1 %v8938_v41  ;;  %7403 = vmatprep.subr.bf16.mxu0 %v9082_v54  ;;  %v2778_v18 = vld [vmem:[#allocation20 + $0x16d0] sm:$0xff]  ;;  %v8906_v34 = vcombine.high %v2634_v6, %v2638_v44  ;;  %v8905_v45 = vcombine.low %v2634_v6, %v2638_v44  ;;  %v2107_v41 = vld [vmem:[#allocation20 + $0x1d8] sm:$0xff]  ;;  %v8371_v44 = vcombine.low %v2099_v63, %v2103_v26 }
 0x751   : > { %v2782_v16 = vld [vmem:[#allocation20 + $0x16f0] sm:$0xff]  ;;  %v2111_v54 = vld [vmem:[#allocation20 + $0x1f8] sm:$0xff] }
 0x752   : > { %v9050_v35 = vcombine.high %v2778_v18, %v2782_v16  ;;  %v2626_v36 = vld [vmem:[#allocation20 + $0x1210] sm:$0xff]  ;;  %v9049_v47 = vcombine.low %v2778_v18, %v2782_v16 }
 0x753   : > { %7365 = vmatpush2.bf16.msra.mxu1 %v8937_v33  ;;  %7404 = vmatpush2.bf16.msra.mxu0 %v9081_v46  ;;  %v2630_v37 = vld [vmem:[#allocation20 + $0x1230] sm:$0xff]  ;;  %v7077_v33 = vpop.f32.mrf.mxu0 }
 0x754   : > { %7366 = vmatprep.subr.bf16.mxu1 %v8930_v12  ;;  %7405 = vmatprep.subr.bf16.mxu0 %v9074_v42  ;;  %v2770_v38 = vld [vmem:[#allocation20 + $0x1690] sm:$0xff]  ;;  %v8898_v49 = vcombine.high %v2626_v36, %v2630_v37  ;;  %v8897_v57 = vcombine.low %v2626_v36, %v2630_v37  ;;  %v8380_v12 = vcombine.high %v2107_v41, %v2111_v54  ;;  %v10692_v37 = vld [vmem:[#allocation20 + $0x5b8] sm:$0xff] }
 0x755   : > { %v2774_v3 = vld [vmem:[#allocation20 + $0x16b0] sm:$0xff] }
 0x756   : > { %v9042_v51 = vcombine.high %v2770_v38, %v2774_v3  ;;  %v2762_v0 = vld [vmem:[#allocation20 + $0x1650] sm:$0xff]  ;;  %v9041_v59 = vcombine.low %v2770_v38, %v2774_v3  ;;  %v9541_v38 = vld [vmem:[#allocation22] sm:$0xff]  ;;  %v8363_v3 = vcombine.low %v2091_v21, %v2095_v9 }
 0x757   : > { %7367 = vmatpush2.bf16.msra.mxu1 %v8929_v5  ;;  %7406 = vmatpush2.bf16.msra.mxu0 %v9073_v4  ;;  %v2766_v27 = vld [vmem:[#allocation20 + $0x1670] sm:$0xff]  ;;  %v8379_v5 = vcombine.low %v2107_v41, %v2111_v54  ;;  %v7040_v4 = vpop.f32.mrf.mxu1  ;;  %v10705_v54 = vld [vmem:[#allocation20 + $0xd8] sm:$0xff] }
 0x758   : > { %7368 = vmatprep.subr.bf16.mxu1 %v8922_v43  ;;  %7407 = vmatprep.subr.bf16.mxu0 %v9066_v8  ;;  %v9034_v46 = vcombine.high %v2762_v0, %v2766_v27  ;;  %v2754_v42 = vld [vmem:[#allocation20 + $0x1610] sm:$0xff]  ;;  %v9033_v39 = vcombine.low %v2762_v0, %v2766_v27  ;;  %v7079_v43 = vpop.f32.mrf.mxu0 }
 0x759   : > { %v2758_v62 = vld [vmem:[#allocation20 + $0x1630] sm:$0xff] }
 0x75a   : > { %v9026_v8 = vcombine.high %v2754_v42, %v2758_v62  ;;  %v9025_v6 = vcombine.low %v2754_v42, %v2758_v62  ;;  %v7081_v18 = vpop.f32.mrf.mxu0 }
 0x75b   : > { %7369 = vmatpush2.bf16.msra.mxu1 %v8921_v13  ;;  %7408 = vmatpush2.bf16.msra.mxu0 %v9065_v14  ;;  %v2239_v13 = vld [vmem:[#allocation20 + $0x5f8] sm:$0xff] }
 0x75c   : > { %7370 = vmatprep.subr.bf16.mxu1 %v8914_v15  ;;  %7409 = vmatprep.subr.bf16.mxu0 %v9058_v2  ;;  %v7700_v15 = vsub.s32 2, %v10502_v40  ;;  %v6992_v2 = vadd.f32 %v10664_v10, %v10658_v61  ;;  %v10688_v61 = vld [vmem:[#allocation20 + $0x138] sm:$0xff]  ;;  %v7083_v0 = vpop.f32.mrf.mxu0 }
 0x75d   : > { %v10690_v10 = vld [vmem:[#allocation20 + $0x598] sm:$0xff] }
 0x75e   : > { %v7035_v36 = vadd.f32 %v10670_v32, %v6992_v2  ;;  %v8500_v41 = vcombine.high %v10690_v10, %v10692_v37  ;;  %v8499_v63 = vcombine.low %v10690_v10, %v10692_v37  ;;  %v2211_v2 = vld [vmem:[#allocation20 + $0x518] sm:$0xff] }
 0x75f   : > { %7371 = vmatpush2.bf16.msra.mxu1 %v8913_v28  ;;  %7410 = vmatpush2.bf16.msra.mxu0 %v9057_v31  ;;  %v8364_v28 = vcombine.high %v2091_v21, %v2095_v9  ;;  %v8508_v31 = vcombine.high %v2235_v11, %v2239_v13 }
 0x760   : > { %7372 = vmatprep.subr.bf16.mxu1 %v8906_v34  ;;  %7411 = vmatprep.subr.bf16.mxu0 %v9050_v35  ;;  %v10683_v34 = vld [vmem:[#allocation20 + $0x118] sm:$0xff]  ;;  %v6994_v35 = vadd.f32 %v10668_v25, %v10660_v23  ;;  %v7078_v25 = vadd.f32 %v7077_v33, %v7035_v36 }
 0x761   : > { %v8356_v27 = vcombine.high %v10683_v34, %v10688_v61  ;;  %v2079_v33 = vld [vmem:[#allocation20 + $0xf8] sm:$0xff]  ;;  %v8355_v62 = vcombine.low %v10683_v34, %v10688_v61 }
 0x762   : > { %v7037_v23 = vadd.f32 %v10674_v48, %v6994_v35 }
 0x763   : > { %7373 = vmatpush2.bf16.msra.mxu1 %v8905_v45  ;;  %7412 = vmatpush2.bf16.msra.mxu0 %v9049_v47  ;;  %v8507_v45 = vcombine.low %v2235_v11, %v2239_v13  ;;  %v7704_v47 = vsub.s32 3, %v10502_v40 }
 0x764   : > { %7374 = vmatprep.subr.bf16.mxu1 %v8898_v49  ;;  %7413 = vmatprep.subr.bf16.mxu0 %v9042_v51  ;;  %v6996_v49 = vadd.f32 %v10672_v19, %v10662_v58  ;;  %v6998_v51 = vadd.f32 %v6997_v56, %v10666_v24  ;;  %v7080_v19 = vadd.f32 %v7079_v43, %v7037_v23  ;;  %v2223_v24 = vld [vmem:[#allocation20 + $0x578] sm:$0xff] }
 0x765   : > { %v7705_v42 = vrot.slane %v9541_v38, %v7704_v47  ;;  %v2063_v23 = vld [vmem:[#allocation20 + $0x78] sm:$0xff] }
 0x766   : > { %v7039_v58 = vadd.f32 %v10676_v60, %v6996_v49  ;;  %v7041_v56 = vadd.f32 %v7040_v4, %v6998_v51  ;;  %v8348_v4 = vcombine.high %v10705_v54, %v2079_v33 }
 0x767   : > { %7375 = vmatpush2.bf16.msra.mxu1 %v8897_v57  ;;  %7414 = vmatpush2.bf16.msra.mxu0 %v9041_v59  ;;  %v9542_v57 = vld [vmem:[#allocation23] sm:$0xff] }
 0x768   : > { %7415 = vmatprep.subr.bf16.mxu0 %v9034_v46  ;;  %7430 = vmatprep.subr.bf16.mxu1 %v8380_v12  ;;  %v7759_v59 = vrot.slane %v9542_v57, %v7700_v15  ;;  %v2219_v46 = vld [vmem:[#allocation20 + $0x558] sm:$0xff]  ;;  %v7082_v26 = vadd.f32 %v7081_v18, %v7039_v58  ;;  %v7084_v43 = vadd.f32 %v7083_v0, %v7041_v56 }
 0x769   : > { %v8492_v21 = vcombine.high %v2219_v46, %v2223_v24 }
 0x76a   : > { %v7120_v14 = vpop.f32.mrf.mxu1  ;;  %7377 = vmatmul.mubr.bf16.vlgmr.msra.gmra.mxu1 %v10582_v30 }
 0x76b   : > { %7416 = vmatpush2.bf16.msra.mxu0 %v9033_v39  ;;  %7431 = vmatpush1.bf16.msra.mxu1 %v8379_v5  ;;  %v7121_v48 = vadd.f32 %v7120_v14, %v7078_v25  ;;  %v7763_v14 = vrot.slane %v9542_v57, %v7704_v47  ;;  %v2203_v25 = vld [vmem:[#allocation20 + $0x4d8] sm:$0xff] }
 0x76c   : > { %7462 = vmatprep.mubr.bf16.mxu1 %v10514_v17  ;;  %v7122_v16 = vpop.f32.mrf.mxu1  ;;  %7417 = vmatprep.subr.bf16.mxu0 %v9026_v8  ;;  %v10694_v17 = vrot.slane %v9541_v38, %v7700_v15  ;;  %v2071_v15 = vld [vmem:[#allocation20 + $0xb8] sm:$0xff] }
 0x76d   : > { %7432 = vmatprep.subr.bf16.mxu1 %v8372_v22  ;;  %v7123_v60 = vadd.f32 %v7122_v16, %v7080_v19  ;;  %v2067_v22 = vld [vmem:[#allocation20 + $0x98] sm:$0xff] }
 0x76e   : > { %v7124_v32 = vpop.f32.mrf.mxu1  ;;  %v8340_v10 = vcombine.high %v2067_v22, %v2071_v15  ;;  %v2059_v38 = vld [vmem:[#allocation20 + $0x58] sm:$0xff]  ;;  %v8339_v51 = vcombine.low %v2067_v22, %v2071_v15 }
 0x76f   : > { %7418 = vmatpush2.bf16.msra.mxu0 %v9025_v6  ;;  %7433 = vmatpush1.bf16.msra.mxu1 %v8371_v44  ;;  %v7125_v9 = vadd.f32 %v7124_v32, %v7082_v26  ;;  %v2215_v6 = vld [vmem:[#allocation20 + $0x538] sm:$0xff]  ;;  %v8332_v58 = vcombine.high %v2059_v38, %v2063_v23 }
 0x770   : > { %7434 = vmatprep.subr.bf16.mxu1 %v8364_v28  ;;  %7473 = vmatprep.subr.bf16.mxu0 %v8508_v31  ;;  %v7126_v39 = vpop.f32.mrf.mxu1  ;;  %v9543_v44 = vld [vmem:[%s10430_s29 + $0x4] ss:$8 sps:$4 sm:$0xff]   ;;  %v8347_v28 = vcombine.low %v10705_v54, %v2079_v33  ;;  %v8491_v31 = vcombine.low %v2219_v46, %v2223_v24  ;;  %v8484_v37 = vcombine.high %v2211_v2, %v2215_v6 }
 0x771   : > { %v7127_v18 = vadd.f32 %v7126_v39, %v7084_v43  ;;  %v2207_v32 = vld [vmem:[#allocation20 + $0x4f8] sm:$0xff]  ;;  %v8483_v0 = vcombine.low %v2211_v2, %v2215_v6 }
 0x772   : > { %v7163_v12 = vpop.f32.mrf.mxu0  ;;  %7420 = vmatmul.mubr.bf16.vlgmr.msra.gmra.mxu0 %v10588_v50  ;;  %v8476_v19 = vcombine.high %v2203_v25, %v2207_v32  ;;  %v2055_v33 = vld [vmem:[#allocation20 + $0x38] sm:$0xff] }
 0x773   : > { %v7164_v5 = vadd.f32 %v7163_v12, %v7121_v48  ;;  %7435 = vmatpush1.bf16.msra.mxu1 %v8363_v3  ;;  %7474 = vmatpush1.bf16.msra.mxu0 %v8507_v45  ;;  %v2051_v48 = vld [vmem:[#allocation20 + $0x18] sm:$0xff]  ;;  %v8331_v12 = vcombine.low %v2059_v38, %v2063_v23 }
 0x774   : > { %v7165_v8 = vpop.f32.mrf.mxu0  ;;  %7436 = vmatprep.subr.bf16.mxu1 %v8356_v27  ;;  %7475 = vmatprep.subr.bf16.mxu0 %v8500_v41  ;;  %v2195_v46 = vld [vmem:[#allocation20 + $0x498] sm:$0xff] }
 0x775   : > { %v7732_v11 = vmul.f32 %v10694_v17, %v7164_v5  ;;  %v7166_v13 = vadd.f32 %v7165_v8, %v7123_v60  ;;  %7505 = vmatprep.mubr.bf16.mxu0 %v9543_v44  ;;  %v2199_v24 = vld [vmem:[#allocation20 + $0x4b8] sm:$0xff]  ;;  %v8323_v5 = vcombine.low %v2051_v48, %v2055_v33 }
 0x776   : > { %v7167_v16 = vpop.f32.mrf.mxu0  ;;  %v2175_v26 = vld [vmem:[#allocation20 + $0x3f8] sm:$0xff]  ;;  %v8467_v43 = vcombine.low %v2195_v46, %v2199_v24 }
 0x777   : > { %v7790_v34 = vadd.f32 %v7759_v59, %v7732_v11  ;;  %v7733_v35 = vmul.f32 %v7705_v42, %v7166_v13  ;;  %v7168_v36 = vadd.f32 %v7167_v16, %v7125_v9  ;;  %7437 = vmatpush1.bf16.msra.mxu1 %v8355_v62  ;;  %7476 = vmatpush1.bf16.msra.mxu0 %v8499_v63  ;;  %v2171_v63 = vld [vmem:[#allocation20 + $0x3d8] sm:$0xff] }
 0x778   : > { %v7169_v61 = vpop.f32.mrf.mxu0  ;;  %7438 = vmatprep.subr.bf16.mxu1 %v8348_v4  ;;  %7477 = vmatprep.subr.bf16.mxu0 %v8492_v21  ;;  %v8468_v62 = vcombine.high %v2195_v46, %v2199_v24  ;;  %v2187_v60 = vld [vmem:[#allocation20 + $0x458] sm:$0xff]  ;;  %v8444_v8 = vcombine.high %v2171_v63, %v2175_v26  ;;  %v8443_v13 = vcombine.low %v2171_v63, %v2175_v26 }
 0x779   : > { %v9087_v3 = vmul.f32 -1.442695, %v7790_v34  ;;  %v7791_v45 = vadd.f32 %v7763_v14, %v7733_v35  ;;  %v7740_v47 = vmul.f32 %v10694_v17, %v7168_v36  ;;  %v7170_v49 = vadd.f32 %v7169_v61, %v7127_v18  ;;  %v2191_v39 = vld [vmem:[#allocation20 + $0x478] sm:$0xff] }
 0x77a   : > { %v8460_v4 = vcombine.high %v2187_v60, %v2191_v39  ;;  %v2163_v21 = vld [vmem:[#allocation20 + $0x398] sm:$0xff] }
 0x77b   : > { %9487 = vpow2.f32 %v9087_v3  ;;  %v9088_v27 = vmul.f32 -1.442695, %v7791_v45  ;;  %v7798_v41 = vadd.f32 %v7759_v59, %v7740_v47  ;;  %v7741_v54 = vmul.f32 %v7705_v42, %v7170_v49  ;;  %7439 = vmatpush1.bf16.msra.mxu1 %v8347_v28  ;;  %7478 = vmatpush1.bf16.msra.mxu0 %v8491_v31  ;;  %v2167_v22 = vld [vmem:[#allocation20 + $0x3b8] sm:$0xff] }
 0x77c   : > { %7440 = vmatprep.subr.bf16.mxu1 %v8340_v10  ;;  %7479 = vmatprep.subr.bf16.mxu0 %v8484_v37  ;;  %v8475_v59 = vcombine.low %v2203_v25, %v2207_v32  ;;  %v8324_v42 = vcombine.high %v2051_v48, %v2055_v33  ;;  %v2179_v9 = vld [vmem:[#allocation20 + $0x418] sm:$0xff]  ;;  %v8436_v2 = vcombine.high %v2163_v21, %v2167_v22 }
 0x77d   : > { %9489 = vpow2.f32 %v9088_v27  ;;  %v9095_v57 = vmul.f32 -1.442695, %v7798_v41  ;;  %v7799_v17 = vadd.f32 %v7763_v14, %v7741_v54  ;;  %v2183_v11 = vld [vmem:[#allocation20 + $0x438] sm:$0xff]  ;;  %v8459_v14 = vcombine.low %v2187_v60, %v2191_v39 }
 0x77e   : > { %v8452_v6 = vcombine.high %v2179_v9, %v2183_v11  ;;  %v2155_v44 = vld [vmem:[#allocation20 + $0x358] sm:$0xff]  ;;  %v8435_v36 = vcombine.low %v2163_v21, %v2167_v22  ;;  %v8451_v61 = vcombine.low %v2179_v9, %v2183_v11 }
 0x77f   : > { %9491 = vpow2.f32 %v9095_v57  ;;  %v9096_v56 = vmul.f32 -1.442695, %v7799_v17  ;;  %7441 = vmatpush1.bf16.msra.mxu1 %v8339_v51  ;;  %7480 = vmatpush1.bf16.msra.mxu0 %v8483_v0  ;;  %v2159_v16 = vld [vmem:[#allocation20 + $0x378] sm:$0xff] }
 0x780   : > { %7442 = vmatprep.subr.bf16.mxu1 %v8332_v58  ;;  %7481 = vmatprep.subr.bf16.mxu0 %v8476_v19  ;;  %v2299_v28 = vld [vmem:[#allocation20 + $0x7d8] sm:$0xff]  ;;  %v8428_v37 = vcombine.high %v2155_v44, %v2159_v16  ;;  %v8427_v51 = vcombine.low %v2155_v44, %v2159_v16 }
 0x781   : > { %9493 = vpow2.f32 %v9096_v56  ;;  %v2303_v31 = vld [vmem:[#allocation20 + $0x7f8] sm:$0xff] }
 0x782   : > { %v8572_v38 = vcombine.high %v2299_v28, %v2303_v31  ;;  %v2147_v3 = vld [vmem:[#allocation20 + $0x318] sm:$0xff]  ;;  %v8571_v0 = vcombine.low %v2299_v28, %v2303_v31 }
 0x783   : > { %7443 = vmatpush1.bf16.msra.mxu1 %v8331_v12  ;;  %7482 = vmatpush1.bf16.msra.mxu0 %v8475_v59  ;;  %v2151_v47 = vld [vmem:[#allocation20 + $0x338] sm:$0xff] }
 0x784   : > { %7444 = vmatprep.subr.bf16.mxu1 %v8324_v42  ;;  %7483 = vmatprep.subr.bf16.mxu0 %v8468_v62  ;;  %v2291_v49 = vld [vmem:[#allocation20 + $0x798] sm:$0xff]  ;;  %v8420_v27 = vcombine.high %v2147_v3, %v2151_v47  ;;  %v8419_v57 = vcombine.low %v2147_v3, %v2151_v47 }
 0x785   : > { %v2295_v23 = vld [vmem:[#allocation20 + $0x7b8] sm:$0xff] }
 0x786   : > { %v8564_v41 = vcombine.high %v2291_v49, %v2295_v23  ;;  %v2139_v54 = vld [vmem:[#allocation20 + $0x2d8] sm:$0xff]  ;;  %v8563_v17 = vcombine.low %v2291_v49, %v2295_v23 }
 0x787   : > { %7445 = vmatpush1.bf16.msra.mxu1 %v8323_v5  ;;  %7484 = vmatpush1.bf16.msra.mxu0 %v8467_v43  ;;  %v2143_v58 = vld [vmem:[#allocation20 + $0x2f8] sm:$0xff] }
 0x788   : > { %v9488_v15 = vpop.eup %9487  ;;  %7446 = vmatprep.subr.bf16.mxu1 %v8444_v8  ;;  %7485 = vmatprep.subr.bf16.mxu0 %v8460_v4  ;;  %v2283_v19 = vld [vmem:[#allocation20 + $0x758] sm:$0xff]  ;;  %v8412_v33 = vcombine.high %v2139_v54, %v2143_v58  ;;  %v8411_v42 = vcombine.low %v2139_v54, %v2143_v58 }
 0x789   : > { %v7854_v18 = vadd.f32 1.0, %v9488_v15  ;;  %v2287_v48 = vld [vmem:[#allocation20 + $0x778] sm:$0xff] }
 0x78a   : > { %v9490_v34 = vpop.eup %9489  ;;  %v8556_v46 = vcombine.high %v2283_v19, %v2287_v48  ;;  %v2131_v24 = vld [vmem:[#allocation20 + $0x298] sm:$0xff]  ;;  %v8555_v62 = vcombine.low %v2283_v19, %v2287_v48 }
 0x78b   : > { %9495 = vrcp.f32 %v7854_v18  ;;  %v7855_v35 = vadd.f32 1.0, %v9490_v34  ;;  %7447 = vmatpush2.bf16.msra.mxu1 %v8443_v13  ;;  %7486 = vmatpush1.bf16.msra.mxu0 %v8459_v14  ;;  %v2135_v56 = vld [vmem:[#allocation20 + $0x2b8] sm:$0xff] }
 0x78c   : > { %v9492_v10 = vpop.eup %9491  ;;  %7448 = vmatprep.subr.bf16.mxu1 %v8436_v2  ;;  %7487 = vmatprep.subr.bf16.mxu0 %v8452_v6  ;;  %v2275_v12 = vld [vmem:[#allocation20 + $0x718] sm:$0xff]  ;;  %v8404_v26 = vcombine.high %v2131_v24, %v2135_v56  ;;  %v8403_v21 = vcombine.low %v2131_v24, %v2135_v56 }
 0x78d   : > { %9497 = vrcp.f32 %v7855_v35  ;;  %v7862_v45 = vadd.f32 1.0, %v9492_v10  ;;  %v2279_v59 = vld [vmem:[#allocation20 + $0x738] sm:$0xff] }
 0x78e   : > { %v9494_v25 = vpop.eup %9493  ;;  %v8548_v60 = vcombine.high %v2275_v12, %v2279_v59  ;;  %v2123_v39 = vld [vmem:[#allocation20 + $0x258] sm:$0xff]  ;;  %v8547_v22 = vcombine.low %v2275_v12, %v2279_v59 }
 0x78f   : > { %9499 = vrcp.f32 %v7862_v45  ;;  %v7863_v32 = vadd.f32 1.0, %v9494_v25  ;;  %7449 = vmatpush2.bf16.msra.mxu1 %v8435_v36  ;;  %7488 = vmatpush1.bf16.msra.mxu0 %v8451_v61  ;;  %v2127_v5 = vld [vmem:[#allocation20 + $0x278] sm:$0xff] }
 0x790   : > { %7450 = vmatprep.subr.bf16.mxu1 %v8428_v37  ;;  %7489 = vmatprep.subr.bf16.mxu0 %v8572_v38  ;;  %v2267_v43 = vld [vmem:[#allocation20 + $0x6d8] sm:$0xff]  ;;  %v8396_v11 = vcombine.high %v2123_v39, %v2127_v5  ;;  %v8395_v18 = vcombine.low %v2123_v39, %v2127_v5 }
 0x791   : > { %9501 = vrcp.f32 %v7863_v32  ;;  %v2271_v8 = vld [vmem:[#allocation20 + $0x6f8] sm:$0xff] }
 0x792   : > { %v8540_v13 = vcombine.high %v2267_v43, %v2271_v8  ;;  %v2115_v14 = vld [vmem:[#allocation20 + $0x218] sm:$0xff]  ;;  %v8539_v16 = vcombine.low %v2267_v43, %v2271_v8 }
 0x793   : > { %7451 = vmatpush2.bf16.msra.mxu1 %v8427_v51  ;;  %7490 = vmatpush2.bf16.msra.mxu0 %v8571_v0  ;;  %v2119_v15 = vld [vmem:[#allocation20 + $0x238] sm:$0xff] }
 0x794   : > { %7452 = vmatprep.subr.bf16.mxu1 %v8420_v27  ;;  %7491 = vmatprep.subr.bf16.mxu0 %v8564_v41  ;;  %v2259_v2 = vld [vmem:[#allocation20 + $0x698] sm:$0xff]  ;;  %v8388_v28 = vcombine.high %v2115_v14, %v2119_v15  ;;  %v8387_v10 = vcombine.low %v2115_v14, %v2119_v15 }
 0x795   : > { %v2263_v6 = vld [vmem:[#allocation20 + $0x6b8] sm:$0xff] }
 0x796   : > { %v8532_v31 = vcombine.high %v2259_v2, %v2263_v6  ;;  %v2251_v34 = vld [vmem:[#allocation20 + $0x658] sm:$0xff]  ;;  %v8531_v37 = vcombine.low %v2259_v2, %v2263_v6 }
 0x797   : > { %7453 = vmatpush2.bf16.msra.mxu1 %v8419_v57  ;;  %7492 = vmatpush2.bf16.msra.mxu0 %v8563_v17  ;;  %v2255_v35 = vld [vmem:[#allocation20 + $0x678] sm:$0xff] }
 0x798   : > { %v9496_v63 = vpop.eup %9495  ;;  %7454 = vmatprep.subr.bf16.mxu1 %v8412_v33  ;;  %7493 = vmatprep.subr.bf16.mxu0 %v8556_v46  ;;  %v2363_v36 = vld [vmem:[#allocation20 + $0x9d8] sm:$0xff]  ;;  %v8524_v38 = vcombine.high %v2251_v34, %v2255_v35  ;;  %v8523_v25 = vcombine.low %v2251_v34, %v2255_v35 }
 0x799   : > { %7902 = vst [vmem:[%s10644_s28 + $0x10] sm:$0xff] %v9496_v63  ;;  %v2367_v61 = vld [vmem:[#allocation20 + $0x9f8] sm:$0xff] }
 0x79a   : > { %v9498_v4 = vpop.eup %9497  ;;  %v8636_v3 = vcombine.high %v2363_v36, %v2367_v61  ;;  %v2243_v45 = vld [vmem:[#allocation20 + $0x618] sm:$0xff]  ;;  %v8635_v32 = vcombine.low %v2363_v36, %v2367_v61 }
 0x79b   : > { %7903 = vst [vmem:[%s10644_s28 + $0x18] sm:$0xff] %v9498_v4  ;;  %7455 = vmatpush2.bf16.msra.mxu1 %v8411_v42  ;;  %7494 = vmatpush2.bf16.msra.mxu0 %v8555_v62  ;;  %v2247_v47 = vld [vmem:[#allocation20 + $0x638] sm:$0xff] }
 0x79c   : > { %v9500_v9 = vpop.eup %9499  ;;  %7456 = vmatprep.subr.bf16.mxu1 %v8404_v26  ;;  %7495 = vmatprep.subr.bf16.mxu0 %v8548_v60  ;;  %v2355_v49 = vld [vmem:[#allocation20 + $0x998] sm:$0xff]  ;;  %v8516_v51 = vcombine.high %v2243_v45, %v2247_v47  ;;  %v8515_v19 = vcombine.low %v2243_v45, %v2247_v47 }
 0x79d   : > { %7910 = vst [vmem:[%s10644_s28 + $0x50] sm:$0xff] %v9500_v9  ;;  %v2359_v23 = vld [vmem:[#allocation20 + $0x9b8] sm:$0xff] }
 0x79e   : > { %v9502_v44 = vpop.eup %9501  ;;  %v2347_v0 = vld [vmem:[#allocation20 + $0x958] sm:$0xff]  ;;  %v8628_v27 = vcombine.high %v2355_v49, %v2359_v23  ;;  %v8627_v48 = vcombine.low %v2355_v49, %v2359_v23 }
 0x79f   : > { %7911 = vst [vmem:[%s10644_s28 + $0x58] sm:$0xff] %v9502_v44  ;;  %7457 = vmatpush2.bf16.msra.mxu1 %v8403_v21  ;;  %7496 = vmatpush2.bf16.msra.mxu0 %v8547_v22  ;;  %v2351_v41 = vld [vmem:[#allocation20 + $0x978] sm:$0xff] }
 0x7a0   : > { %7458 = vmatprep.subr.bf16.mxu1 %v8396_v11  ;;  %7497 = vmatprep.subr.bf16.mxu0 %v8540_v13  ;;  %v2491_v54 = vld [vmem:[#allocation20 + $0xdd8] sm:$0xff]  ;;  %v8620_v57 = vcombine.high %v2347_v0, %v2351_v41  ;;  %v8619_v12 = vcombine.low %v2347_v0, %v2351_v41 }
 0x7a1   : > { %v2495_v58 = vld [vmem:[#allocation20 + $0xdf8] sm:$0xff] }
 0x7a2   : > { %v8764_v17 = vcombine.high %v2491_v54, %v2495_v58  ;;  %v2339_v33 = vld [vmem:[#allocation20 + $0x918] sm:$0xff]  ;;  %v8763_v59 = vcombine.low %v2491_v54, %v2495_v58 }
 0x7a3   : > { %7459 = vmatpush2.bf16.msra.mxu1 %v8395_v18  ;;  %7498 = vmatpush2.bf16.msra.mxu0 %v8539_v16  ;;  %v2343_v46 = vld [vmem:[#allocation20 + $0x938] sm:$0xff] }
 0x7a4   : > { %7460 = vmatprep.subr.bf16.mxu1 %v8388_v28  ;;  %7499 = vmatprep.subr.bf16.mxu0 %v8532_v31  ;;  %v2483_v24 = vld [vmem:[#allocation20 + $0xd98] sm:$0xff]  ;;  %v8611_v39 = vcombine.low %v2339_v33, %v2343_v46 }
 0x7a5   : > { %v2487_v56 = vld [vmem:[#allocation20 + $0xdb8] sm:$0xff] }
 0x7a6   : > { %v2331_v42 = vld [vmem:[#allocation20 + $0x8d8] sm:$0xff]  ;;  %v8756_v62 = vcombine.high %v2483_v24, %v2487_v56  ;;  %v8755_v5 = vcombine.low %v2483_v24, %v2487_v56 }
 0x7a7   : > { %7461 = vmatpush2.bf16.msra.mxu1 %v8387_v10  ;;  %7500 = vmatpush2.bf16.msra.mxu0 %v8531_v37  ;;  %v2335_v63 = vld [vmem:[#allocation20 + $0x8f8] sm:$0xff] }
 0x7a8   : > { %7501 = vmatprep.subr.bf16.mxu0 %v8524_v38  ;;  %7516 = vmatprep.subr.bf16.mxu1 %v8636_v3  ;;  %v2479_v26 = vld [vmem:[#allocation20 + $0xd78] sm:$0xff]  ;;  %v8604_v43 = vcombine.high %v2331_v42, %v2335_v63  ;;  %v8603_v11 = vcombine.low %v2331_v42, %v2335_v63 }
 0x7a9   : > { %v9544_v60 = vld [vmem:[%s10430_s29] ss:$8 sps:$4 sm:$0xff]  }
 0x7aa   : > { %7463 = vmatmul.mubr.bf16.vlgmr.msra.gmra.mxu1 %v10519_v20  ;;  %v8612_v20 = vcombine.high %v2339_v33, %v2343_v46  ;;  %v2323_v4 = vld [vmem:[#allocation20 + $0x898] sm:$0xff] }
 0x7ab   : > { %7502 = vmatpush2.bf16.msra.mxu0 %v8523_v25  ;;  %7517 = vmatpush1.bf16.msra.mxu1 %v8635_v32  ;;  %v2327_v21 = vld [vmem:[#allocation20 + $0x8b8] sm:$0xff] }
 0x7ac   : > { %7548 = vmatprep.mubr.bf16.mxu1 %v10551_v52  ;;  %7503 = vmatprep.subr.bf16.mxu0 %v8516_v51  ;;  %v2475_v52 = vld [vmem:[#allocation20 + $0xd58] sm:$0xff]  ;;  %v8596_v14 = vcombine.high %v2323_v4, %v2327_v21  ;;  %v8595_v18 = vcombine.low %v2323_v4, %v2327_v21 }
 0x7ad   : > { %7518 = vmatprep.subr.bf16.mxu1 %v8628_v27  ;;  %v8748_v8 = vcombine.high %v2475_v52, %v2479_v26  ;;  %v2467_v22 = vld [vmem:[#allocation20 + $0xd18] sm:$0xff]  ;;  %v8747_v13 = vcombine.low %v2475_v52, %v2479_v26 }
 0x7ae   : > { %v2471_v9 = vld [vmem:[#allocation20 + $0xd38] sm:$0xff] }
 0x7af   : > { %7504 = vmatpush2.bf16.msra.mxu0 %v8515_v19  ;;  %7519 = vmatpush1.bf16.msra.mxu1 %v8627_v48  ;;  %v8740_v15 = vcombine.high %v2467_v22, %v2471_v9  ;;  %v2315_v2 = vld [vmem:[#allocation20 + $0x858] sm:$0xff]  ;;  %v8739_v16 = vcombine.low %v2467_v22, %v2471_v9 }
 0x7b0   : > { %7520 = vmatprep.subr.bf16.mxu1 %v8620_v57  ;;  %7559 = vmatprep.subr.bf16.mxu0 %v8764_v17  ;;  %v2319_v6 = vld [vmem:[#allocation20 + $0x878] sm:$0xff] }
 0x7b1   : > { %v2459_v44 = vld [vmem:[#allocation20 + $0xcd8] sm:$0xff]  ;;  %v8588_v28 = vcombine.high %v2315_v2, %v2319_v6  ;;  %v8587_v10 = vcombine.low %v2315_v2, %v2319_v6 }
 0x7b2   : > { %7506 = vmatmul.mubr.bf16.vlgmr.msra.gmra.mxu0 %v9544_v60  ;;  %v2307_v34 = vld [vmem:[#allocation20 + $0x818] sm:$0xff] }
 0x7b3   : > { %7521 = vmatpush1.bf16.msra.mxu1 %v8619_v12  ;;  %7560 = vmatpush1.bf16.msra.mxu0 %v8763_v59  ;;  %v2311_v35 = vld [vmem:[#allocation20 + $0x838] sm:$0xff] }
 0x7b4   : > { %7591 = vmatprep.mubr.bf16.mxu0 %v10560_v1  ;;  %7522 = vmatprep.subr.bf16.mxu1 %v8612_v20  ;;  %v2463_v1 = vld [vmem:[#allocation20 + $0xcf8] sm:$0xff]  ;;  %v8580_v38 = vcombine.high %v2307_v34, %v2311_v35  ;;  %v8579_v25 = vcombine.low %v2307_v34, %v2311_v35 }
 0x7b5   : > { %7561 = vmatprep.subr.bf16.mxu0 %v8756_v62  ;;  %v8732_v31 = vcombine.high %v2459_v44, %v2463_v1  ;;  %v2451_v36 = vld [vmem:[#allocation20 + $0xc98] sm:$0xff]  ;;  %v8731_v37 = vcombine.low %v2459_v44, %v2463_v1 }
 0x7b6   : > { %v2455_v61 = vld [vmem:[#allocation20 + $0xcb8] sm:$0xff] }
 0x7b7   : > { %7523 = vmatpush1.bf16.msra.mxu1 %v8611_v39  ;;  %7562 = vmatpush1.bf16.msra.mxu0 %v8755_v5  ;;  %v8724_v3 = vcombine.high %v2451_v36, %v2455_v61  ;;  %v2427_v45 = vld [vmem:[#allocation20 + $0xbd8] sm:$0xff]  ;;  %v8723_v32 = vcombine.low %v2451_v36, %v2455_v61 }
 0x7b8   : > { %7524 = vmatprep.subr.bf16.mxu1 %v8604_v43  ;;  %7563 = vmatprep.subr.bf16.mxu0 %v8748_v8  ;;  %v2431_v47 = vld [vmem:[#allocation20 + $0xbf8] sm:$0xff] }
 0x7b9   : > { %v2443_v49 = vld [vmem:[#allocation20 + $0xc58] sm:$0xff]  ;;  %v8700_v51 = vcombine.high %v2427_v45, %v2431_v47  ;;  %v8699_v19 = vcombine.low %v2427_v45, %v2431_v47 }
 0x7ba   : > { %v2447_v23 = vld [vmem:[#allocation20 + $0xc78] sm:$0xff] }
 0x7bb   : > { %7525 = vmatpush1.bf16.msra.mxu1 %v8603_v11  ;;  %7564 = vmatpush1.bf16.msra.mxu0 %v8747_v13  ;;  %v8716_v0 = vcombine.high %v2443_v49, %v2447_v23  ;;  %v2419_v27 = vld [vmem:[#allocation20 + $0xb98] sm:$0xff]  ;;  %v8715_v48 = vcombine.low %v2443_v49, %v2447_v23 }
 0x7bc   : > { %7526 = vmatprep.subr.bf16.mxu1 %v8596_v14  ;;  %7565 = vmatprep.subr.bf16.mxu0 %v8740_v15  ;;  %v2423_v41 = vld [vmem:[#allocation20 + $0xbb8] sm:$0xff] }
 0x7bd   : > { %v2435_v54 = vld [vmem:[#allocation20 + $0xc18] sm:$0xff]  ;;  %v8692_v57 = vcombine.high %v2419_v27, %v2423_v41  ;;  %v8691_v12 = vcombine.low %v2419_v27, %v2423_v41 }
 0x7be   : > { %v2439_v58 = vld [vmem:[#allocation20 + $0xc38] sm:$0xff] }
 0x7bf   : > { %7527 = vmatpush1.bf16.msra.mxu1 %v8595_v18  ;;  %7566 = vmatpush1.bf16.msra.mxu0 %v8739_v16  ;;  %v8708_v17 = vcombine.high %v2435_v54, %v2439_v58  ;;  %v2411_v33 = vld [vmem:[#allocation20 + $0xb58] sm:$0xff]  ;;  %v8707_v59 = vcombine.low %v2435_v54, %v2439_v58 }
 0x7c0   : > { %7528 = vmatprep.subr.bf16.mxu1 %v8588_v28  ;;  %7567 = vmatprep.subr.bf16.mxu0 %v8732_v31  ;;  %v2415_v46 = vld [vmem:[#allocation20 + $0xb78] sm:$0xff] }
 0x7c1   : > { %v2555_v24 = vld [vmem:[#allocation20 + $0xfd8] sm:$0xff]  ;;  %v8684_v20 = vcombine.high %v2411_v33, %v2415_v46  ;;  %v8683_v60 = vcombine.low %v2411_v33, %v2415_v46 }
 0x7c2   : > { %v2559_v56 = vld [vmem:[#allocation20 + $0xff8] sm:$0xff] }
 0x7c3   : > { %7529 = vmatpush1.bf16.msra.mxu1 %v8587_v10  ;;  %7568 = vmatpush1.bf16.msra.mxu0 %v8731_v37  ;;  %v8828_v42 = vcombine.high %v2555_v24, %v2559_v56  ;;  %v2403_v62 = vld [vmem:[#allocation20 + $0xb18] sm:$0xff]  ;;  %v8827_v39 = vcombine.low %v2555_v24, %v2559_v56 }
 0x7c4   : > { %7530 = vmatprep.subr.bf16.mxu1 %v8580_v38  ;;  %7569 = vmatprep.subr.bf16.mxu0 %v8724_v3  ;;  %v2407_v63 = vld [vmem:[#allocation20 + $0xb38] sm:$0xff] }
 0x7c5   : > { %v2547_v52 = vld [vmem:[#allocation20 + $0xf98] sm:$0xff]  ;;  %v8676_v5 = vcombine.high %v2403_v62, %v2407_v63  ;;  %v8675_v9 = vcombine.low %v2403_v62, %v2407_v63 }
 0x7c6   : > { %v2551_v26 = vld [vmem:[#allocation20 + $0xfb8] sm:$0xff] }
 0x7c7   : > { %7531 = vmatpush1.bf16.msra.mxu1 %v8579_v25  ;;  %7570 = vmatpush1.bf16.msra.mxu0 %v8723_v32  ;;  %v8820_v43 = vcombine.high %v2547_v52, %v2551_v26  ;;  %v2395_v8 = vld [vmem:[#allocation20 + $0xad8] sm:$0xff]  ;;  %v8819_v11 = vcombine.low %v2547_v52, %v2551_v26 }
 0x7c8   : > { %7532 = vmatprep.subr.bf16.mxu1 %v8700_v51  ;;  %7571 = vmatprep.subr.bf16.mxu0 %v8716_v0  ;;  %v2399_v4 = vld [vmem:[#allocation20 + $0xaf8] sm:$0xff] }
 0x7c9   : > { %v2539_v21 = vld [vmem:[#allocation20 + $0xf58] sm:$0xff]  ;;  %v8668_v13 = vcombine.high %v2395_v8, %v2399_v4  ;;  %v8667_v1 = vcombine.low %v2395_v8, %v2399_v4 }
 0x7ca   : > { %v2543_v22 = vld [vmem:[#allocation20 + $0xf78] sm:$0xff] }
 0x7cb   : > { %7533 = vmatpush2.bf16.msra.mxu1 %v8699_v19  ;;  %7572 = vmatpush1.bf16.msra.mxu0 %v8715_v48  ;;  %v8812_v14 = vcombine.high %v2539_v21, %v2543_v22  ;;  %v2387_v15 = vld [vmem:[#allocation20 + $0xa98] sm:$0xff]  ;;  %v8811_v18 = vcombine.low %v2539_v21, %v2543_v22 }
 0x7cc   : > { %7534 = vmatprep.subr.bf16.mxu1 %v8692_v57  ;;  %7573 = vmatprep.subr.bf16.mxu0 %v8708_v17  ;;  %v2391_v2 = vld [vmem:[#allocation20 + $0xab8] sm:$0xff] }
 0x7cd   : > { %v2531_v6 = vld [vmem:[#allocation20 + $0xf18] sm:$0xff]  ;;  %v8660_v16 = vcombine.high %v2387_v15, %v2391_v2  ;;  %v8659_v61 = vcombine.low %v2387_v15, %v2391_v2 }
 0x7ce   : > { %v2535_v44 = vld [vmem:[#allocation20 + $0xf38] sm:$0xff] }
 0x7cf   : > { %7535 = vmatpush2.bf16.msra.mxu1 %v8691_v12  ;;  %7574 = vmatpush1.bf16.msra.mxu0 %v8707_v59  ;;  %v8804_v28 = vcombine.high %v2531_v6, %v2535_v44  ;;  %v2379_v31 = vld [vmem:[#allocation20 + $0xa58] sm:$0xff]  ;;  %v8803_v10 = vcombine.low %v2531_v6, %v2535_v44 }
 0x7d0   : > { %7536 = vmatprep.subr.bf16.mxu1 %v8684_v20  ;;  %7575 = vmatprep.subr.bf16.mxu0 %v8828_v42  ;;  %v2383_v34 = vld [vmem:[#allocation20 + $0xa78] sm:$0xff] }
 0x7d1   : > { %v2523_v35 = vld [vmem:[#allocation20 + $0xed8] sm:$0xff]  ;;  %v8652_v37 = vcombine.high %v2379_v31, %v2383_v34  ;;  %v8651_v23 = vcombine.low %v2379_v31, %v2383_v34 }
 0x7d2   : > { %v2527_v36 = vld [vmem:[#allocation20 + $0xef8] sm:$0xff] }
 0x7d3   : > { %7537 = vmatpush2.bf16.msra.mxu1 %v8683_v60  ;;  %7576 = vmatpush2.bf16.msra.mxu0 %v8827_v39  ;;  %v8796_v38 = vcombine.high %v2523_v35, %v2527_v36  ;;  %v2371_v3 = vld [vmem:[#allocation20 + $0xa18] sm:$0xff]  ;;  %v8795_v25 = vcombine.low %v2523_v35, %v2527_v36 }
 0x7d4   : > { %7538 = vmatprep.subr.bf16.mxu1 %v8676_v5  ;;  %7577 = vmatprep.subr.bf16.mxu0 %v8820_v43  ;;  %v2375_v45 = vld [vmem:[#allocation20 + $0xa38] sm:$0xff] }
 0x7d5   : > { %v2515_v47 = vld [vmem:[#allocation20 + $0xe98] sm:$0xff]  ;;  %v8644_v32 = vcombine.high %v2371_v3, %v2375_v45  ;;  %v8643_v58 = vcombine.low %v2371_v3, %v2375_v45 }
 0x7d6   : > { %v2519_v49 = vld [vmem:[#allocation20 + $0xeb8] sm:$0xff] }
 0x7d7   : > { %7539 = vmatpush2.bf16.msra.mxu1 %v8675_v9  ;;  %7578 = vmatpush2.bf16.msra.mxu0 %v8819_v11  ;;  %v8788_v51 = vcombine.high %v2515_v47, %v2519_v49  ;;  %v2507_v0 = vld [vmem:[#allocation20 + $0xe58] sm:$0xff]  ;;  %v8787_v19 = vcombine.low %v2515_v47, %v2519_v49 }
 0x7d8   : > { %7540 = vmatprep.subr.bf16.mxu1 %v8668_v13  ;;  %7579 = vmatprep.subr.bf16.mxu0 %v8812_v14  ;;  %v2511_v27 = vld [vmem:[#allocation20 + $0xe78] sm:$0xff] }
 0x7d9   : > { %v2619_v41 = vld [vmem:[#allocation20 + $0x11d8] sm:$0xff]  ;;  %v8780_v48 = vcombine.high %v2507_v0, %v2511_v27  ;;  %v8779_v56 = vcombine.low %v2507_v0, %v2511_v27 }
 0x7da   : > { %v2623_v54 = vld [vmem:[#allocation20 + $0x11f8] sm:$0xff] }
 0x7db   : > { %7541 = vmatpush2.bf16.msra.mxu1 %v8667_v1  ;;  %7580 = vmatpush2.bf16.msra.mxu0 %v8811_v18  ;;  %v8892_v57 = vcombine.high %v2619_v41, %v2623_v54  ;;  %v2499_v17 = vld [vmem:[#allocation20 + $0xe18] sm:$0xff]  ;;  %v8891_v12 = vcombine.low %v2619_v41, %v2623_v54 }
 0x7dc   : > { %7542 = vmatprep.subr.bf16.mxu1 %v8660_v16  ;;  %7581 = vmatprep.subr.bf16.mxu0 %v8804_v28  ;;  %v2503_v33 = vld [vmem:[#allocation20 + $0xe38] sm:$0xff] }
 0x7dd   : > { %v2611_v46 = vld [vmem:[#allocation20 + $0x1198] sm:$0xff]  ;;  %v8772_v59 = vcombine.high %v2499_v17, %v2503_v33  ;;  %v8771_v26 = vcombine.low %v2499_v17, %v2503_v33 }
 0x7de   : > { %v2615_v24 = vld [vmem:[#allocation20 + $0x11b8] sm:$0xff] }
 0x7df   : > { %7543 = vmatpush2.bf16.msra.mxu1 %v8659_v61  ;;  %7582 = vmatpush2.bf16.msra.mxu0 %v8803_v10  ;;  %v2603_v20 = vld [vmem:[#allocation20 + $0x1158] sm:$0xff]  ;;  %v8884_v42 = vcombine.high %v2611_v46, %v2615_v24  ;;  %v8883_v60 = vcombine.low %v2611_v46, %v2615_v24 }
 0x7e0   : > { %7544 = vmatprep.subr.bf16.mxu1 %v8652_v37  ;;  %7583 = vmatprep.subr.bf16.mxu0 %v8796_v38  ;;  %v2607_v62 = vld [vmem:[#allocation20 + $0x1178] sm:$0xff] }
 0x7e1   : > { %v2747_v63 = vld [vmem:[#allocation20 + $0x15d8] sm:$0xff]  ;;  %v8876_v39 = vcombine.high %v2603_v20, %v2607_v62  ;;  %v8875_v22 = vcombine.low %v2603_v20, %v2607_v62 }
 0x7e2   : > { %v2751_v52 = vld [vmem:[#allocation20 + $0x15f8] sm:$0xff] }
 0x7e3   : > { %7545 = vmatpush2.bf16.msra.mxu1 %v8651_v23  ;;  %7584 = vmatpush2.bf16.msra.mxu0 %v8795_v25  ;;  %v9020_v5 = vcombine.high %v2747_v63, %v2751_v52  ;;  %v2595_v43 = vld [vmem:[#allocation20 + $0x1118] sm:$0xff]  ;;  %v9019_v9 = vcombine.low %v2747_v63, %v2751_v52 }
 0x7e4   : > { %7546 = vmatprep.subr.bf16.mxu1 %v8644_v32  ;;  %7585 = vmatprep.subr.bf16.mxu0 %v8788_v51  ;;  %v2599_v8 = vld [vmem:[#allocation20 + $0x1138] sm:$0xff] }
 0x7e5   : > { %v2739_v4 = vld [vmem:[#allocation20 + $0x1598] sm:$0xff]  ;;  %v8867_v2 = vcombine.low %v2595_v43, %v2599_v8 }
 0x7e6   : > { %v2743_v21 = vld [vmem:[#allocation20 + $0x15b8] sm:$0xff] }
 0x7e7   : > { %7547 = vmatpush2.bf16.msra.mxu1 %v8643_v58  ;;  %7586 = vmatpush2.bf16.msra.mxu0 %v8787_v19  ;;  %v2587_v11 = vld [vmem:[#allocation20 + $0x10d8] sm:$0xff]  ;;  %v9012_v13 = vcombine.high %v2739_v4, %v2743_v21  ;;  %v9011_v6 = vcombine.low %v2739_v4, %v2743_v21 }
 0x7e8   : > { %7587 = vmatprep.subr.bf16.mxu0 %v8780_v48  ;;  %7602 = vmatprep.subr.bf16.mxu1 %v8892_v57  ;;  %v2591_v14 = vld [vmem:[#allocation20 + $0x10f8] sm:$0xff] }
 0x7e9   : > { %v2731_v15 = vld [vmem:[#allocation20 + $0x1558] sm:$0xff]  ;;  %v8860_v44 = vcombine.high %v2587_v11, %v2591_v14  ;;  %v8859_v34 = vcombine.low %v2587_v11, %v2591_v14  ;;  %v10730_v11 = vpop.f32.mrf.mxu1 }
 0x7ea   : > { %7549 = vmatmul.mubr.bf16.vlgmr.msra.gmra.mxu1 %v10553_v53  ;;  %v8868_v53 = vcombine.high %v2595_v43, %v2599_v8  ;;  %v2579_v18 = vld [vmem:[#allocation20 + $0x1098] sm:$0xff] }
 0x7eb   : > { %7588 = vmatpush2.bf16.msra.mxu0 %v8779_v56  ;;  %7603 = vmatpush1.bf16.msra.mxu1 %v8891_v12  ;;  %v2583_v16 = vld [vmem:[#allocation20 + $0x10b8] sm:$0xff] }
 0x7ec   : > { %7634 = vmatprep.mubr.bf16.mxu1 %v10570_v29  ;;  %7589 = vmatprep.subr.bf16.mxu0 %v8772_v59  ;;  %v2735_v29 = vld [vmem:[#allocation20 + $0x1578] sm:$0xff]  ;;  %v8851_v38 = vcombine.low %v2579_v18, %v2583_v16 }
 0x7ed   : > { %7604 = vmatprep.subr.bf16.mxu1 %v8884_v42  ;;  %v9004_v1 = vcombine.high %v2731_v15, %v2735_v29  ;;  %v2723_v28 = vld [vmem:[#allocation20 + $0x1518] sm:$0xff]  ;;  %v9003_v35 = vcombine.low %v2731_v15, %v2735_v29 }
 0x7ee   : > { %v2727_v31 = vld [vmem:[#allocation20 + $0x1538] sm:$0xff] }
 0x7ef   : > { %7590 = vmatpush2.bf16.msra.mxu0 %v8771_v26  ;;  %7605 = vmatpush1.bf16.msra.mxu1 %v8883_v60  ;;  %v8996_v36 = vcombine.high %v2723_v28, %v2727_v31  ;;  %v2571_v61 = vld [vmem:[#allocation20 + $0x1058] sm:$0xff]  ;;  %v8995_v3 = vcombine.low %v2723_v28, %v2727_v31 }
 0x7f0   : > { %7606 = vmatprep.subr.bf16.mxu1 %v8876_v39  ;;  %7645 = vmatprep.subr.bf16.mxu0 %v9020_v5  ;;  %v2575_v10 = vld [vmem:[#allocation20 + $0x1078] sm:$0xff] }
 0x7f1   : > { %v2715_v37 = vld [vmem:[#allocation20 + $0x14d8] sm:$0xff]  ;;  %v8844_v45 = vcombine.high %v2571_v61, %v2575_v10  ;;  %v8843_v51 = vcombine.low %v2571_v61, %v2575_v10 }
 0x7f2   : > { %7592 = vmatmul.mubr.bf16.vlgmr.msra.gmra.mxu0 %v10562_v7  ;;  %v8852_v7 = vcombine.high %v2579_v18, %v2583_v16  ;;  %v2563_v49 = vld [vmem:[#allocation20 + $0x1018] sm:$0xff]  ;;  %v10732_v18 = vpop.f32.mrf.mxu1 }
 0x7f3   : > { %7607 = vmatpush1.bf16.msra.mxu1 %v8875_v22  ;;  %7646 = vmatpush1.bf16.msra.mxu0 %v9019_v9  ;;  %v2567_v23 = vld [vmem:[#allocation20 + $0x1038] sm:$0xff] }
 0x7f4   : > { %7677 = vmatprep.mubr.bf16.mxu0 %v10577_v55  ;;  %7608 = vmatprep.subr.bf16.mxu1 %v8868_v53  ;;  %v2719_v55 = vld [vmem:[#allocation20 + $0x14f8] sm:$0xff]  ;;  %v8836_v27 = vcombine.high %v2563_v49, %v2567_v23  ;;  %v8835_v57 = vcombine.low %v2563_v49, %v2567_v23  ;;  %v10734_v10 = vpop.f32.mrf.mxu1 }
 0x7f5   : > { %7647 = vmatprep.subr.bf16.mxu0 %v9012_v13  ;;  %v8988_v47 = vcombine.high %v2715_v37, %v2719_v55  ;;  %v2707_v25 = vld [vmem:[#allocation20 + $0x1498] sm:$0xff]  ;;  %v8987_v0 = vcombine.low %v2715_v37, %v2719_v55  ;;  %v7249_v37 = vpop.f32.mrf.mxu0 }
 0x7f6   : > { %v2711_v32 = vld [vmem:[#allocation20 + $0x14b8] sm:$0xff] }
 0x7f7   : > { %7609 = vmatpush1.bf16.msra.mxu1 %v8867_v2  ;;  %7648 = vmatpush1.bf16.msra.mxu0 %v9011_v6  ;;  %v8980_v41 = vcombine.high %v2707_v25, %v2711_v32  ;;  %v2683_v54 = vld [vmem:[#allocation20 + $0x13d8] sm:$0xff]  ;;  %v8979_v17 = vcombine.low %v2707_v25, %v2711_v32  ;;  %v10736_v32 = vpop.f32.mrf.mxu1 }
 0x7f8   : > { %7610 = vmatprep.subr.bf16.mxu1 %v8860_v44  ;;  %7649 = vmatprep.subr.bf16.mxu0 %v9004_v1  ;;  %v2687_v58 = vld [vmem:[#allocation20 + $0x13f8] sm:$0xff] }
 0x7f9   : > { %v2699_v19 = vld [vmem:[#allocation20 + $0x1458] sm:$0xff]  ;;  %v8956_v33 = vcombine.high %v2683_v54, %v2687_v58  ;;  %v8955_v20 = vcombine.low %v2683_v54, %v2687_v58 }
 0x7fa   : > { %v2703_v48 = vld [vmem:[#allocation20 + $0x1478] sm:$0xff] }
 0x7fb   : > { %7611 = vmatpush1.bf16.msra.mxu1 %v8859_v34  ;;  %7650 = vmatpush1.bf16.msra.mxu0 %v9003_v35  ;;  %v8972_v46 = vcombine.high %v2699_v19, %v2703_v48  ;;  %v2675_v24 = vld [vmem:[#allocation20 + $0x1398] sm:$0xff]  ;;  %v8971_v42 = vcombine.low %v2699_v19, %v2703_v48 }
 0x7fc   : > { %7612 = vmatprep.subr.bf16.mxu1 %v8852_v7  ;;  %7651 = vmatprep.subr.bf16.mxu0 %v8996_v36  ;;  %v2679_v56 = vld [vmem:[#allocation20 + $0x13b8] sm:$0xff] }
 0x7fd   : > { %v2691_v12 = vld [vmem:[#allocation20 + $0x1418] sm:$0xff]  ;;  %v8948_v62 = vcombine.high %v2675_v24, %v2679_v56  ;;  %v8947_v5 = vcombine.low %v2675_v24, %v2679_v56 }
 0x7fe   : > { %v2695_v59 = vld [vmem:[#allocation20 + $0x1438] sm:$0xff] }
 0x7ff   : > { %7613 = vmatpush1.bf16.msra.mxu1 %v8851_v38  ;;  %7652 = vmatpush1.bf16.msra.mxu0 %v8995_v3  ;;  %v8964_v63 = vcombine.high %v2691_v12, %v2695_v59  ;;  %v2667_v52 = vld [vmem:[#allocation20 + $0x1358] sm:$0xff]  ;;  %v8963_v43 = vcombine.low %v2691_v12, %v2695_v59 }
 0x800   : > { %7614 = vmatprep.subr.bf16.mxu1 %v8844_v45  ;;  %7653 = vmatprep.subr.bf16.mxu0 %v8988_v47  ;;  %v2671_v26 = vld [vmem:[#allocation20 + $0x1378] sm:$0xff] }
 0x801   : > { %v2811_v60 = vld [vmem:[#allocation20 + $0x17d8] sm:$0xff]  ;;  %v8940_v8 = vcombine.high %v2667_v52, %v2671_v26  ;;  %v8939_v13 = vcombine.low %v2667_v52, %v2671_v26 }
 0x802   : > { %v2815_v39 = vld [vmem:[#allocation20 + $0x17f8] sm:$0xff] }
 0x803   : > { %7615 = vmatpush1.bf16.msra.mxu1 %v8843_v51  ;;  %7654 = vmatpush1.bf16.msra.mxu0 %v8987_v0  ;;  %v9084_v4 = vcombine.high %v2811_v60, %v2815_v39  ;;  %v2659_v21 = vld [vmem:[#allocation20 + $0x1318] sm:$0xff]  ;;  %v9083_v14 = vcombine.low %v2811_v60, %v2815_v39  ;;  %v7251_v51 = vpop.f32.mrf.mxu0 }
 0x804   : > { %7616 = vmatprep.subr.bf16.mxu1 %v8836_v27  ;;  %7655 = vmatprep.subr.bf16.mxu0 %v8980_v41  ;;  %v2663_v22 = vld [vmem:[#allocation20 + $0x1338] sm:$0xff]  ;;  %v7292_v41 = vpop.f32.mrf.mxu1 }
 0x805   : > { %v2803_v9 = vld [vmem:[#allocation20 + $0x1798] sm:$0xff]  ;;  %v8932_v15 = vcombine.high %v2659_v21, %v2663_v22  ;;  %v8931_v16 = vcombine.low %v2659_v21, %v2663_v22 }
 0x806   : > { %v2807_v53 = vld [vmem:[#allocation20 + $0x17b8] sm:$0xff]  ;;  %v7294_v56 = vpop.f32.mrf.mxu1 }
 0x807   : > { %7617 = vmatpush1.bf16.msra.mxu1 %v8835_v57  ;;  %7656 = vmatpush1.bf16.msra.mxu0 %v8979_v17  ;;  %v9076_v29 = vcombine.high %v2803_v9, %v2807_v53  ;;  %v2651_v2 = vld [vmem:[#allocation20 + $0x12d8] sm:$0xff]  ;;  %v9075_v28 = vcombine.low %v2803_v9, %v2807_v53  ;;  %v7250_v53 = vadd.f32 %v7249_v37, %v10730_v11  ;;  %v10744_v11 = vld [vmem:[#allocation22] sm:$0xff]  ;;  %v10748_v37 = vld [vmem:[#allocation23] sm:$0xff] }
 0x808   : > { %7618 = vmatprep.subr.bf16.mxu1 %v8956_v33  ;;  %7657 = vmatprep.subr.bf16.mxu0 %v8972_v46  ;;  %v2655_v6 = vld [vmem:[#allocation20 + $0x12f8] sm:$0xff]  ;;  %v7253_v33 = vpop.f32.mrf.mxu0  ;;  %v7296_v26 = vpop.f32.mrf.mxu1 }
 0x809   : > { %v2795_v44 = vld [vmem:[#allocation20 + $0x1758] sm:$0xff]  ;;  %v8924_v31 = vcombine.high %v2651_v2, %v2655_v6  ;;  %v8923_v55 = vcombine.low %v2651_v2, %v2655_v6  ;;  %v7252_v2 = vadd.f32 %v7251_v51, %v10732_v18  ;;  %v7293_v6 = vadd.f32 %v7292_v41, %v7250_v53 }
 0x80a   : > { %v2799_v1 = vld [vmem:[#allocation20 + $0x1778] sm:$0xff] }
 0x80b   : > { %7619 = vmatpush2.bf16.msra.mxu1 %v8955_v20  ;;  %7658 = vmatpush1.bf16.msra.mxu0 %v8971_v42  ;;  %v9068_v34 = vcombine.high %v2795_v44, %v2799_v1  ;;  %v2643_v35 = vld [vmem:[#allocation20 + $0x1298] sm:$0xff]  ;;  %v9067_v38 = vcombine.low %v2795_v44, %v2799_v1  ;;  %v7712_v44 = vsub.s32 5, %v10502_v40  ;;  %v7254_v1 = vadd.f32 %v7253_v33, %v10734_v10 }
 0x80c   : > { %7620 = vmatprep.subr.bf16.mxu1 %v8948_v62  ;;  %7659 = vmatprep.subr.bf16.mxu0 %v8964_v63  ;;  %v2647_v7 = vld [vmem:[#allocation20 + $0x12b8] sm:$0xff]  ;;  %v7255_v62 = vpop.f32.mrf.mxu0 }
 0x80d   : > { %v2787_v36 = vld [vmem:[#allocation20 + $0x1718] sm:$0xff]  ;;  %v8916_v3 = vcombine.high %v2643_v35, %v2647_v7  ;;  %v8915_v0 = vcombine.low %v2643_v35, %v2647_v7  ;;  %v7256_v35 = vadd.f32 %v7255_v62, %v10736_v32  ;;  %v7297_v7 = vadd.f32 %v7296_v26, %v7254_v1 }
 0x80e   : > { %v2791_v61 = vld [vmem:[#allocation20 + $0x1738] sm:$0xff]  ;;  %v7335_v60 = vpop.f32.mrf.mxu0  ;;  %v7713_v10 = vrot.slane %v10744_v11, %v7712_v44 }
 0x80f   : > { %7621 = vmatpush2.bf16.msra.mxu1 %v8947_v5  ;;  %7660 = vmatpush1.bf16.msra.mxu0 %v8963_v43  ;;  %v9060_v45 = vcombine.high %v2787_v36, %v2791_v61  ;;  %v2635_v47 = vld [vmem:[#allocation20 + $0x1258] sm:$0xff]  ;;  %v9059_v27 = vcombine.low %v2787_v36, %v2791_v61 }
 0x810   : > { %7622 = vmatprep.subr.bf16.mxu1 %v8940_v8  ;;  %7661 = vmatprep.subr.bf16.mxu0 %v9084_v4  ;;  %v2639_v49 = vld [vmem:[#allocation20 + $0x1278] sm:$0xff]  ;;  %v7298_v4 = vpop.f32.mrf.mxu1  ;;  %v7337_v21 = vpop.f32.mrf.mxu0 }
 0x811   : > { %v2779_v23 = vld [vmem:[#allocation20 + $0x16d8] sm:$0xff]  ;;  %v8908_v54 = vcombine.high %v2635_v47, %v2639_v49  ;;  %v8907_v46 = vcombine.low %v2635_v47, %v2639_v49 }
 0x812   : > { %v2783_v25 = vld [vmem:[#allocation20 + $0x16f8] sm:$0xff] }
 0x813   : > { %7623 = vmatpush2.bf16.msra.mxu1 %v8939_v13  ;;  %7662 = vmatpush2.bf16.msra.mxu0 %v9083_v14  ;;  %v9052_v58 = vcombine.high %v2779_v23, %v2783_v25  ;;  %v2627_v19 = vld [vmem:[#allocation20 + $0x1218] sm:$0xff]  ;;  %v9051_v24 = vcombine.low %v2779_v23, %v2783_v25  ;;  %v7339_v14 = vpop.f32.mrf.mxu0  ;;  %v7771_v25 = vrot.slane %v10748_v37, %v7712_v44 }
 0x814   : > { %7624 = vmatprep.subr.bf16.mxu1 %v8932_v15  ;;  %7663 = vmatprep.subr.bf16.mxu0 %v9076_v29  ;;  %v2631_v48 = vld [vmem:[#allocation20 + $0x1238] sm:$0xff]  ;;  %v7708_v29 = vsub.s32 4, %v10502_v40 }
 0x815   : > { %v2771_v57 = vld [vmem:[#allocation20 + $0x1698] sm:$0xff]  ;;  %v8900_v12 = vcombine.high %v2627_v19, %v2631_v48  ;;  %v8899_v63 = vcombine.low %v2627_v19, %v2631_v48 }
 0x816   : > { %v2775_v17 = vld [vmem:[#allocation20 + $0x16b8] sm:$0xff] }
 0x817   : > { %7625 = vmatpush2.bf16.msra.mxu1 %v8931_v16  ;;  %7664 = vmatpush2.bf16.msra.mxu0 %v9075_v28  ;;  %v9044_v59 = vcombine.high %v2771_v57, %v2775_v17  ;;  %v2763_v20 = vld [vmem:[#allocation20 + $0x1658] sm:$0xff]  ;;  %v9043_v52 = vcombine.low %v2771_v57, %v2775_v17  ;;  %v7295_v16 = vadd.f32 %v7294_v56, %v7252_v2 }
 0x818   : > { %7626 = vmatprep.subr.bf16.mxu1 %v8924_v31  ;;  %7665 = vmatprep.subr.bf16.mxu0 %v9068_v34  ;;  %v2767_v42 = vld [vmem:[#allocation20 + $0x1678] sm:$0xff]  ;;  %v7336_v28 = vadd.f32 %v7335_v60, %v7293_v6  ;;  %v7709_v34 = vrot.slane %v10744_v11, %v7708_v29 }
 0x819   : > { %v9036_v39 = vcombine.high %v2763_v20, %v2767_v42  ;;  %v2755_v5 = vld [vmem:[#allocation20 + $0x1618] sm:$0xff]  ;;  %v9035_v8 = vcombine.low %v2763_v20, %v2767_v42  ;;  %v7338_v36 = vadd.f32 %v7337_v21, %v7295_v16 }
 0x81a   : > { %v2759_v43 = vld [vmem:[#allocation20 + $0x1638] sm:$0xff] }
 0x81b   : > { %7627 = vmatpush2.bf16.msra.mxu1 %v8923_v55  ;;  %7666 = vmatpush2.bf16.msra.mxu0 %v9067_v38  ;;  %v9028_v22 = vcombine.high %v2755_v5, %v2759_v43  ;;  %v9027_v13 = vcombine.low %v2755_v5, %v2759_v43  ;;  %v7767_v55 = vrot.slane %v10748_v37, %v7708_v29 }
 0x81c   : > { %7628 = vmatprep.subr.bf16.mxu1 %v8916_v3  ;;  %7667 = vmatprep.subr.bf16.mxu0 %v9060_v45  ;;  %v7299_v38 = vadd.f32 %v7298_v4, %v7256_v35  ;;  %v7340_v3 = vadd.f32 %v7339_v14, %v7297_v7 }
 0x81f   : > { %7629 = vmatpush2.bf16.msra.mxu1 %v8915_v0  ;;  %7668 = vmatpush2.bf16.msra.mxu0 %v9059_v27 }
 0x820   : > { %7630 = vmatprep.subr.bf16.mxu1 %v8908_v54  ;;  %7669 = vmatprep.subr.bf16.mxu0 %v9052_v58 }
 0x823   : > { %7631 = vmatpush2.bf16.msra.mxu1 %v8907_v46  ;;  %7670 = vmatpush2.bf16.msra.mxu0 %v9051_v24 }
 0x824   : > { %7632 = vmatprep.subr.bf16.mxu1 %v8900_v12  ;;  %7671 = vmatprep.subr.bf16.mxu0 %v9044_v59 }
 0x827   : > { %7633 = vmatpush2.bf16.msra.mxu1 %v8899_v63  ;;  %7672 = vmatpush2.bf16.msra.mxu0 %v9043_v52 }
 0x828   : > { %7673 = vmatprep.subr.bf16.mxu0 %v9036_v39 }
 0x82a   : > { %v7378_v9 = vpop.f32.mrf.mxu1  ;;  %7635 = vmatmul.mubr.bf16.vlgmr.msra.gmra.mxu1 %v10582_v30  ;;  %v7341_v30 = vpop.f32.mrf.mxu0 }
 0x82b   : > { %7674 = vmatpush2.bf16.msra.mxu0 %v9035_v8  ;;  %v7379_v61 = vadd.f32 %v7378_v9, %v7336_v28  ;;  %v7342_v32 = vadd.f32 %v7341_v30, %v7299_v38 }
 0x82c   : > { %v7380_v15 = vpop.f32.mrf.mxu1  ;;  %7675 = vmatprep.subr.bf16.mxu0 %v9028_v22 }
 0x82d   : > { %v7381_v45 = vadd.f32 %v7380_v15, %v7338_v36 }
 0x82e   : > { %v7382_v31 = vpop.f32.mrf.mxu1 }
 0x82f   : > { %7676 = vmatpush2.bf16.msra.mxu0 %v9027_v13  ;;  %v7383_v51 = vadd.f32 %v7382_v31, %v7340_v3 }
 0x830   : > { %v7384_v49 = vpop.f32.mrf.mxu1 }
 0x831   : > { %v7385_v54 = vadd.f32 %v7384_v49, %v7342_v32 }
 0x832   : > { %v7421_v18 = vpop.f32.mrf.mxu0  ;;  %7678 = vmatmul.mubr.bf16.vlgmr.msra.gmra.mxu0 %v10588_v50 }
 0x833   : > { %v7422_v47 = vadd.f32 %v7421_v18, %v7379_v61  ;;  %v7716_v61 = vsub.s32 6, %v10502_v40 }
 0x834   : > { %v7423_v23 = vpop.f32.mrf.mxu0 }
 0x835   : > { %v7734_v0 = vmul.f32 %v7709_v34, %v7422_v47  ;;  %v7424_v27 = vadd.f32 %v7423_v23, %v7381_v45  ;;  %v7717_v23 = vrot.slane %v10744_v11, %v7716_v61 }
 0x836   : > { %v7425_v41 = vpop.f32.mrf.mxu0 }
 0x837   : > { %v7792_v58 = vadd.f32 %v7767_v55, %v7734_v0  ;;  %v7735_v19 = vmul.f32 %v7713_v10, %v7424_v27  ;;  %v7426_v48 = vadd.f32 %v7425_v41, %v7383_v51  ;;  %v7775_v41 = vrot.slane %v10748_v37, %v7716_v61 }
 0x838   : > { %v7427_v50 = vpop.f32.mrf.mxu0 }
 0x839   : > { %v9089_v57 = vmul.f32 -1.442695, %v7792_v58  ;;  %v7793_v17 = vadd.f32 %v7771_v25, %v7735_v19  ;;  %v7742_v33 = vmul.f32 %v7709_v34, %v7426_v48  ;;  %v7428_v46 = vadd.f32 %v7427_v50, %v7385_v54 }
 0x83b   : > { %9503 = vpow2.f32 %v9089_v57  ;;  %v9090_v24 = vmul.f32 -1.442695, %v7793_v17  ;;  %v7800_v56 = vadd.f32 %v7767_v55, %v7742_v33  ;;  %v7743_v12 = vmul.f32 %v7713_v10, %v7428_v46 }
 0x83c   : > { %v7720_v10 = vsub.s32 7, %v10502_v40 }
 0x83d   : > { %9505 = vpow2.f32 %v9090_v24  ;;  %v9097_v59 = vmul.f32 -1.442695, %v7800_v56  ;;  %v7801_v20 = vadd.f32 %v7771_v25, %v7743_v12 }
 0x83e   : > { %v7721_v54 = vrot.slane %v10744_v11, %v7720_v10  ;;  %v7779_v17 = vrot.slane %v10748_v37, %v7720_v10 }
 0x83f   : > { %9507 = vpow2.f32 %v9097_v59  ;;  %v9098_v42 = vmul.f32 -1.442695, %v7801_v20 }
 0x841   : > { %9509 = vpow2.f32 %v9098_v42 }
 0x848   : > { %v9504_v62 = vpop.eup %9503 }
 0x849   : > { %v7856_v63 = vadd.f32 1.0, %v9504_v62 }
 0x84a   : > { %v9506_v52 = vpop.eup %9505 }
 0x84b   : > { %9511 = vrcp.f32 %v7856_v63  ;;  %v7857_v26 = vadd.f32 1.0, %v9506_v52 }
 0x84c   : > { %v9508_v60 = vpop.eup %9507 }
 0x84d   : > { %9513 = vrcp.f32 %v7857_v26  ;;  %v7864_v39 = vadd.f32 1.0, %v9508_v60 }
 0x84e   : > { %v9510_v5 = vpop.eup %9509 }
 0x84f   : > { %9515 = vrcp.f32 %v7864_v39  ;;  %v7865_v43 = vadd.f32 1.0, %v9510_v5 }
 0x851   : > { %9517 = vrcp.f32 %v7865_v43 }
 0x858   : > { %v9512_v8 = vpop.eup %9511 }
 0x859   : > { %7904 = vst [vmem:[%s10644_s28 + $0x20] sm:$0xff] %v9512_v8 }
 0x85a   : > { %v9514_v4 = vpop.eup %9513 }
 0x85b   : > { %7905 = vst [vmem:[%s10644_s28 + $0x28] sm:$0xff] %v9514_v4 }
 0x85c   : > { %v9516_v21 = vpop.eup %9515 }
 0x85d   : > { %7912 = vst [vmem:[%s10644_s28 + $0x60] sm:$0xff] %v9516_v21 }
 0x85e   : > { %v9518_v22 = vpop.eup %9517 }
 0x85f   : > { %7913 = vst [vmem:[%s10644_s28 + $0x68] sm:$0xff] %v9518_v22 }
 0x86a   : > { %v7464_v9 = vpop.f32.mrf.mxu1 }
 0x86c   : > { %v7466_v53 = vpop.f32.mrf.mxu1 }
 0x86e   : > { %v7468_v13 = vpop.f32.mrf.mxu1 }
 0x870   : > { %v7470_v15 = vpop.f32.mrf.mxu1 }
 0x872   : > { %v7507_v14 = vpop.f32.mrf.mxu0 }
 0x873   : > { %v7508_v35 = vadd.f32 %v7507_v14, %v7464_v9 }
 0x874   : > { %v7509_v29 = vpop.f32.mrf.mxu0 }
 0x875   : > { %v7510_v18 = vadd.f32 %v7509_v29, %v7466_v53 }
 0x876   : > { %v7511_v6 = vpop.f32.mrf.mxu0 }
 0x877   : > { %v7512_v38 = vadd.f32 %v7511_v6, %v7468_v13 }
 0x878   : > { %v7513_v1 = vpop.f32.mrf.mxu0 }
 0x879   : > { %v7514_v25 = vadd.f32 %v7513_v1, %v7470_v15 }
 0x8aa   : > { %v7550_v2 = vpop.f32.mrf.mxu1 }
 0x8ab   : > { %v7551_v55 = vadd.f32 %v7550_v2, %v7508_v35 }
 0x8ac   : > { %v7552_v44 = vpop.f32.mrf.mxu1 }
 0x8ad   : > { %v7553_v3 = vadd.f32 %v7552_v44, %v7510_v18 }
 0x8ae   : > { %v7554_v16 = vpop.f32.mrf.mxu1 }
 0x8af   : > { %v7555_v32 = vadd.f32 %v7554_v16, %v7512_v38 }
 0x8b0   : > { %v7556_v30 = vpop.f32.mrf.mxu1 }
 0x8b1   : > { %v7557_v58 = vadd.f32 %v7556_v30, %v7514_v25 }
 0x8b2   : > { %v7593_v28 = vpop.f32.mrf.mxu0 }
 0x8b3   : > { %v7594_v45 = vadd.f32 %v7593_v28, %v7551_v55 }
 0x8b4   : > { %v7595_v31 = vpop.f32.mrf.mxu0 }
 0x8b5   : > { %v7596_v51 = vadd.f32 %v7595_v31, %v7553_v3 }
 0x8b6   : > { %v7597_v7 = vpop.f32.mrf.mxu0 }
 0x8b7   : > { %v7598_v19 = vadd.f32 %v7597_v7, %v7555_v32 }
 0x8b8   : > { %v7599_v47 = vpop.f32.mrf.mxu0 }
 0x8b9   : > { %v7600_v33 = vadd.f32 %v7599_v47, %v7557_v58 }
 0x8ea   : > { %v7636_v34 = vpop.f32.mrf.mxu1 }
 0x8eb   : > { %v7637_v0 = vadd.f32 %v7636_v34, %v7594_v45 }
 0x8ec   : > { %v7638_v36 = vpop.f32.mrf.mxu1 }
 0x8ed   : > { %v7639_v48 = vadd.f32 %v7638_v36, %v7596_v51 }
 0x8ee   : > { %v7640_v49 = vpop.f32.mrf.mxu1 }
 0x8ef   : > { %v7641_v46 = vadd.f32 %v7640_v49, %v7598_v19 }
 0x8f0   : > { %v7642_v50 = vpop.f32.mrf.mxu1 }
 0x8f1   : > { %v7643_v59 = vadd.f32 %v7642_v50, %v7600_v33 }
 0x8f2   : > { %v7679_v27 = vpop.f32.mrf.mxu0 }
 0x8f3   : > { %v7680_v40 = vadd.f32 %v7679_v27, %v7637_v0 }
 0x8f4   : > { %v7681_v57 = vpop.f32.mrf.mxu0 }
 0x8f5   : > { %v7736_v24 = vmul.f32 %v7717_v23, %v7680_v40  ;;  %v7682_v56 = vadd.f32 %v7681_v57, %v7639_v48 }
 0x8f6   : > { %v7683_v12 = vpop.f32.mrf.mxu0 }
 0x8f7   : > { %v7794_v20 = vadd.f32 %v7775_v41, %v7736_v24  ;;  %v7737_v42 = vmul.f32 %v7721_v54, %v7682_v56  ;;  %v7684_v62 = vadd.f32 %v7683_v12, %v7641_v46 }
 0x8f8   : > { %v7685_v63 = vpop.f32.mrf.mxu0 }
 0x8f9   : > { %v9091_v52 = vmul.f32 -1.442695, %v7794_v20  ;;  %v7795_v11 = vadd.f32 %v7779_v17, %v7737_v42  ;;  %v7744_v26 = vmul.f32 %v7717_v23, %v7684_v62  ;;  %v7686_v60 = vadd.f32 %v7685_v63, %v7643_v59 }
 0x8fb   : > { %9519 = vpow2.f32 %v9091_v52  ;;  %v9092_v39 = vmul.f32 -1.442695, %v7795_v11  ;;  %v7802_v5 = vadd.f32 %v7775_v41, %v7744_v26  ;;  %v7745_v43 = vmul.f32 %v7721_v54, %v7686_v60 }
 0x8fd   : > { %9521 = vpow2.f32 %v9092_v39  ;;  %v9099_v37 = vmul.f32 -1.442695, %v7802_v5  ;;  %v7803_v8 = vadd.f32 %v7779_v17, %v7745_v43 }
 0x8ff   : > { %9523 = vpow2.f32 %v9099_v37  ;;  %v9100_v4 = vmul.f32 -1.442695, %v7803_v8 }
 0x901   : > { %9525 = vpow2.f32 %v9100_v4 }
 0x908   : > { %v9520_v21 = vpop.eup %9519 }
 0x909   : > { %v7858_v22 = vadd.f32 1.0, %v9520_v21 }
 0x90a   : > { %v9522_v9 = vpop.eup %9521 }
 0x90b   : > { %9527 = vrcp.f32 %v7858_v22  ;;  %v7859_v53 = vadd.f32 1.0, %v9522_v9 }
 0x90c   : > { %v9524_v13 = vpop.eup %9523 }
 0x90d   : > { %9529 = vrcp.f32 %v7859_v53  ;;  %v7866_v14 = vadd.f32 1.0, %v9524_v13 }
 0x90e   : > { %v9526_v15 = vpop.eup %9525 }
 0x90f   : > { %9531 = vrcp.f32 %v7866_v14  ;;  %v7867_v29 = vadd.f32 1.0, %v9526_v15 }
 0x911   : > { %9533 = vrcp.f32 %v7867_v29 }
 0x918   : > { %v9528_v2 = vpop.eup %9527 }
 0x919   : > { %7906 = vst [vmem:[%s10644_s28 + $0x30] sm:$0xff] %v9528_v2 }
 0x91a   : > { %v9530_v6 = vpop.eup %9529 }
 0x91b   : > { %7907 = vst [vmem:[%s10644_s28 + $0x38] sm:$0xff] %v9530_v6 }
 0x91c   : > { %v9532_v44 = vpop.eup %9531 }
 0x91d   : > { %7914 = vst [vmem:[%s10644_s28 + $0x70] sm:$0xff] %v9532_v44 }
 0x91e   : > { %v9534_v1 = vpop.eup %9533 }
 0x91f   : > { %7915 = vst [vmem:[%s10644_s28 + $0x78] sm:$0xff] %v9534_v1 }
 0x920   : > { %9930 = shalt.err (!%p9927_p0)
}
 0x921   : > { %s9931_s26 = scalar_lea.hbm %s10771_s23, 2048  ;;  %s9935_s20 = scalar_lea.hbm %s10914_s1, 4096 }
 0x922   : > { %p9932_p2 = scmp.ne.s32.totalorder %s10771_s23, %s9931_s26  ;;  %p9936_p8 = scmp.lt.s32.totalorder %s10771_s23, %s10914_s1 }
 0x923   : > { %p9937_p13 = scmp.lt.s32.totalorder %s9935_s20, %s9931_s26 }
 0x924   : > { %p9933_p5 = pnand %p9932_p2, %p10915_p6 }
 0x925   : > { %p9938_p10 = por %p9937_p13, %p9936_p8 }
 0x926   : > { %p9934_p11 = pneg %p9933_p5 }
 0x928   : > { %p9939_p1 = pnand %p9938_p10, %p9934_p11 }
 0x92a   : > { %9942 = shalt.err (!%p9939_p1)
}
 0x92b   : > { %s10037_s17 = smov 1024   ;;  %s10038_s25 = smov 64  }
 0x92c   : > { %9176 = dma.vmem_to_hbm [thread:$0]  (%p10915_p6), %s10773_s5, 2048, %s10771_s23, %s7917_s6, %s10037_s17, %s10037_s17, %s10038_s25  }
 0x92d PF: > { %s10916_s21 = sld [smem:[#allocation35_spill]]  ;;  %p10919_p7 = scmp.ge.s32.totalorder %s10009_s16, 2 }
 0x92e   : > { %s10917_s28 = sld [smem:[#allocation39_spill]] }
 0x933   : > { %s7945_s27 = sand.u32 1, %s10916_s21  }
 0x934   : > { %p10918_p12 = scmp.ne.s32.totalorder %s10917_s28, 0  ;;  %s7946_s11 = scalar_lea.sflag [#allocation4], %s7945_s27 }
 0x936   : > { %p9223_p3 = pnand %p10919_p7, %p10918_p12 }
 0x938   : > { %p9224_p4 = pneg %p9223_p3 }
 0x93a   : > { %9992 = dma.done.wait (%p9224_p4), %s7946_s11, 2048  }
 0x93b   : > { %9994 = vsyncadd (%p9224_p4), %s7946_s11, 4294965248  ;;  %s10920_s16 = sld [smem:[#allocation37_spill]]  ;;  %s10923_s29 = smov %s10001_s30 }
 0x93c   : > { %s10921_s9 = sld [smem:[#allocation36_spill]] }
 0x93d   : > { %s10922_s15 = sld [smem:[#allocation38_spill]] }
 0x941   : > { %p36_p9 = scmp.ge.s32.totalorder %s10920_s16, 4  }
 0x942   : > { %s10924_s30 = smov %s10921_s9 }
 0x943   :  { %38 = sbr.rel (!%p36_p9) target bundleno = 23 (0x17), region = 189 }
 0x948   :  { %7951 = vsyncpa [#allocation3], 1 }
 0x949   :  { %7953 = vsyncpa [#allocation3 + $0x1], 1 }
 0x94a   :  { %7954 = vsyncpa [#allocation6], 1 }
 0x94b   :  { %7956 = vsyncpa [#allocation6 + $0x1], 1 }
 0x94c   :  { %7957 = vsyncpa [#allocation9], 1 }
 0x94d   :  { %7958 = vsyncpa [#allocation12], 1 }
 0x94e   :  { %7959 = vsyncpa [#allocation15], 1 }
 0x94f   :  { %7960 = vsyncpa [#allocation18], 1 }
 0x950   :  { %7961 = vsyncpa [#allocation21], 1 }
 0x951   :  { %7962 = vsyncpa [#allocation24], 1 }
 0x952   :  { %7963 = vsyncpa [#allocation4], 1 }
 0x953   :  { %7965 = vsyncpa [#allocation4 + $0x1], 1 }

</bundles_post_ra>
